<compile_context>
chip_gen: v7x
topology: tpu7x:2x2x1
jax: 0.10.0
libtpu: 0.0.40
codegen_flags: <defaults>
</compile_context>

<pallas_src>
import functools

import jax
import jax.numpy as jnp
from jax.experimental import pallas as pl
from jax.experimental.pallas import tpu as pltpu

EPS = 1e-5


# ----------------------------------------------------------------------------
# hardware-aware knobs
# ----------------------------------------------------------------------------
@functools.lru_cache(maxsize=None)
def _vmem_capacity():
    try:
        return int(pltpu.get_tpu_info().vmem_capacity_bytes)
    except Exception:
        return 64 * 1024 * 1024  # conservative (v7x-sized) fallback


def _vmem_limit_bytes():
    return min((_vmem_capacity() * 3) // 4, 96 * 1024 * 1024)


def _pick_tile_rows(h, w):
    """Even divisor of h (<= capacity-dependent target) with legal block dims; else h."""
    if h < 4:
        return h
    target = 64 if _vmem_capacity() >= 100 * 1024 * 1024 else 32
    cap = max(2, min(target, h // 2))
    best = None
    for th in range(2, cap + 1, 2):
        if h % th == 0 and ((th // 2) * w) % 8 == 0:
            best = th
    return best if best is not None else h


def _pick_chunk_rows(th, w, need_even, limit=512):
    divs = [d for d in range(1, th + 1)
            if th % d == 0 and (not need_even or d % 2 == 0)]
    if not divs:
        return th
    good = [d for d in divs if d * w <= limit]
    return max(good) if good else min(divs)


# ----------------------------------------------------------------------------
# small helpers
# ----------------------------------------------------------------------------
def _avgpool2(x):  # 2x2 avg pool, stride 2: (B,H,W,C) -> (B,H/2,W/2,C)
    B, H, W, C = x.shape
    return x.reshape(B, H // 2, 2, W // 2, 2, C).mean(axis=(2, 4))


def _upsample2(x):  # nearest, scale 2 (pure-JAX reference only)
    return jnp.repeat(jnp.repeat(x, 2, axis=1), 2, axis=2)


def _build_halo(xb, th):
    """Boundary rows for every row tile: (B, 2*nt, W+2, Cin); row 0 = above, row 1 = below."""
    B, H, Wp2, Cin = xb.shape
    nt = H // th
    zero = jnp.zeros((B, 1, Wp2, Cin), xb.dtype)
    top = jnp.concatenate([zero, xb[:, th - 1:H - 1:th]], axis=1)   # (B, nt, Wp2, Cin)
    bot = jnp.concatenate([xb[:, th:H:th], zero], axis=1)           # (B, nt, Wp2, Cin)
    return jnp.stack([top, bot], axis=2).reshape(B, 2 * nt, Wp2, Cin)


# ----------------------------------------------------------------------------
# Pallas kernels
# ----------------------------------------------------------------------------
def _conv3x3_kernel(*refs, rc, has_add):
    """3x3 / stride-1 / pad-1 conv over one row tile.

    body_ref: (1, th, W+2, Cin)   width-padded rows of this tile
    halo_ref: (1, 2,  W+2, Cin)   row above / row below the tile (zeros at image edges)
    w_ref:    (9*Cin, Cout)       K-packed weights, tap order (dx, dy, ci)
    add_ref:  (1, (th//2)*W, Cout) optional low-res L2H term (already W-repeated); it is
                                   nearest-upsampled 2x along rows here (fused add)
    o_ref:    (1, th*W, Cout)     flattened-spatial output slab
    """
    if has_add:
        body_ref, halo_ref, w_ref, add_ref, o_ref = refs
    else:
        body_ref, halo_ref, w_ref, o_ref = refs
        add_ref = None

    th, wp2, cin = body_ref.shape[1], body_ref.shape[2], body_ref.shape[3]
    w_out = wp2 - 2
    cout = w_ref.shape[-1]

    wmat = w_ref[...]                                                # resident in VMEM
    win = jnp.concatenate([halo_ref[0, 0:1], body_ref[0], halo_ref[0, 1:2]], axis=0)

    for c in range(th // rc):                                        # short static loop
        r0 = c * rc
        # in-VMEM K-packing: concat dy taps along channels, then dx taps -> (rc, W, 9*Cin)
        rowcat = jnp.concatenate([win[r0 + dy:r0 + dy + rc] for dy in range(3)], axis=-1)
        patch = jnp.concatenate([rowcat[:, dx:dx + w_out] for dx in range(3)], axis=-1)
        y = jnp.dot(patch.reshape(rc * w_out, 9 * cin), wmat,
                    preferred_element_type=jnp.float32)              # one MXU matmul / chunk
        if has_add:
            a = add_ref[0, (r0 // 2) * w_out:(r0 // 2 + rc // 2) * w_out, :]
            y = (y.reshape(rc // 2, 2, w_out, cout)
                 + a.reshape(rc // 2, 1, w_out, cout).astype(jnp.float32)
                 ).reshape(rc * w_out, cout)
        o_ref[0, r0 * w_out:(r0 + rc) * w_out, :] = y.astype(o_ref.dtype)  # one bulk store


def _inorm_kernel(*refs, relu, has_res, res_off, eps, inv_n):
    """InstanceNorm2d (no affine, biased var, two-pass stats) over flattened spatial axis.

    x: (1, n, Cc).  Optional fused ReLU; optional fused residual add where the residual
    has C >= Cc channels and the normalized channels occupy [res_off, res_off+Cc).
    """
    if has_res:
        x_ref, r_ref, o_ref = refs
    else:
        x_ref, o_ref = refs
        r_ref = None

    x = x_ref[0].astype(jnp.float32)
    mean = jnp.sum(x, axis=0, keepdims=True) * inv_n
    xc = x - mean
    var = jnp.sum(xc * xc, axis=0, keepdims=True) * inv_n
    y = xc * jax.lax.rsqrt(var + eps)
    if relu:
        y = jnp.maximum(y, 0.0)
    if has_res:
        r = r_ref[0].astype(jnp.float32)
        cc, c_full = x.shape[-1], r.shape[-1]
        pieces = []
        if res_off > 0:
            pieces.append(r[:, :res_off])
        pieces.append(r[:, res_off:res_off + cc] + y)
        if res_off + cc < c_full:
            pieces.append(r[:, res_off + cc:])
        y = jnp.concatenate(pieces, axis=-1) if len(pieces) > 1 else pieces[0]
    o_ref[0] = y.astype(o_ref.dtype)


# ----------------------------------------------------------------------------
# Pallas wrappers
# ----------------------------------------------------------------------------
def conv3x3_pallas(x, w_hwio, add_flat=None, *, compute_dtype=jnp.bfloat16, out_dtype=None):
    """y = conv3x3(x, w) [+ nearest_up2(add) fused in-kernel]; stride 1, pad 1, no bias.

    x:        (B, H, W, Cin) NHWC
    w_hwio:   (3, 3, Cin, Cout)
    add_flat: (B, (H//2)*W, Cout) or None -- low-res term already repeated 2x along W
              (flattened); repeated 2x along H inside the kernel.
    Returns the output with flattened spatial dims: (B, H*W, Cout).
    """
    B, H, W, Cin = x.shape
    Cout = w_hwio.shape[-1]
    if out_dtype is None:
        out_dtype = x.dtype
    cdt = compute_dtype

    th = _pick_tile_rows(H, W)
    nt = H // th
    rc = _pick_chunk_rows(th, W, need_even=add_flat is not None)
    wp2 = W + 2

    xb = jnp.pad(x.astype(cdt), ((0, 0), (0, 0), (1, 1), (0, 0)))    # single width pad
    halo = _build_halo(xb, th)                                        # (B, 2*nt, wp2, Cin)
    # K-packed weights; tap order (dx, dy, ci) to match the in-kernel concatenation order
    wmat = jnp.transpose(w_hwio, (1, 0, 2, 3)).reshape(9 * Cin, Cout).astype(cdt)

    inputs = [xb, halo, wmat]
    in_specs = [
        pl.BlockSpec((1, th, wp2, Cin), lambda b, t: (b, t, 0, 0)),
        pl.BlockSpec((1, 2, wp2, Cin), lambda b, t: (b, t, 0, 0)),
        pl.BlockSpec((9 * Cin, Cout), lambda b, t: (0, 0)),           # weights stay resident
    ]
    add_bytes = 0
    if add_flat is not None:
        add_flat = add_flat.astype(cdt)
        inputs.append(add_flat)
        in_specs.append(pl.BlockSpec((1, (th // 2) * W, Cout), lambda b, t: (b, t, 0)))
        add_bytes = add_flat.size * jnp.dtype(cdt).itemsize

    flops = 2 * B * H * W * 9 * Cin * Cout
    bytes_acc = ((xb.size + halo.size + wmat.size) * jnp.dtype(cdt).itemsize
                 + add_bytes + B * H * W * Cout * jnp.dtype(out_dtype).itemsize)

    kern = functools.partial(_conv3x3_kernel, rc=rc, has_add=add_flat is not None)
    out = pl.pallas_call(
        kern,
        out_shape=jax.ShapeDtypeStruct((B, H * W, Cout), out_dtype),
        grid=(B, nt),
        in_specs=in_specs,
        out_specs=pl.BlockSpec((1, th * W, Cout), lambda b, t: (b, t, 0)),
        compiler_params=pltpu.CompilerParams(
            dimension_semantics=("parallel", "parallel"),
            vmem_limit_bytes=_vmem_limit_bytes()),
        cost_estimate=pl.CostEstimate(flops=flops, transcendentals=0,
                                      bytes_accessed=int(bytes_acc)),
    )(*inputs)
    return out                                                        # (B, H*W, Cout)


def instance_norm_pallas(x_flat, residual=None, relu=False, res_offset=0, out_dtype=None):
    """InstanceNorm2d (no affine, eps=1e-5) on (B, n, Cc) with fused ReLU / residual add."""
    B, n, Cc = x_flat.shape
    if out_dtype is None:
        out_dtype = residual.dtype if residual is not None else x_flat.dtype
    C_out = residual.shape[-1] if residual is not None else Cc

    inputs = [x_flat]
    in_specs = [pl.BlockSpec((1, n, Cc), lambda b: (b, 0, 0))]
    if residual is not None:
        inputs.append(residual)
        in_specs.append(pl.BlockSpec((1, n, C_out), lambda b: (b, 0, 0)))

    kern = functools.partial(_inorm_kernel, relu=relu, has_res=residual is not None,
                             res_off=res_offset, eps=EPS, inv_n=1.0 / n)
    return pl.pallas_call(
        kern,
        out_shape=jax.ShapeDtypeStruct((B, n, C_out), out_dtype),
        grid=(B,),
        in_specs=in_specs,
        out_specs=pl.BlockSpec((1, n, C_out), lambda b: (b, 0, 0)),
        compiler_params=pltpu.CompilerParams(
            dimension_semantics=("parallel",), vmem_limit_bytes=_vmem_limit_bytes()),
    )(*inputs)


# ----------------------------------------------------------------------------
# ResidualOctBlock_basic forward
# ----------------------------------------------------------------------------
def _pack_weights(wH, wLH, wLL, wHL, h_rows, l_rows, Ch):
    """Masks folded into weights + channel shrinking.

    w_high: (3,3, n_h_in, Ch)          -- H2H restricted to live output channels
    w_low:  (3,3, n_l_in+n_h_in, C)    -- one low-res conv on [lf | pool(hf)] producing
                                          [masked L2H (Ch) | masked L2L+H2L (Cl)]
    """
    w_high = wH[:, :, h_rows, :Ch]
    top = jnp.concatenate([wLH[:, :, l_rows, :Ch], wLL[:, :, l_rows, Ch:]], axis=-1)
    n_h_in = w_high.shape[2]
    bot = jnp.concatenate([jnp.zeros((3, 3, n_h_in, Ch), wHL.dtype),
                           wHL[:, :, h_rows, Ch:]], axis=-1)
    w_low = jnp.concatenate([top, bot], axis=2)
    return w_high, w_low


def residual_oct_block(hf, lf, params, alpha_out=0.25, compute_dtype=jnp.bfloat16):
    """ResidualOctBlock_basic.forward((hf, lf)) with the module's default call args."""
    B, H, W, C = hf.shape
    assert H % 2 == 0 and W % 2 == 0, "octave conv needs even spatial dims"
    Ch = int(C * (1.0 - alpha_out))           # same rounding as the torch code
    cdt = compute_dtype

    def oct_layer(h_in, l_in, wH, wLH, wLL, wHL, h_rows, l_rows):
        w_high, w_low = _pack_weights(wH, wLH, wLL, wHL, h_rows, l_rows, Ch)
        Hh, Wh = h_in.shape[1], h_in.shape[2]
        low_in = jnp.concatenate([l_in, _avgpool2(h_in)], axis=-1)    # (B, Hh/2, Wh/2, ·)
        low_out = conv3x3_pallas(low_in, w_low, compute_dtype=cdt, out_dtype=cdt)
        l2h = low_out[..., :Ch].reshape(B, Hh // 2, Wh // 2, Ch)      # masked L2H (low-res)
        add = jnp.repeat(l2h, 2, axis=2).reshape(B, (Hh // 2) * Wh, Ch)  # W-repeat only
        l_pre = low_out[..., Ch:]                                     # masked lf output
        h_pre = conv3x3_pallas(h_in, w_high, add_flat=add,
                               compute_dtype=cdt, out_dtype=cdt)      # fused up+add
        return h_pre, l_pre

    full = slice(None)
    h1, l1 = oct_layer(hf, lf, params["c1_h2h"], params["c1_l2h"],
                       params["c1_l2l"], params["c1_h2l"], h_rows=full, l_rows=full)
    h1 = instance_norm_pallas(h1, relu=True, out_dtype=cdt).reshape(B, H, W, Ch)
    l1 = instance_norm_pallas(l1, relu=True, out_dtype=cdt).reshape(B, H // 2, W // 2, C - Ch)
    h2, l2 = oct_layer(h1, l1, params["c2_h2h"], params["c2_l2h"],
                       params["c2_l2l"], params["c2_h2l"],
                       h_rows=slice(0, Ch), l_rows=slice(Ch, C))
    out_h = instance_norm_pallas(h2, residual=hf.reshape(B, H * W, C), res_offset=0,
                                 out_dtype=hf.dtype).reshape(B, H, W, C)
    out_l = instance_norm_pallas(l2, residual=lf.reshape(B, (H // 2) * (W // 2), C),
                                 res_offset=Ch,
                                 out_dtype=lf.dtype).reshape(B, H // 2, W // 2, C)
    return out_h, out_l


# ----------------------------------------------------------------------------
# Pure-JAX reference (mirrors the PyTorch semantics) for correctness checks
# ----------------------------------------------------------------------------
def _conv3x3_ref(x, w):
    return jax.lax.conv_general_dilated(
        x, w, window_strides=(1, 1), padding=((1, 1), (1, 1)),
        dimension_numbers=("NHWC", "HWIO", "NHWC"),
        precision=jax.lax.Precision.HIGHEST)


def _inorm_ref(x):
    mean = x.mean(axis=(1, 2), keepdims=True)
    var = ((x - mean) ** 2).mean(axis=(1, 2), keepdims=True)
    return (x - mean) * jax.lax.rsqrt(var + EPS)


def _oct_conv_normal_ref(hf, lf, w_h2h, w_l2h, w_l2l, w_h2l, mask_hf, mask_lf):
    hf_out = (_conv3x3_ref(hf, w_h2h) + _upsample2(_conv3x3_ref(lf, w_l2h))) * mask_hf
    lf_out = (_conv3x3_ref(lf, w_l2l) + _conv3x3_ref(_avgpool2(hf), w_h2l)) * mask_lf
    return hf_out, lf_out


def residual_oct_block_ref(hf, lf, params, alpha_out=0.25):
    C = hf.shape[-1]
    hf_ch_out = int(C * (1.0 - alpha_out))
    mask_hf = (jnp.arange(C) < hf_ch_out).astype(jnp.float32)
    mask_lf = 1.0 - mask_hf
    h, l = _oct_conv_normal_ref(hf, lf, params["c1_h2h"], params["c1_l2h"],
                                params["c1_l2l"], params["c1_h2l"], mask_hf, mask_lf)
    h = jnp.maximum(_inorm_ref(h), 0.0)
    l = jnp.maximum(_inorm_ref(l), 0.0)
    h, l = _oct_conv_normal_ref(h, l, params["c2_h2h"], params["c2_l2h"],
                                params["c2_l2l"], params["c2_h2l"], mask_hf, mask_lf)
    return hf + _inorm_ref(h), lf + _inorm_ref(l)


# ----------------------------------------------------------------------------
def init_params(key, C):
    names = ["c1_h2h", "c1_l2h", "c1_l2l", "c1_h2l",
             "c2_h2h", "c2_l2h", "c2_l2l", "c2_h2l"]
    keys = jax.random.split(key, len(names))
    return {n: jax.random.normal(k, (3, 3, C, C), jnp.float32) * 0.1
            for n, k in zip(names, keys)}


if __name__ == "__main__":
    key = jax.random.PRNGKey(0)
    k_hf, k_lf, k_w = jax.random.split(key, 3)

    B, C, H, W = 2, 4, 16, 16                      # conv_dim = C = 4 (small synthetic)
    hf = jax.random.normal(k_hf, (B, H, W, C), jnp.float32)            # high-freq stream
    lf = jax.random.normal(k_lf, (B, H // 2, W // 2, C), jnp.float32)  # low-freq stream
    params = init_params(k_w, C)

    ref_h, ref_l = residual_oct_block_ref(hf, lf, params)

    # default bf16-compute / f32-accumulate path
    fwd_bf16 = jax.jit(functools.partial(residual_oct_block, compute_dtype=jnp.bfloat16))
    out_h, out_l = fwd_bf16(hf, lf, params)
    jax.block_until_ready((out_h, out_l))
    err_h = float(jnp.max(jnp.abs(out_h - ref_h)))
    err_l = float(jnp.max(jnp.abs(out_l - ref_l)))
    assert err_h < 2e-1 and err_l < 2e-1, ("bf16", err_h, err_l)

    # f32 path (tight check against the f32 reference of the torch semantics)
    fwd_f32 = jax.jit(functools.partial(residual_oct_block, compute_dtype=jnp.float32))
    out_h32, out_l32 = fwd_f32(hf, lf, params)
    jax.block_until_ready((out_h32, out_l32))
    err_h32 = float(jnp.max(jnp.abs(out_h32 - ref_h)))
    err_l32 = float(jnp.max(jnp.abs(out_l32 - ref_l)))
    assert err_h32 < 2e-2 and err_l32 < 2e-2, ("f32", err_h32, err_l32)

    print("KERNEL_OK")
</pallas_src>

<mosaic_0001>
module attributes {stable_mosaic.version = 11 : i64} {
  func.func @_conv3x3_kernel(%arg0: i32, %arg1: i32, %arg2: memref<1x4x10x8xbf16, #tpu.memory_space<vmem>>, %arg3: memref<1x2x10x8xbf16, #tpu.memory_space<vmem>>, %arg4: memref<72x4xbf16, #tpu.memory_space<vmem>>, %arg5: memref<1x32x4xbf16, #tpu.memory_space<vmem>>) attributes {dimension_semantics = [#tpu.dimension_semantics<parallel>, #tpu.dimension_semantics<parallel>], iteration_bounds = array<i64: 2, 2>, scalar_prefetch = 0 : i64, scratch_operands = 0 : i64, tpu.core_type = #tpu.core_type<tc>, window_params = [{transform_indices = @transform_0, window_bounds = array<i64: 1, 4, 10, 8>}, {transform_indices = @transform_1, window_bounds = array<i64: 1, 2, 10, 8>}, {pipeline_mode = #tpu.pipeline_mode<synchronous>, transform_indices = @transform_2, window_bounds = array<i64: 72, 4>}, {transform_indices = @transform_3, window_bounds = array<i64: 1, 32, 4>}]} {
    %c0 = arith.constant 0 : index
    %c0_0 = arith.constant 0 : index
    %0 = vector.load %arg4[%c0, %c0_0] : memref<72x4xbf16, #tpu.memory_space<vmem>>, vector<72x4xbf16>
    %c0_1 = arith.constant 0 : index
    %c0_2 = arith.constant 0 : index
    %c0_3 = arith.constant 0 : index
    %c0_4 = arith.constant 0 : index
    %1 = vector.load %arg3[%c0_1, %c0_2, %c0_3, %c0_4] : memref<1x2x10x8xbf16, #tpu.memory_space<vmem>>, vector<1x1x10x8xbf16>
    %2 = vector.shape_cast %1 : vector<1x1x10x8xbf16> to vector<1x10x8xbf16>
    %c0_5 = arith.constant 0 : index
    %c0_6 = arith.constant 0 : index
    %c0_7 = arith.constant 0 : index
    %c0_8 = arith.constant 0 : index
    %3 = vector.load %arg2[%c0_5, %c0_6, %c0_7, %c0_8] : memref<1x4x10x8xbf16, #tpu.memory_space<vmem>>, vector<1x4x10x8xbf16>
    %4 = vector.shape_cast %3 : vector<1x4x10x8xbf16> to vector<4x10x8xbf16>
    %c0_9 = arith.constant 0 : index
    %c1 = arith.constant 1 : index
    %c0_10 = arith.constant 0 : index
    %c0_11 = arith.constant 0 : index
    %5 = vector.load %arg3[%c0_9, %c1, %c0_10, %c0_11] : memref<1x2x10x8xbf16, #tpu.memory_space<vmem>>, vector<1x1x10x8xbf16>
    %6 = vector.shape_cast %5 : vector<1x1x10x8xbf16> to vector<1x10x8xbf16>
    %7 = tpu.concatenate %2, %4, %6 in 0 : vector<1x10x8xbf16>, vector<4x10x8xbf16>, vector<1x10x8xbf16> -> vector<6x10x8xbf16>
    %8 = vector.extract_strided_slice %7 {offsets = [0, 0, 0], sizes = [4, 10, 8], strides = [1, 1, 1]} : vector<6x10x8xbf16> to vector<4x10x8xbf16>
    %9 = vector.extract_strided_slice %7 {offsets = [1, 0, 0], sizes = [4, 10, 8], strides = [1, 1, 1]} : vector<6x10x8xbf16> to vector<4x10x8xbf16>
    %10 = vector.extract_strided_slice %7 {offsets = [2, 0, 0], sizes = [4, 10, 8], strides = [1, 1, 1]} : vector<6x10x8xbf16> to vector<4x10x8xbf16>
    %11 = tpu.concatenate %8, %9, %10 in 2 : vector<4x10x8xbf16>, vector<4x10x8xbf16>, vector<4x10x8xbf16> -> vector<4x10x24xbf16>
    %12 = vector.extract_strided_slice %11 {offsets = [0, 0, 0], sizes = [4, 8, 24], strides = [1, 1, 1]} : vector<4x10x24xbf16> to vector<4x8x24xbf16>
    %13 = vector.extract_strided_slice %11 {offsets = [0, 1, 0], sizes = [4, 8, 24], strides = [1, 1, 1]} : vector<4x10x24xbf16> to vector<4x8x24xbf16>
    %14 = vector.extract_strided_slice %11 {offsets = [0, 2, 0], sizes = [4, 8, 24], strides = [1, 1, 1]} : vector<4x10x24xbf16> to vector<4x8x24xbf16>
    %15 = tpu.concatenate %12, %13, %14 in 2 : vector<4x8x24xbf16>, vector<4x8x24xbf16>, vector<4x8x24xbf16> -> vector<4x8x72xbf16>
    %16 = vector.shape_cast %15 : vector<4x8x72xbf16> to vector<32x72xbf16>
    %cst = arith.constant dense<0.000000e+00> : vector<32x4xf32>
    %17 = tpu.matmul %16, %0, %cst {dimension_numbers = #tpu.dot_dimension_numbers<[1], [0], [0], [1], [0, 0, 1, 1], [], []>} : vector<32x72xbf16>, vector<72x4xbf16>, vector<32x4xf32> -> vector<32x4xf32>
    %18 = arith.truncf %17 : vector<32x4xf32> to vector<32x4xbf16>
    %c0_12 = arith.constant 0 : index
    %c0_13 = arith.constant 0 : index
    %c0_14 = arith.constant 0 : index
    %19 = vector.load %arg5[%c0_12, %c0_13, %c0_14] : memref<1x32x4xbf16, #tpu.memory_space<vmem>>, vector<1x32x4xbf16>
    %20 = vector.shape_cast %19 : vector<1x32x4xbf16> to vector<32x4xbf16>
    %21 = vector.shape_cast %18 : vector<32x4xbf16> to vector<1x32x4xbf16>
    tpu.vector_store %arg5[%c0_12, %c0_13, %c0_14], %21 {strides = array<i32>} : memref<1x32x4xbf16, #tpu.memory_space<vmem>>, vector<1x32x4xbf16>,
    return
  }
  func.func @transform_0(%arg0: i32, %arg1: i32) -> (i32, i32, i32, i32) {
    %c0_i32 = arith.constant 0 : i32
    %c0_i32_0 = arith.constant 0 : i32
    %c0_i32_1 = arith.constant 0 : i32
    return %arg0, %arg1, %c0_i32, %c0_i32_0 : i32, i32, i32, i32
  }
  func.func @transform_1(%arg0: i32, %arg1: i32) -> (i32, i32, i32, i32) {
    %c0_i32 = arith.constant 0 : i32
    %c0_i32_0 = arith.constant 0 : i32
    %c0_i32_1 = arith.constant 0 : i32
    return %arg0, %arg1, %c0_i32, %c0_i32_0 : i32, i32, i32, i32
  }
  func.func @transform_2(%arg0: i32, %arg1: i32) -> (i32, i32) {
    %c0_i32 = arith.constant 0 : i32
    %c0_i32_0 = arith.constant 0 : i32
    %c0_i32_1 = arith.constant 0 : i32
    return %c0_i32, %c0_i32_0 : i32, i32
  }
  func.func @transform_3(%arg0: i32, %arg1: i32) -> (i32, i32, i32) {
    %c0_i32 = arith.constant 0 : i32
    %c0_i32_0 = arith.constant 0 : i32
    return %arg0, %arg1, %c0_i32 : i32, i32, i32
  }
}

module attributes {stable_mosaic.version = 11 : i64} {
  func.func @_inorm_kernel(%arg0: i32, %arg1: memref<1x256x3xbf16, #tpu.memory_space<vmem>>, %arg2: memref<1x256x3xbf16, #tpu.memory_space<vmem>>) attributes {dimension_semantics = [#tpu.dimension_semantics<parallel>], iteration_bounds = array<i64: 2>, scalar_prefetch = 0 : i64, scratch_operands = 0 : i64, tpu.core_type = #tpu.core_type<tc>, window_params = [{transform_indices = @transform_0, window_bounds = array<i64: 1, 256, 3>}, {transform_indices = @transform_1, window_bounds = array<i64: 1, 256, 3>}]} {
    %c0 = arith.constant 0 : index
    %c0_0 = arith.constant 0 : index
    %c0_1 = arith.constant 0 : index
    %0 = vector.load %arg1[%c0, %c0_0, %c0_1] : memref<1x256x3xbf16, #tpu.memory_space<vmem>>, vector<1x256x3xbf16>
    %1 = vector.shape_cast %0 : vector<1x256x3xbf16> to vector<256x3xbf16>
    %2 = arith.extf %1 : vector<256x3xbf16> to vector<256x3xf32>
    %cst = arith.constant dense<0.000000e+00> : vector<3xf32>
    %3 = vector.multi_reduction <add>, %2, %cst [0] : vector<256x3xf32> to vector<3xf32>
    %4 = vector.shape_cast %3 : vector<3xf32> to vector<1x3xf32>
    %cst_2 = arith.constant 3.906250e-03 : f32
    %5 = vector.broadcast %cst_2 : f32 to vector<1x3xf32>
    %6 = arith.mulf %4, %5 : vector<1x3xf32>
    %7 = vector.broadcast %6 : vector<1x3xf32> to vector<256x3xf32>
    %8 = arith.subf %2, %7 : vector<256x3xf32>
    %9 = arith.mulf %8, %8 : vector<256x3xf32>
    %cst_3 = arith.constant dense<0.000000e+00> : vector<3xf32>
    %10 = vector.multi_reduction <add>, %9, %cst_3 [0] : vector<256x3xf32> to vector<3xf32>
    %11 = vector.shape_cast %10 : vector<3xf32> to vector<1x3xf32>
    %cst_4 = arith.constant 3.906250e-03 : f32
    %12 = vector.broadcast %cst_4 : f32 to vector<1x3xf32>
    %13 = arith.mulf %11, %12 : vector<1x3xf32>
    %cst_5 = arith.constant 9.99999974E-6 : f32
    %14 = vector.broadcast %cst_5 : f32 to vector<1x3xf32>
    %15 = arith.addf %13, %14 : vector<1x3xf32>
    %16 = math.rsqrt %15 : vector<1x3xf32>
    %17 = vector.broadcast %16 : vector<1x3xf32> to vector<256x3xf32>
    %18 = arith.mulf %8, %17 : vector<256x3xf32>
    %cst_6 = arith.constant 0.000000e+00 : f32
    %19 = vector.broadcast %cst_6 : f32 to vector<256x3xf32>
    %20 = arith.maximumf %18, %19 : vector<256x3xf32>
    %21 = arith.truncf %20 : vector<256x3xf32> to vector<256x3xbf16>
    %c0_7 = arith.constant 0 : index
    %c0_8 = arith.constant 0 : index
    %c0_9 = arith.constant 0 : index
    %22 = vector.load %arg2[%c0_7, %c0_8, %c0_9] : memref<1x256x3xbf16, #tpu.memory_space<vmem>>, vector<1x256x3xbf16>
    %23 = vector.shape_cast %22 : vector<1x256x3xbf16> to vector<256x3xbf16>
    %24 = vector.shape_cast %21 : vector<256x3xbf16> to vector<1x256x3xbf16>
    tpu.vector_store %arg2[%c0_7, %c0_8, %c0_9], %24 {strides = array<i32>} : memref<1x256x3xbf16, #tpu.memory_space<vmem>>, vector<1x256x3xbf16>,
    return
  }
  func.func @transform_0(%arg0: i32) -> (i32, i32, i32) {
    %c0_i32 = arith.constant 0 : i32
    %c0_i32_0 = arith.constant 0 : i32
    %c0_i32_1 = arith.constant 0 : i32
    return %arg0, %c0_i32, %c0_i32_0 : i32, i32, i32
  }
  func.func @transform_1(%arg0: i32) -> (i32, i32, i32) {
    %c0_i32 = arith.constant 0 : i32
    %c0_i32_0 = arith.constant 0 : i32
    %c0_i32_1 = arith.constant 0 : i32
    return %arg0, %c0_i32, %c0_i32_0 : i32, i32, i32
  }
}

module attributes {stable_mosaic.version = 11 : i64} {
  func.func @_conv3x3_kernel(%arg0: i32, %arg1: i32, %arg2: memref<1x8x18x4xbf16, #tpu.memory_space<vmem>>, %arg3: memref<1x2x18x4xbf16, #tpu.memory_space<vmem>>, %arg4: memref<36x3xbf16, #tpu.memory_space<vmem>>, %arg5: memref<1x64x3xbf16, #tpu.memory_space<vmem>>, %arg6: memref<1x128x3xbf16, #tpu.memory_space<vmem>>) attributes {dimension_semantics = [#tpu.dimension_semantics<parallel>, #tpu.dimension_semantics<parallel>], iteration_bounds = array<i64: 2, 2>, scalar_prefetch = 0 : i64, scratch_operands = 0 : i64, tpu.core_type = #tpu.core_type<tc>, window_params = [{transform_indices = @transform_0, window_bounds = array<i64: 1, 8, 18, 4>}, {transform_indices = @transform_1, window_bounds = array<i64: 1, 2, 18, 4>}, {pipeline_mode = #tpu.pipeline_mode<synchronous>, transform_indices = @transform_2, window_bounds = array<i64: 36, 3>}, {transform_indices = @transform_3, window_bounds = array<i64: 1, 64, 3>}, {transform_indices = @transform_4, window_bounds = array<i64: 1, 128, 3>}]} {
    %c0 = arith.constant 0 : index
    %c0_0 = arith.constant 0 : index
    %0 = vector.load %arg4[%c0, %c0_0] : memref<36x3xbf16, #tpu.memory_space<vmem>>, vector<36x3xbf16>
    %c0_1 = arith.constant 0 : index
    %c0_2 = arith.constant 0 : index
    %c0_3 = arith.constant 0 : index
    %c0_4 = arith.constant 0 : index
    %1 = vector.load %arg3[%c0_1, %c0_2, %c0_3, %c0_4] : memref<1x2x18x4xbf16, #tpu.memory_space<vmem>>, vector<1x1x18x4xbf16>
    %2 = vector.shape_cast %1 : vector<1x1x18x4xbf16> to vector<1x18x4xbf16>
    %c0_5 = arith.constant 0 : index
    %c0_6 = arith.constant 0 : index
    %c0_7 = arith.constant 0 : index
    %c0_8 = arith.constant 0 : index
    %3 = vector.load %arg2[%c0_5, %c0_6, %c0_7, %c0_8] : memref<1x8x18x4xbf16, #tpu.memory_space<vmem>>, vector<1x8x18x4xbf16>
    %4 = vector.shape_cast %3 : vector<1x8x18x4xbf16> to vector<8x18x4xbf16>
    %c0_9 = arith.constant 0 : index
    %c1 = arith.constant 1 : index
    %c0_10 = arith.constant 0 : index
    %c0_11 = arith.constant 0 : index
    %5 = vector.load %arg3[%c0_9, %c1, %c0_10, %c0_11] : memref<1x2x18x4xbf16, #tpu.memory_space<vmem>>, vector<1x1x18x4xbf16>
    %6 = vector.shape_cast %5 : vector<1x1x18x4xbf16> to vector<1x18x4xbf16>
    %7 = tpu.concatenate %2, %4, %6 in 0 : vector<1x18x4xbf16>, vector<8x18x4xbf16>, vector<1x18x4xbf16> -> vector<10x18x4xbf16>
    %8 = vector.extract_strided_slice %7 {offsets = [0, 0, 0], sizes = [8, 18, 4], strides = [1, 1, 1]} : vector<10x18x4xbf16> to vector<8x18x4xbf16>
    %9 = vector.extract_strided_slice %7 {offsets = [1, 0, 0], sizes = [8, 18, 4], strides = [1, 1, 1]} : vector<10x18x4xbf16> to vector<8x18x4xbf16>
    %10 = vector.extract_strided_slice %7 {offsets = [2, 0, 0], sizes = [8, 18, 4], strides = [1, 1, 1]} : vector<10x18x4xbf16> to vector<8x18x4xbf16>
    %11 = tpu.concatenate %8, %9, %10 in 2 : vector<8x18x4xbf16>, vector<8x18x4xbf16>, vector<8x18x4xbf16> -> vector<8x18x12xbf16>
    %12 = vector.extract_strided_slice %11 {offsets = [0, 0, 0], sizes = [8, 16, 12], strides = [1, 1, 1]} : vector<8x18x12xbf16> to vector<8x16x12xbf16>
    %13 = vector.extract_strided_slice %11 {offsets = [0, 1, 0], sizes = [8, 16, 12], strides = [1, 1, 1]} : vector<8x18x12xbf16> to vector<8x16x12xbf16>
    %14 = vector.extract_strided_slice %11 {offsets = [0, 2, 0], sizes = [8, 16, 12], strides = [1, 1, 1]} : vector<8x18x12xbf16> to vector<8x16x12xbf16>
    %15 = tpu.concatenate %12, %13, %14 in 2 : vector<8x16x12xbf16>, vector<8x16x12xbf16>, vector<8x16x12xbf16> -> vector<8x16x36xbf16>
    %16 = vector.shape_cast %15 : vector<8x16x36xbf16> to vector<128x36xbf16>
    %cst = arith.constant dense<0.000000e+00> : vector<128x3xf32>
    %17 = tpu.matmul %16, %0, %cst {dimension_numbers = #tpu.dot_dimension_numbers<[1], [0], [0], [1], [0, 0, 1, 1], [], []>} : vector<128x36xbf16>, vector<36x3xbf16>, vector<128x3xf32> -> vector<128x3xf32>
    %c0_12 = arith.constant 0 : index
    %c0_13 = arith.constant 0 : index
    %c0_14 = arith.constant 0 : index
    %18 = vector.load %arg5[%c0_12, %c0_13, %c0_14] : memref<1x64x3xbf16, #tpu.memory_space<vmem>>, vector<1x64x3xbf16>
    %19 = vector.shape_cast %18 : vector<1x64x3xbf16> to vector<64x3xbf16>
    %20 = vector.shape_cast %17 : vector<128x3xf32> to vector<4x2x16x3xf32>
    %21 = vector.shape_cast %19 : vector<64x3xbf16> to vector<4x1x16x3xbf16>
    %22 = arith.extf %21 : vector<4x1x16x3xbf16> to vector<4x1x16x3xf32>
    %23 = vector.broadcast %22 : vector<4x1x16x3xf32> to vector<4x2x16x3xf32>
    %24 = arith.addf %20, %23 : vector<4x2x16x3xf32>
    %25 = vector.shape_cast %24 : vector<4x2x16x3xf32> to vector<128x3xf32>
    %26 = arith.truncf %25 : vector<128x3xf32> to vector<128x3xbf16>
    %c0_15 = arith.constant 0 : index
    %c0_16 = arith.constant 0 : index
    %c0_17 = arith.constant 0 : index
    %27 = vector.load %arg6[%c0_15, %c0_16, %c0_17] : memref<1x128x3xbf16, #tpu.memory_space<vmem>>, vector<1x128x3xbf16>
    %28 = vector.shape_cast %27 : vector<1x128x3xbf16> to vector<128x3xbf16>
    %29 = vector.shape_cast %26 : vector<128x3xbf16> to vector<1x128x3xbf16>
    tpu.vector_store %arg6[%c0_15, %c0_16, %c0_17], %29 {strides = array<i32>} : memref<1x128x3xbf16, #tpu.memory_space<vmem>>, vector<1x128x3xbf16>,
    return
  }
  func.func @transform_0(%arg0: i32, %arg1: i32) -> (i32, i32, i32, i32) {
    %c0_i32 = arith.constant 0 : i32
    %c0_i32_0 = arith.constant 0 : i32
    %c0_i32_1 = arith.constant 0 : i32
    return %arg0, %arg1, %c0_i32, %c0_i32_0 : i32, i32, i32, i32
  }
  func.func @transform_1(%arg0: i32, %arg1: i32) -> (i32, i32, i32, i32) {
    %c0_i32 = arith.constant 0 : i32
    %c0_i32_0 = arith.constant 0 : i32
    %c0_i32_1 = arith.constant 0 : i32
    return %arg0, %arg1, %c0_i32, %c0_i32_0 : i32, i32, i32, i32
  }
  func.func @transform_2(%arg0: i32, %arg1: i32) -> (i32, i32) {
    %c0_i32 = arith.constant 0 : i32
    %c0_i32_0 = arith.constant 0 : i32
    %c0_i32_1 = arith.constant 0 : i32
    return %c0_i32, %c0_i32_0 : i32, i32
  }
  func.func @transform_3(%arg0: i32, %arg1: i32) -> (i32, i32, i32) {
    %c0_i32 = arith.constant 0 : i32
    %c0_i32_0 = arith.constant 0 : i32
    return %arg0, %arg1, %c0_i32 : i32, i32, i32
  }
  func.func @transform_4(%arg0: i32, %arg1: i32) -> (i32, i32, i32) {
    %c0_i32 = arith.constant 0 : i32
    %c0_i32_0 = arith.constant 0 : i32
    return %arg0, %arg1, %c0_i32 : i32, i32, i32
  }
}

module attributes {stable_mosaic.version = 11 : i64} {
  func.func @_inorm_kernel(%arg0: i32, %arg1: memref<1x64x1xbf16, #tpu.memory_space<vmem>>, %arg2: memref<1x64x1xbf16, #tpu.memory_space<vmem>>) attributes {dimension_semantics = [#tpu.dimension_semantics<parallel>], iteration_bounds = array<i64: 2>, scalar_prefetch = 0 : i64, scratch_operands = 0 : i64, tpu.core_type = #tpu.core_type<tc>, window_params = [{transform_indices = @transform_0, window_bounds = array<i64: 1, 64, 1>}, {transform_indices = @transform_1, window_bounds = array<i64: 1, 64, 1>}]} {
    %c0 = arith.constant 0 : index
    %c0_0 = arith.constant 0 : index
    %c0_1 = arith.constant 0 : index
    %0 = vector.load %arg1[%c0, %c0_0, %c0_1] : memref<1x64x1xbf16, #tpu.memory_space<vmem>>, vector<1x64x1xbf16>
    %1 = vector.shape_cast %0 : vector<1x64x1xbf16> to vector<64x1xbf16>
    %2 = arith.extf %1 : vector<64x1xbf16> to vector<64x1xf32>
    %cst = arith.constant dense<0.000000e+00> : vector<1xf32>
    %3 = vector.multi_reduction <add>, %2, %cst [0] : vector<64x1xf32> to vector<1xf32>
    %4 = vector.shape_cast %3 : vector<1xf32> to vector<1x1xf32>
    %cst_2 = arith.constant 1.562500e-02 : f32
    %5 = vector.broadcast %cst_2 : f32 to vector<1x1xf32>
    %6 = arith.mulf %4, %5 : vector<1x1xf32>
    %7 = vector.broadcast %6 : vector<1x1xf32> to vector<64x1xf32>
    %8 = arith.subf %2, %7 : vector<64x1xf32>
    %9 = arith.mulf %8, %8 : vector<64x1xf32>
    %cst_3 = arith.constant dense<0.000000e+00> : vector<1xf32>
    %10 = vector.multi_reduction <add>, %9, %cst_3 [0] : vector<64x1xf32> to vector<1xf32>
    %11 = vector.shape_cast %10 : vector<1xf32> to vector<1x1xf32>
    %cst_4 = arith.constant 1.562500e-02 : f32
    %12 = vector.broadcast %cst_4 : f32 to vector<1x1xf32>
    %13 = arith.mulf %11, %12 : vector<1x1xf32>
    %cst_5 = arith.constant 9.99999974E-6 : f32
    %14 = vector.broadcast %cst_5 : f32 to vector<1x1xf32>
    %15 = arith.addf %13, %14 : vector<1x1xf32>
    %16 = math.rsqrt %15 : vector<1x1xf32>
    %17 = vector.broadcast %16 : vector<1x1xf32> to vector<64x1xf32>
    %18 = arith.mulf %8, %17 : vector<64x1xf32>
    %cst_6 = arith.constant 0.000000e+00 : f32
    %19 = vector.broadcast %cst_6 : f32 to vector<64x1xf32>
    %20 = arith.maximumf %18, %19 : vector<64x1xf32>
    %21 = arith.truncf %20 : vector<64x1xf32> to vector<64x1xbf16>
    %c0_7 = arith.constant 0 : index
    %c0_8 = arith.constant 0 : index
    %c0_9 = arith.constant 0 : index
    %22 = vector.load %arg2[%c0_7, %c0_8, %c0_9] : memref<1x64x1xbf16, #tpu.memory_space<vmem>>, vector<1x64x1xbf16>
    %23 = vector.shape_cast %22 : vector<1x64x1xbf16> to vector<64x1xbf16>
    %24 = vector.shape_cast %21 : vector<64x1xbf16> to vector<1x64x1xbf16>
    tpu.vector_store %arg2[%c0_7, %c0_8, %c0_9], %24 {strides = array<i32>} : memref<1x64x1xbf16, #tpu.memory_space<vmem>>, vector<1x64x1xbf16>,
    return
  }
  func.func @transform_0(%arg0: i32) -> (i32, i32, i32) {
    %c0_i32 = arith.constant 0 : i32
    %c0_i32_0 = arith.constant 0 : i32
    %c0_i32_1 = arith.constant 0 : i32
    return %arg0, %c0_i32, %c0_i32_0 : i32, i32, i32
  }
  func.func @transform_1(%arg0: i32) -> (i32, i32, i32) {
    %c0_i32 = arith.constant 0 : i32
    %c0_i32_0 = arith.constant 0 : i32
    %c0_i32_1 = arith.constant 0 : i32
    return %arg0, %c0_i32, %c0_i32_0 : i32, i32, i32
  }
}

module attributes {stable_mosaic.version = 11 : i64} {
  func.func @_conv3x3_kernel(%arg0: i32, %arg1: i32, %arg2: memref<1x4x10x4xbf16, #tpu.memory_space<vmem>>, %arg3: memref<1x2x10x4xbf16, #tpu.memory_space<vmem>>, %arg4: memref<36x4xbf16, #tpu.memory_space<vmem>>, %arg5: memref<1x32x4xbf16, #tpu.memory_space<vmem>>) attributes {dimension_semantics = [#tpu.dimension_semantics<parallel>, #tpu.dimension_semantics<parallel>], iteration_bounds = array<i64: 2, 2>, scalar_prefetch = 0 : i64, scratch_operands = 0 : i64, tpu.core_type = #tpu.core_type<tc>, window_params = [{transform_indices = @transform_0, window_bounds = array<i64: 1, 4, 10, 4>}, {transform_indices = @transform_1, window_bounds = array<i64: 1, 2, 10, 4>}, {pipeline_mode = #tpu.pipeline_mode<synchronous>, transform_indices = @transform_2, window_bounds = array<i64: 36, 4>}, {transform_indices = @transform_3, window_bounds = array<i64: 1, 32, 4>}]} {
    %c0 = arith.constant 0 : index
    %c0_0 = arith.constant 0 : index
    %0 = vector.load %arg4[%c0, %c0_0] : memref<36x4xbf16, #tpu.memory_space<vmem>>, vector<36x4xbf16>
    %c0_1 = arith.constant 0 : index
    %c0_2 = arith.constant 0 : index
    %c0_3 = arith.constant 0 : index
    %c0_4 = arith.constant 0 : index
    %1 = vector.load %arg3[%c0_1, %c0_2, %c0_3, %c0_4] : memref<1x2x10x4xbf16, #tpu.memory_space<vmem>>, vector<1x1x10x4xbf16>
    %2 = vector.shape_cast %1 : vector<1x1x10x4xbf16> to vector<1x10x4xbf16>
    %c0_5 = arith.constant 0 : index
    %c0_6 = arith.constant 0 : index
    %c0_7 = arith.constant 0 : index
    %c0_8 = arith.constant 0 : index
    %3 = vector.load %arg2[%c0_5, %c0_6, %c0_7, %c0_8] : memref<1x4x10x4xbf16, #tpu.memory_space<vmem>>, vector<1x4x10x4xbf16>
    %4 = vector.shape_cast %3 : vector<1x4x10x4xbf16> to vector<4x10x4xbf16>
    %c0_9 = arith.constant 0 : index
    %c1 = arith.constant 1 : index
    %c0_10 = arith.constant 0 : index
    %c0_11 = arith.constant 0 : index
    %5 = vector.load %arg3[%c0_9, %c1, %c0_10, %c0_11] : memref<1x2x10x4xbf16, #tpu.memory_space<vmem>>, vector<1x1x10x4xbf16>
    %6 = vector.shape_cast %5 : vector<1x1x10x4xbf16> to vector<1x10x4xbf16>
    %7 = tpu.concatenate %2, %4, %6 in 0 : vector<1x10x4xbf16>, vector<4x10x4xbf16>, vector<1x10x4xbf16> -> vector<6x10x4xbf16>
    %8 = vector.extract_strided_slice %7 {offsets = [0, 0, 0], sizes = [4, 10, 4], strides = [1, 1, 1]} : vector<6x10x4xbf16> to vector<4x10x4xbf16>
    %9 = vector.extract_strided_slice %7 {offsets = [1, 0, 0], sizes = [4, 10, 4], strides = [1, 1, 1]} : vector<6x10x4xbf16> to vector<4x10x4xbf16>
    %10 = vector.extract_strided_slice %7 {offsets = [2, 0, 0], sizes = [4, 10, 4], strides = [1, 1, 1]} : vector<6x10x4xbf16> to vector<4x10x4xbf16>
    %11 = tpu.concatenate %8, %9, %10 in 2 : vector<4x10x4xbf16>, vector<4x10x4xbf16>, vector<4x10x4xbf16> -> vector<4x10x12xbf16>
    %12 = vector.extract_strided_slice %11 {offsets = [0, 0, 0], sizes = [4, 8, 12], strides = [1, 1, 1]} : vector<4x10x12xbf16> to vector<4x8x12xbf16>
    %13 = vector.extract_strided_slice %11 {offsets = [0, 1, 0], sizes = [4, 8, 12], strides = [1, 1, 1]} : vector<4x10x12xbf16> to vector<4x8x12xbf16>
    %14 = vector.extract_strided_slice %11 {offsets = [0, 2, 0], sizes = [4, 8, 12], strides = [1, 1, 1]} : vector<4x10x12xbf16> to vector<4x8x12xbf16>
    %15 = tpu.concatenate %12, %13, %14 in 2 : vector<4x8x12xbf16>, vector<4x8x12xbf16>, vector<4x8x12xbf16> -> vector<4x8x36xbf16>
    %16 = vector.shape_cast %15 : vector<4x8x36xbf16> to vector<32x36xbf16>
    %cst = arith.constant dense<0.000000e+00> : vector<32x4xf32>
    %17 = tpu.matmul %16, %0, %cst {dimension_numbers = #tpu.dot_dimension_numbers<[1], [0], [0], [1], [0, 0, 1, 1], [], []>} : vector<32x36xbf16>, vector<36x4xbf16>, vector<32x4xf32> -> vector<32x4xf32>
    %18 = arith.truncf %17 : vector<32x4xf32> to vector<32x4xbf16>
    %c0_12 = arith.constant 0 : index
    %c0_13 = arith.constant 0 : index
    %c0_14 = arith.constant 0 : index
    %19 = vector.load %arg5[%c0_12, %c0_13, %c0_14] : memref<1x32x4xbf16, #tpu.memory_space<vmem>>, vector<1x32x4xbf16>
    %20 = vector.shape_cast %19 : vector<1x32x4xbf16> to vector<32x4xbf16>
    %21 = vector.shape_cast %18 : vector<32x4xbf16> to vector<1x32x4xbf16>
    tpu.vector_store %arg5[%c0_12, %c0_13, %c0_14], %21 {strides = array<i32>} : memref<1x32x4xbf16, #tpu.memory_space<vmem>>, vector<1x32x4xbf16>,
    return
  }
  func.func @transform_0(%arg0: i32, %arg1: i32) -> (i32, i32, i32, i32) {
    %c0_i32 = arith.constant 0 : i32
    %c0_i32_0 = arith.constant 0 : i32
    %c0_i32_1 = arith.constant 0 : i32
    return %arg0, %arg1, %c0_i32, %c0_i32_0 : i32, i32, i32, i32
  }
  func.func @transform_1(%arg0: i32, %arg1: i32) -> (i32, i32, i32, i32) {
    %c0_i32 = arith.constant 0 : i32
    %c0_i32_0 = arith.constant 0 : i32
    %c0_i32_1 = arith.constant 0 : i32
    return %arg0, %arg1, %c0_i32, %c0_i32_0 : i32, i32, i32, i32
  }
  func.func @transform_2(%arg0: i32, %arg1: i32) -> (i32, i32) {
    %c0_i32 = arith.constant 0 : i32
    %c0_i32_0 = arith.constant 0 : i32
    %c0_i32_1 = arith.constant 0 : i32
    return %c0_i32, %c0_i32_0 : i32, i32
  }
  func.func @transform_3(%arg0: i32, %arg1: i32) -> (i32, i32, i32) {
    %c0_i32 = arith.constant 0 : i32
    %c0_i32_0 = arith.constant 0 : i32
    return %arg0, %arg1, %c0_i32 : i32, i32, i32
  }
}

module attributes {stable_mosaic.version = 11 : i64} {
  func.func @_conv3x3_kernel(%arg0: i32, %arg1: i32, %arg2: memref<1x8x18x3xbf16, #tpu.memory_space<vmem>>, %arg3: memref<1x2x18x3xbf16, #tpu.memory_space<vmem>>, %arg4: memref<27x3xbf16, #tpu.memory_space<vmem>>, %arg5: memref<1x64x3xbf16, #tpu.memory_space<vmem>>, %arg6: memref<1x128x3xbf16, #tpu.memory_space<vmem>>) attributes {dimension_semantics = [#tpu.dimension_semantics<parallel>, #tpu.dimension_semantics<parallel>], iteration_bounds = array<i64: 2, 2>, scalar_prefetch = 0 : i64, scratch_operands = 0 : i64, tpu.core_type = #tpu.core_type<tc>, window_params = [{transform_indices = @transform_0, window_bounds = array<i64: 1, 8, 18, 3>}, {transform_indices = @transform_1, window_bounds = array<i64: 1, 2, 18, 3>}, {pipeline_mode = #tpu.pipeline_mode<synchronous>, transform_indices = @transform_2, window_bounds = array<i64: 27, 3>}, {transform_indices = @transform_3, window_bounds = array<i64: 1, 64, 3>}, {transform_indices = @transform_4, window_bounds = array<i64: 1, 128, 3>}]} {
    %c0 = arith.constant 0 : index
    %c0_0 = arith.constant 0 : index
    %0 = vector.load %arg4[%c0, %c0_0] : memref<27x3xbf16, #tpu.memory_space<vmem>>, vector<27x3xbf16>
    %c0_1 = arith.constant 0 : index
    %c0_2 = arith.constant 0 : index
    %c0_3 = arith.constant 0 : index
    %c0_4 = arith.constant 0 : index
    %1 = vector.load %arg3[%c0_1, %c0_2, %c0_3, %c0_4] : memref<1x2x18x3xbf16, #tpu.memory_space<vmem>>, vector<1x1x18x3xbf16>
    %2 = vector.shape_cast %1 : vector<1x1x18x3xbf16> to vector<1x18x3xbf16>
    %c0_5 = arith.constant 0 : index
    %c0_6 = arith.constant 0 : index
    %c0_7 = arith.constant 0 : index
    %c0_8 = arith.constant 0 : index
    %3 = vector.load %arg2[%c0_5, %c0_6, %c0_7, %c0_8] : memref<1x8x18x3xbf16, #tpu.memory_space<vmem>>, vector<1x8x18x3xbf16>
    %4 = vector.shape_cast %3 : vector<1x8x18x3xbf16> to vector<8x18x3xbf16>
    %c0_9 = arith.constant 0 : index
    %c1 = arith.constant 1 : index
    %c0_10 = arith.constant 0 : index
    %c0_11 = arith.constant 0 : index
    %5 = vector.load %arg3[%c0_9, %c1, %c0_10, %c0_11] : memref<1x2x18x3xbf16, #tpu.memory_space<vmem>>, vector<1x1x18x3xbf16>
    %6 = vector.shape_cast %5 : vector<1x1x18x3xbf16> to vector<1x18x3xbf16>
    %7 = tpu.concatenate %2, %4, %6 in 0 : vector<1x18x3xbf16>, vector<8x18x3xbf16>, vector<1x18x3xbf16> -> vector<10x18x3xbf16>
    %8 = vector.extract_strided_slice %7 {offsets = [0, 0, 0], sizes = [8, 18, 3], strides = [1, 1, 1]} : vector<10x18x3xbf16> to vector<8x18x3xbf16>
    %9 = vector.extract_strided_slice %7 {offsets = [1, 0, 0], sizes = [8, 18, 3], strides = [1, 1, 1]} : vector<10x18x3xbf16> to vector<8x18x3xbf16>
    %10 = vector.extract_strided_slice %7 {offsets = [2, 0, 0], sizes = [8, 18, 3], strides = [1, 1, 1]} : vector<10x18x3xbf16> to vector<8x18x3xbf16>
    %11 = tpu.concatenate %8, %9, %10 in 2 : vector<8x18x3xbf16>, vector<8x18x3xbf16>, vector<8x18x3xbf16> -> vector<8x18x9xbf16>
    %12 = vector.extract_strided_slice %11 {offsets = [0, 0, 0], sizes = [8, 16, 9], strides = [1, 1, 1]} : vector<8x18x9xbf16> to vector<8x16x9xbf16>
    %13 = vector.extract_strided_slice %11 {offsets = [0, 1, 0], sizes = [8, 16, 9], strides = [1, 1, 1]} : vector<8x18x9xbf16> to vector<8x16x9xbf16>
    %14 = vector.extract_strided_slice %11 {offsets = [0, 2, 0], sizes = [8, 16, 9], strides = [1, 1, 1]} : vector<8x18x9xbf16> to vector<8x16x9xbf16>
    %15 = tpu.concatenate %12, %13, %14 in 2 : vector<8x16x9xbf16>, vector<8x16x9xbf16>, vector<8x16x9xbf16> -> vector<8x16x27xbf16>
    %16 = vector.shape_cast %15 : vector<8x16x27xbf16> to vector<128x27xbf16>
    %cst = arith.constant dense<0.000000e+00> : vector<128x3xf32>
    %17 = tpu.matmul %16, %0, %cst {dimension_numbers = #tpu.dot_dimension_numbers<[1], [0], [0], [1], [0, 0, 1, 1], [], []>} : vector<128x27xbf16>, vector<27x3xbf16>, vector<128x3xf32> -> vector<128x3xf32>
    %c0_12 = arith.constant 0 : index
    %c0_13 = arith.constant 0 : index
    %c0_14 = arith.constant 0 : index
    %18 = vector.load %arg5[%c0_12, %c0_13, %c0_14] : memref<1x64x3xbf16, #tpu.memory_space<vmem>>, vector<1x64x3xbf16>
    %19 = vector.shape_cast %18 : vector<1x64x3xbf16> to vector<64x3xbf16>
    %20 = vector.shape_cast %17 : vector<128x3xf32> to vector<4x2x16x3xf32>
    %21 = vector.shape_cast %19 : vector<64x3xbf16> to vector<4x1x16x3xbf16>
    %22 = arith.extf %21 : vector<4x1x16x3xbf16> to vector<4x1x16x3xf32>
    %23 = vector.broadcast %22 : vector<4x1x16x3xf32> to vector<4x2x16x3xf32>
    %24 = arith.addf %20, %23 : vector<4x2x16x3xf32>
    %25 = vector.shape_cast %24 : vector<4x2x16x3xf32> to vector<128x3xf32>
    %26 = arith.truncf %25 : vector<128x3xf32> to vector<128x3xbf16>
    %c0_15 = arith.constant 0 : index
    %c0_16 = arith.constant 0 : index
    %c0_17 = arith.constant 0 : index
    %27 = vector.load %arg6[%c0_15, %c0_16, %c0_17] : memref<1x128x3xbf16, #tpu.memory_space<vmem>>, vector<1x128x3xbf16>
    %28 = vector.shape_cast %27 : vector<1x128x3xbf16> to vector<128x3xbf16>
    %29 = vector.shape_cast %26 : vector<128x3xbf16> to vector<1x128x3xbf16>
    tpu.vector_store %arg6[%c0_15, %c0_16, %c0_17], %29 {strides = array<i32>} : memref<1x128x3xbf16, #tpu.memory_space<vmem>>, vector<1x128x3xbf16>,
    return
  }
  func.func @transform_0(%arg0: i32, %arg1: i32) -> (i32, i32, i32, i32) {
    %c0_i32 = arith.constant 0 : i32
    %c0_i32_0 = arith.constant 0 : i32
    %c0_i32_1 = arith.constant 0 : i32
    return %arg0, %arg1, %c0_i32, %c0_i32_0 : i32, i32, i32, i32
  }
  func.func @transform_1(%arg0: i32, %arg1: i32) -> (i32, i32, i32, i32) {
    %c0_i32 = arith.constant 0 : i32
    %c0_i32_0 = arith.constant 0 : i32
    %c0_i32_1 = arith.constant 0 : i32
    return %arg0, %arg1, %c0_i32, %c0_i32_0 : i32, i32, i32, i32
  }
  func.func @transform_2(%arg0: i32, %arg1: i32) -> (i32, i32) {
    %c0_i32 = arith.constant 0 : i32
    %c0_i32_0 = arith.constant 0 : i32
    %c0_i32_1 = arith.constant 0 : i32
    return %c0_i32, %c0_i32_0 : i32, i32
  }
  func.func @transform_3(%arg0: i32, %arg1: i32) -> (i32, i32, i32) {
    %c0_i32 = arith.constant 0 : i32
    %c0_i32_0 = arith.constant 0 : i32
    return %arg0, %arg1, %c0_i32 : i32, i32, i32
  }
  func.func @transform_4(%arg0: i32, %arg1: i32) -> (i32, i32, i32) {
    %c0_i32 = arith.constant 0 : i32
    %c0_i32_0 = arith.constant 0 : i32
    return %arg0, %arg1, %c0_i32 : i32, i32, i32
  }
}

module attributes {stable_mosaic.version = 11 : i64} {
  func.func @_inorm_kernel(%arg0: i32, %arg1: memref<1x256x3xbf16, #tpu.memory_space<vmem>>, %arg2: memref<1x256x4xf32, #tpu.memory_space<vmem>>, %arg3: memref<1x256x4xf32, #tpu.memory_space<vmem>>) attributes {dimension_semantics = [#tpu.dimension_semantics<parallel>], iteration_bounds = array<i64: 2>, scalar_prefetch = 0 : i64, scratch_operands = 0 : i64, tpu.core_type = #tpu.core_type<tc>, window_params = [{transform_indices = @transform_0, window_bounds = array<i64: 1, 256, 3>}, {transform_indices = @transform_1, window_bounds = array<i64: 1, 256, 4>}, {transform_indices = @transform_2, window_bounds = array<i64: 1, 256, 4>}]} {
    %c0 = arith.constant 0 : index
    %c0_0 = arith.constant 0 : index
    %c0_1 = arith.constant 0 : index
    %0 = vector.load %arg1[%c0, %c0_0, %c0_1] : memref<1x256x3xbf16, #tpu.memory_space<vmem>>, vector<1x256x3xbf16>
    %1 = vector.shape_cast %0 : vector<1x256x3xbf16> to vector<256x3xbf16>
    %2 = arith.extf %1 : vector<256x3xbf16> to vector<256x3xf32>
    %cst = arith.constant dense<0.000000e+00> : vector<3xf32>
    %3 = vector.multi_reduction <add>, %2, %cst [0] : vector<256x3xf32> to vector<3xf32>
    %4 = vector.shape_cast %3 : vector<3xf32> to vector<1x3xf32>
    %cst_2 = arith.constant 3.906250e-03 : f32
    %5 = vector.broadcast %cst_2 : f32 to vector<1x3xf32>
    %6 = arith.mulf %4, %5 : vector<1x3xf32>
    %7 = vector.broadcast %6 : vector<1x3xf32> to vector<256x3xf32>
    %8 = arith.subf %2, %7 : vector<256x3xf32>
    %9 = arith.mulf %8, %8 : vector<256x3xf32>
    %cst_3 = arith.constant dense<0.000000e+00> : vector<3xf32>
    %10 = vector.multi_reduction <add>, %9, %cst_3 [0] : vector<256x3xf32> to vector<3xf32>
    %11 = vector.shape_cast %10 : vector<3xf32> to vector<1x3xf32>
    %cst_4 = arith.constant 3.906250e-03 : f32
    %12 = vector.broadcast %cst_4 : f32 to vector<1x3xf32>
    %13 = arith.mulf %11, %12 : vector<1x3xf32>
    %cst_5 = arith.constant 9.99999974E-6 : f32
    %14 = vector.broadcast %cst_5 : f32 to vector<1x3xf32>
    %15 = arith.addf %13, %14 : vector<1x3xf32>
    %16 = math.rsqrt %15 : vector<1x3xf32>
    %17 = vector.broadcast %16 : vector<1x3xf32> to vector<256x3xf32>
    %18 = arith.mulf %8, %17 : vector<256x3xf32>
    %c0_6 = arith.constant 0 : index
    %c0_7 = arith.constant 0 : index
    %c0_8 = arith.constant 0 : index
    %19 = vector.load %arg2[%c0_6, %c0_7, %c0_8] : memref<1x256x4xf32, #tpu.memory_space<vmem>>, vector<1x256x4xf32>
    %20 = vector.shape_cast %19 : vector<1x256x4xf32> to vector<256x4xf32>
    %21 = vector.extract_strided_slice %20 {offsets = [0, 0], sizes = [256, 3], strides = [1, 1]} : vector<256x4xf32> to vector<256x3xf32>
    %22 = arith.addf %21, %18 : vector<256x3xf32>
    %23 = vector.extract_strided_slice %20 {offsets = [0, 3], sizes = [256, 1], strides = [1, 1]} : vector<256x4xf32> to vector<256x1xf32>
    %24 = tpu.concatenate %22, %23 in 1 : vector<256x3xf32>, vector<256x1xf32> -> vector<256x4xf32>
    %c0_9 = arith.constant 0 : index
    %c0_10 = arith.constant 0 : index
    %c0_11 = arith.constant 0 : index
    %25 = vector.load %arg3[%c0_9, %c0_10, %c0_11] : memref<1x256x4xf32, #tpu.memory_space<vmem>>, vector<1x256x4xf32>
    %26 = vector.shape_cast %25 : vector<1x256x4xf32> to vector<256x4xf32>
    %27 = vector.shape_cast %24 : vector<256x4xf32> to vector<1x256x4xf32>
    tpu.vector_store %arg3[%c0_9, %c0_10, %c0_11], %27 {strides = array<i32>} : memref<1x256x4xf32, #tpu.memory_space<vmem>>, vector<1x256x4xf32>,
    return
  }
  func.func @transform_0(%arg0: i32) -> (i32, i32, i32) {
    %c0_i32 = arith.constant 0 : i32
    %c0_i32_0 = arith.constant 0 : i32
    %c0_i32_1 = arith.constant 0 : i32
    return %arg0, %c0_i32, %c0_i32_0 : i32, i32, i32
  }
  func.func @transform_1(%arg0: i32) -> (i32, i32, i32) {
    %c0_i32 = arith.constant 0 : i32
    %c0_i32_0 = arith.constant 0 : i32
    %c0_i32_1 = arith.constant 0 : i32
    return %arg0, %c0_i32, %c0_i32_0 : i32, i32, i32
  }
  func.func @transform_2(%arg0: i32) -> (i32, i32, i32) {
    %c0_i32 = arith.constant 0 : i32
    %c0_i32_0 = arith.constant 0 : i32
    %c0_i32_1 = arith.constant 0 : i32
    return %arg0, %c0_i32, %c0_i32_0 : i32, i32, i32
  }
}

module attributes {stable_mosaic.version = 11 : i64} {
  func.func @_inorm_kernel(%arg0: i32, %arg1: memref<1x64x1xbf16, #tpu.memory_space<vmem>>, %arg2: memref<1x64x4xf32, #tpu.memory_space<vmem>>, %arg3: memref<1x64x4xf32, #tpu.memory_space<vmem>>) attributes {dimension_semantics = [#tpu.dimension_semantics<parallel>], iteration_bounds = array<i64: 2>, scalar_prefetch = 0 : i64, scratch_operands = 0 : i64, tpu.core_type = #tpu.core_type<tc>, window_params = [{transform_indices = @transform_0, window_bounds = array<i64: 1, 64, 1>}, {transform_indices = @transform_1, window_bounds = array<i64: 1, 64, 4>}, {transform_indices = @transform_2, window_bounds = array<i64: 1, 64, 4>}]} {
    %c0 = arith.constant 0 : index
    %c0_0 = arith.constant 0 : index
    %c0_1 = arith.constant 0 : index
    %0 = vector.load %arg1[%c0, %c0_0, %c0_1] : memref<1x64x1xbf16, #tpu.memory_space<vmem>>, vector<1x64x1xbf16>
    %1 = vector.shape_cast %0 : vector<1x64x1xbf16> to vector<64x1xbf16>
    %2 = arith.extf %1 : vector<64x1xbf16> to vector<64x1xf32>
    %cst = arith.constant dense<0.000000e+00> : vector<1xf32>
    %3 = vector.multi_reduction <add>, %2, %cst [0] : vector<64x1xf32> to vector<1xf32>
    %4 = vector.shape_cast %3 : vector<1xf32> to vector<1x1xf32>
    %cst_2 = arith.constant 1.562500e-02 : f32
    %5 = vector.broadcast %cst_2 : f32 to vector<1x1xf32>
    %6 = arith.mulf %4, %5 : vector<1x1xf32>
    %7 = vector.broadcast %6 : vector<1x1xf32> to vector<64x1xf32>
    %8 = arith.subf %2, %7 : vector<64x1xf32>
    %9 = arith.mulf %8, %8 : vector<64x1xf32>
    %cst_3 = arith.constant dense<0.000000e+00> : vector<1xf32>
    %10 = vector.multi_reduction <add>, %9, %cst_3 [0] : vector<64x1xf32> to vector<1xf32>
    %11 = vector.shape_cast %10 : vector<1xf32> to vector<1x1xf32>
    %cst_4 = arith.constant 1.562500e-02 : f32
    %12 = vector.broadcast %cst_4 : f32 to vector<1x1xf32>
    %13 = arith.mulf %11, %12 : vector<1x1xf32>
    %cst_5 = arith.constant 9.99999974E-6 : f32
    %14 = vector.broadcast %cst_5 : f32 to vector<1x1xf32>
    %15 = arith.addf %13, %14 : vector<1x1xf32>
    %16 = math.rsqrt %15 : vector<1x1xf32>
    %17 = vector.broadcast %16 : vector<1x1xf32> to vector<64x1xf32>
    %18 = arith.mulf %8, %17 : vector<64x1xf32>
    %c0_6 = arith.constant 0 : index
    %c0_7 = arith.constant 0 : index
    %c0_8 = arith.constant 0 : index
    %19 = vector.load %arg2[%c0_6, %c0_7, %c0_8] : memref<1x64x4xf32, #tpu.memory_space<vmem>>, vector<1x64x4xf32>
    %20 = vector.shape_cast %19 : vector<1x64x4xf32> to vector<64x4xf32>
    %21 = vector.extract_strided_slice %20 {offsets = [0, 0], sizes = [64, 3], strides = [1, 1]} : vector<64x4xf32> to vector<64x3xf32>
    %22 = vector.extract_strided_slice %20 {offsets = [0, 3], sizes = [64, 1], strides = [1, 1]} : vector<64x4xf32> to vector<64x1xf32>
    %23 = arith.addf %22, %18 : vector<64x1xf32>
    %24 = tpu.concatenate %21, %23 in 1 : vector<64x3xf32>, vector<64x1xf32> -> vector<64x4xf32>
    %c0_9 = arith.constant 0 : index
    %c0_10 = arith.constant 0 : index
    %c0_11 = arith.constant 0 : index
    %25 = vector.load %arg3[%c0_9, %c0_10, %c0_11] : memref<1x64x4xf32, #tpu.memory_space<vmem>>, vector<1x64x4xf32>
    %26 = vector.shape_cast %25 : vector<1x64x4xf32> to vector<64x4xf32>
    %27 = vector.shape_cast %24 : vector<64x4xf32> to vector<1x64x4xf32>
    tpu.vector_store %arg3[%c0_9, %c0_10, %c0_11], %27 {strides = array<i32>} : memref<1x64x4xf32, #tpu.memory_space<vmem>>, vector<1x64x4xf32>,
    return
  }
  func.func @transform_0(%arg0: i32) -> (i32, i32, i32) {
    %c0_i32 = arith.constant 0 : i32
    %c0_i32_0 = arith.constant 0 : i32
    %c0_i32_1 = arith.constant 0 : i32
    return %arg0, %c0_i32, %c0_i32_0 : i32, i32, i32
  }
  func.func @transform_1(%arg0: i32) -> (i32, i32, i32) {
    %c0_i32 = arith.constant 0 : i32
    %c0_i32_0 = arith.constant 0 : i32
    %c0_i32_1 = arith.constant 0 : i32
    return %arg0, %c0_i32, %c0_i32_0 : i32, i32, i32
  }
  func.func @transform_2(%arg0: i32) -> (i32, i32, i32) {
    %c0_i32 = arith.constant 0 : i32
    %c0_i32_0 = arith.constant 0 : i32
    %c0_i32_1 = arith.constant 0 : i32
    return %arg0, %c0_i32, %c0_i32_0 : i32, i32, i32
  }
}

</mosaic_0001>

<bundles_post_ra>
// kernel: residual_oct_block.8
= control target key start
LH: loop header
LB: loop body
LE: loop exit
PB: predicated region body
PF: predicated region fallthrough
CT: control target
= control target key end

     0   :  { %s825_s12 = smov 0   ;;  %s827_s13 = smov 0   ;;  %s924_s0 = inlined_call_operand.vmem [shape: bf16[2,8,10,8], index: 0, kind: input, shape index: {}]   ;;  %s925_s1 = inlined_call_operand.vmem [shape: bf16[2,4,10,8], index: 1, kind: input, shape index: {}]   ;;  %s926_s2 = inlined_call_operand.vmem [shape: bf16[72,4], index: 2, kind: input, shape index: {}]   ;;  %s927_s3 = inlined_call_operand.vmem [shape: bf16[2,64,4], index: 3, kind: output, shape index: {}]  }
   0x1   :  { %s829_s14 = smov 0   ;;  %s831_s15 = smov 0  }
   0x2   :  { %s833_s16 = smov 0  }
   0x3 LB: > { %s22_s17 = sadd.s32 1, %s791_s14  ;;  %s25_s18 = sadd.s32 1, %s795_s15  ;;  %s799_s16 = sphi %s833_s16, %s13_s16   ;;  %s795_s15 = sphi %s831_s15, %s931_s15   ;;  %s791_s14 = sphi %s829_s14, %s930_s14   ;;  %s787_s13 = sphi %s827_s13, %s929_s13   ;;  %s783_s12 = sphi %s825_s12, %s928_s12  }
   0x4   : > { %p23_p0 = scmp.ge.s32.totalorder %s22_s17, 2  ;;  %p645_p1 = scmp.ge.s32.totalorder %s799_s16, 1 }
   0x5   : > { %p177_p2 = scmp.lt.s32.totalorder %s799_s16, 5 }
   0x6   : > { %s933_s17 = smov (%p23_p0, %s22_s17), 0  ;;  %s935_s18 = smov (!%p23_p0, %s25_s18), %s795_s15 }
   0x7   : > { %p178_p3 = pnand %p645_p1, %p177_p2  ;;  %p27_p4 = scmp.ge.s32.totalorder %s935_s18, 2 }
   0x8   : > { %s646_s19 = sshll.u32 (!%p178_p3), %s783_s12, 2  ;;  %p221_p5 = scmp.lt.s32.totalorder (!%p178_p3), %s787_s13, 1  ;;  %v756_v5 = vld [vmem:[%s926_s2] sm:$0xff] (!%p178_p3)   ;;  %v757_v6 = vld [vmem:[%s926_s2 + $0x8] sm:$0xff] (!%p178_p3)   ;;  %v758_v7 = vld [vmem:[%s926_s2 + $0x10] sm:$0xff] (!%p178_p3)   ;;  %vm321_vm0 = vcmask (!%p178_p3), 64512  }
   0x9   : > { %s937_s18 = smov (%p27_p4, %s935_s18), 0  ;;  %181 = sbr.rel (%p178_p3) target bundleno = 496 (0x1f0), region = 32 }
   0xa   : > { %p223_p6 = scmp.lt.s32.totalorder (!%p178_p3), %s646_s19, 7  ;;  %s650_s22 = sshll.u32 (!%p178_p3), %s783_s12, 1  ;;  %691 = vmatprep.subr.bf16.mxu0 (!%p178_p3), %v756_v5  ;;  %v759_v11 = vld [vmem:[%s926_s2 + $0x18] sm:$0xff] (!%p178_p3)   ;;  %vm334_vm1 = vcmask (!%p178_p3), 130048   ;;  %v760_v16 = vld [vmem:[%s926_s2 + $0x20] ss:$0 sps:$4 sm:$0xff] (!%p178_p3)  }
   0xb   : > { %p234_p7 = scmp.lt.s32.totalorder (!%p178_p3), %s650_s22, 3  ;;  %s801_s29 = smov (!%p178_p3), 8   ;;  %692 = vmatpush3.bf16.msra.mxu0 (!%p178_p3), %v756_v5  ;;  %vm453_vm2 = vcmask (!%p178_p3), 1043456   ;;  %vm391_vm3 = vcmask (!%p178_p3), 195584   ;;  %vm400_vm4 = vcmask (!%p178_p3), 392192   ;;  %vm446_vm5 = vcmask (!%p178_p3), 588800  }
   0xc   : > { %s802_s9 = smov (!%p178_p3), 16   ;;  %693 = vmatprep.subr.bf16.mxu0 (!%p178_p3), %v757_v6  ;;  %v455_v29 = vsel (!%p178_p3), %vm453_vm2, %v760_v16, 0  ;;  %vm522_vm6 = vcmask (!%p178_p3), 27648  }
   0xf   : > { %694 = vmatpush3.bf16.msra.mxu0 (!%p178_p3), %v757_v6 }
  0x10   : > { %s939_s13 = smov (!%p221_p5, %s787_s13), 1  ;;  %s941_s19 = smov (!%p223_p6, %s646_s19), 7  ;;  %695 = vmatprep.subr.bf16.mxu0 %v758_v7 }
  0x11   : > { %s648_s20 = sshll.u32 %s939_s13, 4  ;;  %s647_s21 = sshll.u32 %s941_s19, 1 }
  0x12   : > { %s227_s23 = sadd.s32 %s648_s20, %s647_s21  ;;  %s652_s28 = sshll.u32 %s939_s13, 3 }
  0x13   : > { %s649_s24 = sshll.u32 %s227_s23, 2  ;;  %s943_s22 = smov (!%p234_p7, %s650_s22), 3  ;;  %696 = vmatpush3.bf16.msra.mxu0 %v758_v7 }
  0x14   : > { %s229_s27 = scalar_lea.vmem %s924_s0, %s649_s24  ;;  %s651_s30 = sshll.u32 %s943_s22, 1  ;;  %697 = vmatprep.subr.bf16.mxu0 %v759_v11 }
  0x15   : > { %v750_v0 = vld [vmem:[%s229_s27 + $0x10] sm:$0x1f]   ;;  %v751_v1 = vld [vmem:[%s229_s27] sm:$0x1f]   ;;  %v752_v2 = vld [vmem:[%s229_s27 + $0x18] sm:$0x1f]   ;;  %s238_s4 = sadd.s32 %s652_s28, %s651_s30  ;;  %s248_s30 = sadd.s32 %s652_s28, %s941_s19 }
  0x16   : > { %304 = vrot.lane.b32.xlu1 %v750_v0, %s801_s29  ;;  %300 = vrot.lane.b32.xlu0 %v751_v1, %s801_s29  ;;  %v753_v3 = vld [vmem:[%s229_s27 + $0x8] sm:$0x1f]   ;;  %s653_s5 = sshll.u32 %s238_s4, 2  ;;  %s803_s27 = smov 48  }
  0x17   : > { %s240_s8 = scalar_lea.vmem %s925_s1, %s653_s5  ;;  %698 = vmatpush3.bf16.msra.mxu0 %v759_v11  ;;  %s656_s4 = sshll.u32 %s248_s30, 2 }
  0x18   : > { %v754_v4 = vld [vmem:[%s240_s8 + $0x8] sm:$0x1f]   ;;  %v755_v12 = vld [vmem:[%s240_s8] sm:$0x1f]   ;;  %705 = vmatprep.subr.msk.bf16.mxu0 %vm453_vm2, %v760_v16  ;;  %s250_s7 = scalar_lea.vmem %s927_s3, %s656_s4 }
  0x1a   : > { %306 = vrot.lane.b32.xlu1 %v752_v2, %s801_s29  ;;  %302 = vrot.lane.b32.xlu0 %v753_v3, %s801_s29  ;;  %s804_s29 = smov 24  }
  0x1b   : > { %700 = vmatpush3.bf16.msra.mxu0 %v455_v29 }
  0x1e   : > { %315 = vrot.lane.b32.xlu1 %v750_v0, %s802_s9  ;;  %313 = vrot.lane.b32.xlu0 %v753_v3, %s802_s9 }
  0x22   : > { %319 = vrot.lane.b32.xlu1 %v754_v4, %s802_s9  ;;  %317 = vrot.lane.b32.xlu0 %v752_v2, %s802_s9 }
  0x88   : > { %v305_v8 = vpop.permute.xlu1 %304  ;;  %v301_v9 = vpop.permute.xlu0 %300 }
  0x89   : > { %v324_v17 = vsel %vm321_vm0, %v755_v12, %v301_v9  ;;  %v330_v30 = vsel %vm321_vm0, %v753_v3, %v305_v8 }
  0x8c   : > { %v307_v10 = vpop.permute.xlu1 %306  ;;  %v303_v13 = vpop.permute.xlu0 %302 }
  0x8d   : > { %v327_v14 = vsel %vm321_vm0, %v751_v1, %v303_v13  ;;  %v333_v25 = vsel %vm321_vm0, %v750_v0, %v307_v10 }
  0x90   : > { %v316_v15 = vpop.permute.xlu1 %315  ;;  %v314_v19 = vpop.permute.xlu0 %313 }
  0x91   : > { %v338_v18 = vsel %vm334_vm1, %v327_v14, %v316_v15  ;;  %v336_v21 = vsel %vm334_vm1, %v324_v17, %v314_v19 }
  0x92   : > { %v351_v20 = vshll.u32 %v338_v18, 16  ;;  %v380_v22 = vrot.slane %v338_v18, 1  ;;  %v345_v23 = vshll.u32 %v336_v21, 16  ;;  %v379_v24 = vrot.slane %v336_v21, 1 }
  0x93   : > { %v349_v26 = vshrl.u32 %v338_v18, 16  ;;  %v343_v31 = vshrl.u32 %v336_v21, 16 }
  0x94   : > { %v320_v27 = vpop.permute.xlu1 %319  ;;  %385 = vrot.lane.b32.xlu1 %v380_v22, %s803_s27  ;;  %v353_v28 = vrot.slane %v351_v20, 1  ;;  %383 = vrot.lane.b32.xlu0 %v379_v24, %s803_s27  ;;  %v318_v33 = vpop.permute.xlu0 %317  ;;  %v347_v34 = vrot.slane %v345_v23, 1 }
  0x95   : > { %v342_v32 = vsel %vm334_vm1, %v333_v25, %v320_v27  ;;  %v340_v36 = vsel %vm334_vm1, %v330_v30, %v318_v33 }
  0x96   : > { %v363_v35 = vshll.u32 %v342_v32, 16  ;;  %v354_v37 = vor.u32 %v353_v28, %v349_v26  ;;  %v357_v38 = vshll.u32 %v340_v36, 16  ;;  %v348_v39 = vor.u32 %v347_v34, %v343_v31 }
  0x97   : > { %v361_v40 = vshrl.u32 %v342_v32, 16  ;;  %v355_v42 = vshrl.u32 %v340_v36, 16  ;;  %v382_v46 = vrot.slane %v342_v32, 1  ;;  %v381_v47 = vrot.slane %v340_v36, 1 }
  0x98   : > { %369 = vrot.lane.b32.xlu1 %v354_v37, %s804_s29  ;;  %v365_v41 = vrot.slane %v363_v35, 1  ;;  %367 = vrot.lane.b32.xlu0 %v348_v39, %s804_s29  ;;  %v359_v43 = vrot.slane %v357_v38, 1 }
  0x9a   : > { %v366_v44 = vor.u32 %v365_v41, %v361_v40  ;;  %v360_v45 = vor.u32 %v359_v43, %v355_v42 }
  0x9c   : > { %373 = vrot.lane.b32.xlu1 %v366_v44, %s804_s29  ;;  %371 = vrot.lane.b32.xlu0 %v360_v45, %s804_s29 }
  0xa0   : > { %389 = vrot.lane.b32.xlu1 %v382_v46, %s803_s27  ;;  %387 = vrot.lane.b32.xlu0 %v381_v47, %s803_s27 }
 0x106   : > { %v386_v48 = vpop.permute.xlu1 %385  ;;  %v384_v49 = vpop.permute.xlu0 %383 }
 0x10a   : > { %v370_v50 = vpop.permute.xlu1 %369  ;;  %v368_v52 = vpop.permute.xlu0 %367 }
 0x10b   : > { %v395_v51 = vsel %vm391_vm3, %v338_v18, %v370_v50  ;;  %v393_v53 = vsel %vm391_vm3, %v336_v21, %v368_v52 }
 0x10c   : > { %v404_v54 = vsel %vm400_vm4, %v395_v51, %v386_v48  ;;  %v402_v55 = vsel %vm400_vm4, %v393_v53, %v384_v49 }
 0x10d   : > { %v665_v57 = vcombine.low %v402_v55, %v404_v54 }
 0x10e   : > { %v374_v56 = vpop.permute.xlu1 %373  ;;  %v372_v58 = vpop.permute.xlu0 %371 }
 0x10f   : > { %701 = vmatprep.mubr.msk.bf16.mxu0 %vm446_vm5, %v665_v57  ;;  %v399_v59 = vsel %vm391_vm3, %v342_v32, %v374_v56  ;;  %v397_v61 = vsel %vm391_vm3, %v340_v36, %v372_v58 }
 0x112   : > { %v390_v60 = vpop.permute.xlu1 %389  ;;  %v388_v63 = vpop.permute.xlu0 %387 }
 0x113   : > { %v408_v62 = vsel %vm400_vm4, %v399_v59, %v390_v60  ;;  %v406_v0 = vsel %vm400_vm4, %v397_v61, %v388_v63 }
 0x114   : > { %v666_v1 = vcombine.low %v406_v0, %v408_v62 }
 0x116   : > { %702 = vmatmul.mubr.msk.bf16.vlgmr.msra.gmra.mrb[0].mxu0 %vm446_vm5, %v666_v1 }
 0x1e9   : > { %v703_v2 = vpop.f32.mrb[0].mxu0 }
 0x1ea   : > { %v682_v3 = vpack.c.bf16 %v703_v2, %v703_v2  ;;  %v491_v4 = vpop.f32.mrb[1].mxu0 }
 0x1eb   : > { %v680_v5 = vpack.c.bf16 %v491_v4, %v491_v4  ;;  %v704_v6 = vpop.f32.mrb[2].mxu0 }
 0x1ec   : > { %525 = vst.msk [vmem:[%s250_s7 + $0x8] sm:$0xf] %vm522_vm6, %v682_v3  ;;  %v683_v7 = vpack.c.bf16 %v704_v6, %v704_v6  ;;  %v494_v8 = vpop.f32.mrb[3].mxu0 }
 0x1ed   : > { %523 = vst.msk [vmem:[%s250_s7] sm:$0xf] %vm522_vm6, %v680_v5  ;;  %v681_v9 = vpack.c.bf16 %v494_v8, %v494_v8 }
 0x1ee   : > { %526 = vst.msk [vmem:[%s250_s7 + $0xc] sm:$0xf] %vm522_vm6, %v683_v7 }
 0x1ef   : > { %524 = vst.msk [vmem:[%s250_s7 + $0x4] sm:$0xf] %vm522_vm6, %v681_v9 }
 0x1f0 PF: > { %s13_s16 = sadd.s32 1, %s799_s16   ;;  %s928_s12 = smov %s791_s14 }
 0x1f1   : > { %p10_p8 = scmp.ge.s32.totalorder %s13_s16, 6   ;;  %s929_s13 = smov %s795_s15 }
 0x1f2   : > { %s930_s14 = smov %s933_s17  ;;  %s931_s15 = smov %s937_s18 }
 0x1f3   :  { %12 = sbr.rel (!%p10_p8) target bundleno = 3 (0x3), region = 66 }

// kernel: residual_oct_block.10
= control target key start
LH: loop header
LB: loop body
LE: loop exit
PB: predicated region body
PF: predicated region fallthrough
CT: control target
= control target key end

     0   :  { %s852_s6 = smov 0   ;;  %s1444_s0 = inlined_call_operand.vmem [shape: bf16[2,256,3], index: 0, kind: input, shape index: {}]   ;;  %s1445_s1 = inlined_call_operand.vmem [shape: bf16[2,256,3], index: 1, kind: output, shape index: {}]  }
   0x1 LB: > { %s668_s7 = sadd.s32 4294967295, %s840_s6   ;;  %p672_p0 = scmp.ge.s32.totalorder %s840_s6, 1  ;;  %s840_s6 = sphi %s852_s6, %s11_s6  }
   0x2   : > { %p87_p1 = scmp.lt.s32.totalorder %s840_s6, 3 }
   0x4   : > { %p88_p2 = pnand %p672_p0, %p87_p1 }
   0x5   : > { %p107_p3 = scmp.lt.s32.totalorder (!%p88_p2), %s668_s7, 1  ;;  %vm181_vm0 = vcmask (!%p88_p2), 23552   ;;  %vm580_vm1 = vcmask (!%p88_p2), 19456  }
   0x6   : > { %91 = sbr.rel (%p88_p2) target bundleno = 219 (0xdb), region = 24 }
   0xd   : > { %s1447_s7 = smov (!%p107_p3, %s668_s7), 1 }
   0xe   : > { %s711_s8 = sshll.u32 %s1447_s7, 7 }
   0xf   : > { %s868_s11 = scalar_lea.vmem %s1444_s0, %s711_s8  ;;  %s1327_s14 = scalar_lea.vmem %s1445_s1, %s711_s8 }
  0x10   : > { %v871_v0 = vld [vmem:[%s868_s11] sm:$0xff]   ;;  %v874_v1 = vld [vmem:[%s868_s11 + $0x8] sm:$0xff]   ;;  %v880_v5 = vld [vmem:[%s868_s11 + $0x10] sm:$0xff]  }
  0x11   : > { %v747_v2 = vunpack.c.l.bf16 %v871_v0  ;;  %v748_v3 = vunpack.c.h.bf16 %v871_v0  ;;  %v751_v4 = vunpack.c.l.bf16 %v874_v1  ;;  %v752_v6 = vunpack.c.h.bf16 %v874_v1  ;;  %v894_v11 = vld [vmem:[%s868_s11 + $0x18] sm:$0xff]   ;;  %v905_v18 = vld [vmem:[%s868_s11 + $0x20] sm:$0xff]   ;;  %v916_v25 = vld [vmem:[%s868_s11 + $0x28] sm:$0xff]  }
  0x12   : > { %v755_v7 = vunpack.c.l.bf16 %v880_v5  ;;  %v756_v13 = vunpack.c.h.bf16 %v880_v5  ;;  %v759_v16 = vunpack.c.l.bf16 %v894_v11  ;;  %v760_v20 = vunpack.c.h.bf16 %v894_v11  ;;  %v927_v32 = vld [vmem:[%s868_s11 + $0x30] sm:$0xff]   ;;  %v938_v39 = vld [vmem:[%s868_s11 + $0x38] sm:$0xff]   ;;  %v949_v46 = vld [vmem:[%s868_s11 + $0x40] sm:$0xff]  }
  0x13   : > { %v182_v8 = vsel %vm181_vm0, %v747_v2, 0.0  ;;  %v183_v9 = vsel %vm181_vm0, %v748_v3, 0.0  ;;  %v185_v10 = vsel %vm181_vm0, %v751_v4, 0.0  ;;  %v187_v14 = vsel %vm181_vm0, %v752_v6, 0.0  ;;  %v960_v53 = vld [vmem:[%s868_s11 + $0x48] sm:$0xff]   ;;  %v971_v60 = vld [vmem:[%s868_s11 + $0x50] sm:$0xff]  }
  0x14   : > { %v184_v12 = vadd.f32 %v183_v9, %v182_v8  ;;  %v189_v17 = vsel %vm181_vm0, %v755_v7, 0.0  ;;  %v191_v21 = vsel %vm181_vm0, %v756_v13, 0.0  ;;  %v763_v23 = vunpack.c.l.bf16 %v905_v18 }
  0x15   : > { %v193_v24 = vsel %vm181_vm0, %v759_v16, 0.0  ;;  %v764_v27 = vunpack.c.h.bf16 %v905_v18  ;;  %v195_v28 = vsel %vm181_vm0, %v760_v20, 0.0  ;;  %v767_v30 = vunpack.c.l.bf16 %v916_v25 }
  0x16   : > { %v186_v15 = vadd.f32 %v185_v10, %v184_v12  ;;  %v197_v31 = vsel %vm181_vm0, %v763_v23, 0.0  ;;  %v768_v34 = vunpack.c.h.bf16 %v916_v25  ;;  %v771_v37 = vunpack.c.l.bf16 %v927_v32  ;;  %v982_v12 = vld [vmem:[%s868_s11 + $0x58] sm:$0xff]  }
  0x17   : > { %v199_v35 = vsel %vm181_vm0, %v764_v27, 0.0  ;;  %v201_v38 = vsel %vm181_vm0, %v767_v30, 0.0  ;;  %v772_v41 = vunpack.c.h.bf16 %v927_v32  ;;  %v775_v44 = vunpack.c.l.bf16 %v938_v39 }
  0x18   : > { %v188_v19 = vadd.f32 %v187_v14, %v186_v15  ;;  %v203_v42 = vsel %vm181_vm0, %v768_v34, 0.0  ;;  %v205_v45 = vsel %vm181_vm0, %v771_v37, 0.0  ;;  %v776_v48 = vunpack.c.h.bf16 %v938_v39 }
  0x19   : > { %v207_v49 = vsel %vm181_vm0, %v772_v41, 0.0  ;;  %v779_v51 = vunpack.c.l.bf16 %v949_v46  ;;  %v209_v52 = vsel %vm181_vm0, %v775_v44, 0.0  ;;  %v780_v55 = vunpack.c.h.bf16 %v949_v46 }
  0x1a   : > { %v190_v22 = vadd.f32 %v189_v17, %v188_v19  ;;  %v211_v56 = vsel %vm181_vm0, %v776_v48, 0.0  ;;  %v783_v58 = vunpack.c.l.bf16 %v960_v53  ;;  %v784_v62 = vunpack.c.h.bf16 %v960_v53 }
  0x1b   : > { %v213_v59 = vsel %vm181_vm0, %v779_v51, 0.0  ;;  %v215_v63 = vsel %vm181_vm0, %v780_v55, 0.0  ;;  %v787_v9 = vunpack.c.l.bf16 %v971_v60  ;;  %v788_v15 = vunpack.c.h.bf16 %v971_v60 }
  0x1c   : > { %v192_v26 = vadd.f32 %v191_v21, %v190_v22  ;;  %v217_v10 = vsel %vm181_vm0, %v783_v58, 0.0  ;;  %v219_v17 = vsel %vm181_vm0, %v784_v62, 0.0  ;;  %v791_v21 = vunpack.c.l.bf16 %v982_v12 }
  0x1d   : > { %v221_v22 = vsel %vm181_vm0, %v787_v9, 0.0 }
  0x1e   : > { %v194_v29 = vadd.f32 %v193_v24, %v192_v26  ;;  %v993_v24 = vld [vmem:[%s868_s11 + $0x60] sm:$0xff]  }
  0x20   : > { %v196_v33 = vadd.f32 %v195_v28, %v194_v29  ;;  %v792_v28 = vunpack.c.h.bf16 %v982_v12  ;;  %v223_v29 = vsel %vm181_vm0, %v788_v15, 0.0 }
  0x22   : > { %v198_v36 = vadd.f32 %v197_v31, %v196_v33  ;;  %v795_v33 = vunpack.c.l.bf16 %v993_v24 }
  0x24   : > { %v200_v40 = vadd.f32 %v199_v35, %v198_v36  ;;  %v225_v35 = vsel %vm181_vm0, %v791_v21, 0.0  ;;  %v1004_v36 = vld [vmem:[%s868_s11 + $0x68] sm:$0xff]  }
  0x26   : > { %v202_v43 = vadd.f32 %v201_v38, %v200_v40  ;;  %v796_v40 = vunpack.c.h.bf16 %v993_v24 }
  0x28   : > { %v204_v47 = vadd.f32 %v203_v42, %v202_v43  ;;  %v227_v42 = vsel %vm181_vm0, %v792_v28, 0.0 }
  0x2a   : > { %v206_v50 = vadd.f32 %v205_v45, %v204_v47  ;;  %v799_v45 = vunpack.c.l.bf16 %v1004_v36  ;;  %v229_v47 = vsel %vm181_vm0, %v795_v33, 0.0 }
  0x2c   : > { %v208_v54 = vadd.f32 %v207_v49, %v206_v50  ;;  %v1015_v49 = vld [vmem:[%s868_s11 + $0x70] sm:$0xff]  }
  0x2e   : > { %v210_v57 = vadd.f32 %v209_v52, %v208_v54  ;;  %v800_v52 = vunpack.c.h.bf16 %v1004_v36  ;;  %v231_v54 = vsel %vm181_vm0, %v796_v40, 0.0 }
  0x30   : > { %v212_v61 = vadd.f32 %v211_v56, %v210_v57  ;;  %v803_v57 = vunpack.c.l.bf16 %v1015_v49 }
  0x32   : > { %v214_v8 = vadd.f32 %v213_v59, %v212_v61  ;;  %v233_v59 = vsel %vm181_vm0, %v799_v45, 0.0  ;;  %v1026_v61 = vld [vmem:[%s868_s11 + $0x78] sm:$0xff]  }
  0x34   : > { %v216_v14 = vadd.f32 %v215_v63, %v214_v8  ;;  %v804_v8 = vunpack.c.h.bf16 %v1015_v49 }
  0x36   : > { %v218_v19 = vadd.f32 %v217_v10, %v216_v14  ;;  %v235_v10 = vsel %vm181_vm0, %v800_v52, 0.0 }
  0x38   : > { %v220_v26 = vadd.f32 %v219_v17, %v218_v19  ;;  %v807_v17 = vunpack.c.l.bf16 %v1026_v61  ;;  %v237_v19 = vsel %vm181_vm0, %v803_v57, 0.0 }
  0x3a   : > { %v222_v31 = vadd.f32 %v221_v22, %v220_v26  ;;  %v808_v26 = vunpack.c.h.bf16 %v1026_v61 }
  0x3c   : > { %v224_v38 = vadd.f32 %v223_v29, %v222_v31  ;;  %v239_v29 = vsel %vm181_vm0, %v804_v8, 0.0 }
  0x3e   : > { %v226_v43 = vadd.f32 %v225_v35, %v224_v38  ;;  %v241_v35 = vsel %vm181_vm0, %v807_v17, 0.0 }
  0x40   : > { %v228_v50 = vadd.f32 %v227_v42, %v226_v43  ;;  %v243_v42 = vsel %vm181_vm0, %v808_v26, 0.0 }
  0x42   : > { %v230_v56 = vadd.f32 %v229_v47, %v228_v50 }
  0x44   : > { %v232_v63 = vadd.f32 %v231_v54, %v230_v56 }
  0x46   : > { %v234_v14 = vadd.f32 %v233_v59, %v232_v63 }
  0x48   : > { %v236_v22 = vadd.f32 %v235_v10, %v234_v14 }
  0x4a   : > { %v238_v31 = vadd.f32 %v237_v19, %v236_v22 }
  0x4c   : > { %v240_v38 = vadd.f32 %v239_v29, %v238_v31 }
  0x4e   : > { %v242_v43 = vadd.f32 %v241_v35, %v240_v38 }
  0x50   : > { %v244_v47 = vadd.f32 %v243_v42, %v242_v43 }
  0x52   : > { %v245_v50 = vrot.slane %v244_v47, 4 }
  0x54   : > { %v246_v54 = vadd.f32 %v245_v50, %v244_v47 }
  0x56   : > { %v247_v56 = vrot.slane %v246_v54, 2 }
  0x58   : > { %v248_v59 = vadd.f32 %v247_v56, %v246_v54 }
  0x5a   : > { %v249_v63 = vrot.slane %v248_v59, 1 }
  0x5c   : > { %v250_v10 = vadd.f32 %v249_v63, %v248_v59 }
  0x5e   : > { %v1046_v14 = vmul.f32 0.00390625, %v250_v10 }
  0x60   : > { %v1051_v19 = vsub.f32 %v747_v2, %v1046_v14  ;;  %v1056_v22 = vsub.f32 %v748_v3, %v1046_v14  ;;  %v1061_v29 = vsub.f32 %v751_v4, %v1046_v14  ;;  %v1066_v31 = vsub.f32 %v752_v6, %v1046_v14 }
  0x61   : > { %v1071_v2 = vsub.f32 %v755_v7, %v1046_v14  ;;  %v1082_v1 = vsub.f32 %v756_v13, %v1046_v14  ;;  %v1089_v7 = vsub.f32 %v759_v16, %v1046_v14  ;;  %v1099_v13 = vsub.f32 %v760_v20, %v1046_v14 }
  0x62   : > { %v284_v0 = vmul.f32 %v1051_v19, %v1051_v19  ;;  %v285_v3 = vmul.f32 %v1056_v22, %v1056_v22  ;;  %v286_v4 = vmul.f32 %v1061_v29, %v1061_v29  ;;  %v287_v6 = vmul.f32 %v1066_v31, %v1066_v31 }
  0x63   : > { %v288_v35 = vmul.f32 %v1071_v2, %v1071_v2  ;;  %v289_v47 = vmul.f32 %v1082_v1, %v1082_v1  ;;  %v1107_v54 = vsub.f32 %v763_v23, %v1046_v14  ;;  %v290_v56 = vmul.f32 %v1089_v7, %v1089_v7 }
  0x64   : > { %v316_v38 = vsel %vm181_vm0, %v284_v0, 0.0  ;;  %v317_v42 = vsel %vm181_vm0, %v285_v3, 0.0  ;;  %v319_v43 = vsel %vm181_vm0, %v286_v4, 0.0  ;;  %v321_v16 = vsel %vm181_vm0, %v287_v6, 0.0 }
  0x65   : > { %v318_v5 = vadd.f32 %v317_v42, %v316_v38  ;;  %v323_v59 = vsel %vm181_vm0, %v288_v35, 0.0  ;;  %v1115_v11 = vsub.f32 %v764_v27, %v1046_v14  ;;  %v291_v20 = vmul.f32 %v1099_v13, %v1099_v13 }
  0x66   : > { %v325_v10 = vsel %vm181_vm0, %v289_v47, 0.0  ;;  %v1123_v23 = vsub.f32 %v767_v30, %v1046_v14  ;;  %v292_v3 = vmul.f32 %v1107_v54, %v1107_v54  ;;  %v327_v4 = vsel %vm181_vm0, %v290_v56, 0.0 }
  0x67   : > { %v320_v50 = vadd.f32 %v319_v43, %v318_v5  ;;  %v1131_v18 = vsub.f32 %v768_v34, %v1046_v14  ;;  %v293_v27 = vmul.f32 %v1115_v11, %v1115_v11  ;;  %v329_v35 = vsel %vm181_vm0, %v291_v20, 0.0 }
  0x68   : > { %v1139_v30 = vsub.f32 %v771_v37, %v1046_v14  ;;  %v294_v42 = vmul.f32 %v1123_v23, %v1123_v23  ;;  %v331_v43 = vsel %vm181_vm0, %v292_v3, 0.0  ;;  %v1147_v25 = vsub.f32 %v772_v41, %v1046_v14 }
  0x69   : > { %v322_v63 = vadd.f32 %v321_v16, %v320_v50  ;;  %v295_v34 = vmul.f32 %v1131_v18, %v1131_v18  ;;  %v333_v47 = vsel %vm181_vm0, %v293_v27, 0.0  ;;  %v1155_v37 = vsub.f32 %v775_v44, %v1046_v14 }
  0x6a   : > { %v296_v50 = vmul.f32 %v1139_v30, %v1139_v30  ;;  %v335_v56 = vsel %vm181_vm0, %v294_v42, 0.0  ;;  %v1163_v32 = vsub.f32 %v776_v48, %v1046_v14  ;;  %v297_v41 = vmul.f32 %v1147_v25, %v1147_v25 }
  0x6b   : > { %v324_v0 = vadd.f32 %v323_v59, %v322_v63  ;;  %v337_v63 = vsel %vm181_vm0, %v295_v34, 0.0  ;;  %v1171_v44 = vsub.f32 %v779_v51, %v1046_v14  ;;  %v1179_v39 = vsub.f32 %v780_v55, %v1046_v14 }
  0x6c   : > { %v299_v48 = vmul.f32 %v1163_v32, %v1163_v32  ;;  %v1187_v51 = vsub.f32 %v783_v58, %v1046_v14  ;;  %v1195_v46 = vsub.f32 %v784_v62, %v1046_v14  ;;  %v1203_v58 = vsub.f32 %v787_v9, %v1046_v14 }
  0x6d   : > { %v326_v6 = vadd.f32 %v325_v10, %v324_v0  ;;  %v298_v10 = vmul.f32 %v1155_v37, %v1155_v37  ;;  %v339_v0 = vsel %vm181_vm0, %v296_v50, 0.0  ;;  %v300_v27 = vmul.f32 %v1171_v44, %v1171_v44 }
  0x6e   : > { %v301_v55 = vmul.f32 %v1179_v39, %v1179_v39  ;;  %v345_v42 = vsel %vm181_vm0, %v299_v48, 0.0  ;;  %v1211_v53 = vsub.f32 %v788_v15, %v1046_v14  ;;  %v303_v62 = vmul.f32 %v1195_v46, %v1195_v46 }
  0x6f   : > { %v328_v38 = vadd.f32 %v327_v4, %v326_v6  ;;  %v341_v4 = vsel %vm181_vm0, %v297_v41, 0.0  ;;  %v347_v34 = vsel %vm181_vm0, %v300_v27, 0.0  ;;  %v1219_v9 = vsub.f32 %v791_v21, %v1046_v14 }
  0x70   : > { %v1227_v60 = vsub.f32 %v792_v28, %v1046_v14  ;;  %v305_v15 = vmul.f32 %v1211_v53, %v1211_v53  ;;  %v1235_v21 = vsub.f32 %v795_v33, %v1046_v14  ;;  %v1243_v12 = vsub.f32 %v796_v40, %v1046_v14 }
  0x71   : > { %v330_v5 = vadd.f32 %v329_v35, %v328_v38  ;;  %v343_v35 = vsel %vm181_vm0, %v298_v10, 0.0  ;;  %v306_v10 = vmul.f32 %v1219_v9, %v1219_v9  ;;  %v1251_v33 = vsub.f32 %v799_v45, %v1046_v14 }
  0x72   : > { %v307_v28 = vmul.f32 %v1227_v60, %v1227_v60  ;;  %v357_v48 = vsel %vm181_vm0, %v305_v15, 0.0  ;;  %v1259_v24 = vsub.f32 %v800_v52, %v1046_v14  ;;  %v309_v40 = vmul.f32 %v1243_v12, %v1243_v12 }
  0x73   : > { %v332_v16 = vadd.f32 %v331_v43, %v330_v5  ;;  %v302_v5 = vmul.f32 %v1187_v51, %v1187_v51  ;;  %v359_v27 = vsel %vm181_vm0, %v306_v10, 0.0  ;;  %v1267_v45 = vsub.f32 %v803_v57, %v1046_v14 }
  0x74   : > { %v1275_v36 = vsub.f32 %v804_v8, %v1046_v14  ;;  %v311_v52 = vmul.f32 %v1259_v24, %v1259_v24  ;;  %v1283_v57 = vsub.f32 %v807_v17, %v1046_v14  ;;  %v1291_v49 = vsub.f32 %v808_v26, %v1046_v14 }
  0x75   : > { %v334_v59 = vadd.f32 %v333_v47, %v332_v16  ;;  %v349_v16 = vsel %vm181_vm0, %v301_v55, 0.0 }
  0x76   : > { %v313_v8 = vmul.f32 %v1275_v36, %v1275_v36  ;;  %v314_v17 = vmul.f32 %v1283_v57, %v1283_v57 }
  0x77   : > { %v336_v20 = vadd.f32 %v335_v56, %v334_v59  ;;  %v304_v56 = vmul.f32 %v1203_v58, %v1203_v58  ;;  %v351_v59 = vsel %vm181_vm0, %v302_v5, 0.0 }
  0x78   : > { %v375_v26 = vsel %vm181_vm0, %v314_v17, 0.0 }
  0x79   : > { %v338_v3 = vadd.f32 %v337_v63, %v336_v20  ;;  %v353_v63 = vsel %vm181_vm0, %v303_v62, 0.0  ;;  %v312_v62 = vmul.f32 %v1267_v45, %v1267_v45 }
  0x7b   : > { %v340_v6 = vadd.f32 %v339_v0, %v338_v3  ;;  %v355_v0 = vsel %vm181_vm0, %v304_v56, 0.0  ;;  %v369_v56 = vsel %vm181_vm0, %v311_v52, 0.0 }
  0x7d   : > { %v342_v38 = vadd.f32 %v341_v4, %v340_v6  ;;  %v308_v6 = vmul.f32 %v1235_v21, %v1235_v21 }
  0x7f   : > { %v344_v43 = vadd.f32 %v343_v35, %v342_v38  ;;  %v361_v38 = vsel %vm181_vm0, %v307_v28, 0.0 }
  0x81   : > { %v346_v47 = vadd.f32 %v345_v42, %v344_v43  ;;  %v310_v42 = vmul.f32 %v1251_v33, %v1251_v33  ;;  %v363_v43 = vsel %vm181_vm0, %v308_v6, 0.0 }
  0x83   : > { %v348_v50 = vadd.f32 %v347_v34, %v346_v47  ;;  %v365_v34 = vsel %vm181_vm0, %v309_v40, 0.0 }
  0x85   : > { %v350_v41 = vadd.f32 %v349_v16, %v348_v50  ;;  %v367_v16 = vsel %vm181_vm0, %v310_v42, 0.0 }
  0x87   : > { %v352_v20 = vadd.f32 %v351_v59, %v350_v41  ;;  %v371_v41 = vsel %vm181_vm0, %v312_v62, 0.0 }
  0x89   : > { %v354_v3 = vadd.f32 %v353_v63, %v352_v20  ;;  %v315_v63 = vmul.f32 %v1291_v49, %v1291_v49  ;;  %v373_v20 = vsel %vm181_vm0, %v313_v8, 0.0 }
  0x8b   : > { %v356_v4 = vadd.f32 %v355_v0, %v354_v3  ;;  %v377_v10 = vsel %vm181_vm0, %v315_v63, 0.0 }
  0x8d   : > { %v358_v35 = vadd.f32 %v357_v48, %v356_v4 }
  0x8f   : > { %v360_v55 = vadd.f32 %v359_v27, %v358_v35 }
  0x91   : > { %v362_v5 = vadd.f32 %v361_v38, %v360_v55 }
  0x93   : > { %v364_v47 = vadd.f32 %v363_v43, %v362_v5 }
  0x95   : > { %v366_v50 = vadd.f32 %v365_v34, %v364_v47 }
  0x97   : > { %v368_v59 = vadd.f32 %v367_v16, %v366_v50 }
  0x99   : > { %v370_v15 = vadd.f32 %v369_v56, %v368_v59 }
  0x9b   : > { %v372_v61 = vadd.f32 %v371_v41, %v370_v15 }
  0x9d   : > { %v374_v14 = vadd.f32 %v373_v20, %v372_v61 }
  0x9f   : > { %v376_v0 = vadd.f32 %v375_v26, %v374_v14 }
  0xa1   : > { %v378_v3 = vadd.f32 %v377_v10, %v376_v0 }
  0xa3   : > { %v379_v28 = vrot.slane %v378_v3, 4 }
  0xa5   : > { %v380_v48 = vadd.f32 %v379_v28, %v378_v3 }
  0xa7   : > { %v381_v4 = vrot.slane %v380_v48, 2 }
  0xa9   : > { %v382_v6 = vadd.f32 %v381_v4, %v380_v48 }
  0xab   : > { %v383_v27 = vrot.slane %v382_v6, 1 }
  0xad   : > { %v384_v35 = vadd.f32 %v383_v27, %v382_v6 }
  0xaf   : > { %v385_v40 = vmul.f32 0.00390625, %v384_v35 }
  0xb1   : > { %v386_v38 = vadd.f32 1e-05, %v385_v40 }
  0xb3   : > { %832 = vrsqrt.f32 %v386_v38 }
  0xbd   : > { %v1304_v55 = vpop.eup %832 }
  0xbe   : > { %v388_v42 = vmul.f32 %v1304_v55, %v1051_v19  ;;  %v389_v43 = vmul.f32 %v1304_v55, %v1056_v22  ;;  %v390_v5 = vmul.f32 %v1304_v55, %v1061_v29  ;;  %v391_v52 = vmul.f32 %v1304_v55, %v1066_v31 }
  0xbf   : > { %v392_v34 = vmul.f32 %v1304_v55, %v1071_v2  ;;  %v393_v47 = vmul.f32 %v1304_v55, %v1082_v1  ;;  %v394_v62 = vmul.f32 %v1304_v55, %v1089_v7  ;;  %v395_v19 = vmul.f32 %v1304_v55, %v1099_v13 }
  0xc0   : > { %v420_v16 = vmax.f32 %v388_v42, 0.0  ;;  %v421_v22 = vmax.f32 %v389_v43, 0.0  ;;  %v422_v50 = vmax.f32 %v390_v5, 0.0  ;;  %v423_v8 = vmax.f32 %v391_v52, 0.0 }
  0xc1   : > { %v424_v29 = vmax.f32 %v392_v34, 0.0  ;;  %v425_v31 = vmax.f32 %v393_v47, 0.0  ;;  %v426_v2 = vmax.f32 %v394_v62, 0.0  ;;  %v427_v1 = vmax.f32 %v395_v19, 0.0 }
  0xc2   : > { %v713_v7 = vpack.c.bf16 %v420_v16, %v420_v16  ;;  %v714_v13 = vpack.c.bf16 %v421_v22, %v421_v22  ;;  %v715_v56 = vpack.c.bf16 %v422_v50, %v422_v50  ;;  %v716_v59 = vpack.c.bf16 %v423_v8, %v423_v8 }
  0xc3   : > { %v717_v17 = vpack.c.bf16 %v424_v29, %v424_v29  ;;  %v718_v41 = vpack.c.bf16 %v425_v31, %v425_v31  ;;  %v719_v15 = vpack.c.bf16 %v426_v2, %v426_v2  ;;  %v720_v63 = vpack.c.bf16 %v427_v1, %v427_v1 }
  0xc4   : > { %581 = vst.msk [vmem:[%s1327_s14] sm:$0xf] %vm580_vm1, %v713_v7  ;;  %582 = vst.msk [vmem:[%s1327_s14 + $0x4] sm:$0xf] %vm580_vm1, %v714_v13  ;;  %v396_v20 = vmul.f32 %v1304_v55, %v1107_v54  ;;  %v397_v61 = vmul.f32 %v1304_v55, %v1115_v11  ;;  %v398_v26 = vmul.f32 %v1304_v55, %v1123_v23 }
  0xc5   : > { %583 = vst.msk [vmem:[%s1327_s14 + $0x8] sm:$0xf] %vm580_vm1, %v715_v56  ;;  %584 = vst.msk [vmem:[%s1327_s14 + $0xc] sm:$0xf] %vm580_vm1, %v716_v59  ;;  %v399_v14 = vmul.f32 %v1304_v55, %v1131_v18  ;;  %v400_v54 = vmul.f32 %v1304_v55, %v1139_v30  ;;  %v401_v11 = vmul.f32 %v1304_v55, %v1147_v25 }
  0xc6   : > { %585 = vst.msk [vmem:[%s1327_s14 + $0x10] sm:$0xf] %vm580_vm1, %v717_v17  ;;  %586 = vst.msk [vmem:[%s1327_s14 + $0x14] sm:$0xf] %vm580_vm1, %v718_v41  ;;  %v402_v23 = vmul.f32 %v1304_v55, %v1155_v37  ;;  %v403_v18 = vmul.f32 %v1304_v55, %v1163_v32  ;;  %v428_v10 = vmax.f32 %v396_v20, 0.0  ;;  %v429_v0 = vmax.f32 %v397_v61, 0.0 }
  0xc7   : > { %587 = vst.msk [vmem:[%s1327_s14 + $0x18] sm:$0xf] %vm580_vm1, %v719_v15  ;;  %588 = vst.msk [vmem:[%s1327_s14 + $0x1c] sm:$0xf] %vm580_vm1, %v720_v63  ;;  %v430_v3 = vmax.f32 %v398_v26, 0.0  ;;  %v431_v28 = vmax.f32 %v399_v14, 0.0  ;;  %v404_v43 = vmul.f32 %v1304_v55, %v1171_v44  ;;  %v405_v5 = vmul.f32 %v1304_v55, %v1179_v39 }
  0xc8   : > { %v432_v48 = vmax.f32 %v400_v54, 0.0  ;;  %v433_v4 = vmax.f32 %v401_v11, 0.0  ;;  %v434_v30 = vmax.f32 %v402_v23, 0.0  ;;  %v435_v6 = vmax.f32 %v403_v18, 0.0 }
  0xc9   : > { %v721_v27 = vpack.c.bf16 %v428_v10, %v428_v10  ;;  %v722_v25 = vpack.c.bf16 %v429_v0, %v429_v0  ;;  %v723_v37 = vpack.c.bf16 %v430_v3, %v430_v3  ;;  %v724_v35 = vpack.c.bf16 %v431_v28, %v431_v28 }
  0xca   : > { %v725_v32 = vpack.c.bf16 %v432_v48, %v432_v48  ;;  %v726_v40 = vpack.c.bf16 %v433_v4, %v433_v4  ;;  %v727_v38 = vpack.c.bf16 %v434_v30, %v434_v30  ;;  %v728_v42 = vpack.c.bf16 %v435_v6, %v435_v6 }
  0xcb   : > { %589 = vst.msk [vmem:[%s1327_s14 + $0x20] sm:$0xf] %vm580_vm1, %v721_v27  ;;  %590 = vst.msk [vmem:[%s1327_s14 + $0x24] sm:$0xf] %vm580_vm1, %v722_v25  ;;  %v406_v52 = vmul.f32 %v1304_v55, %v1187_v51  ;;  %v407_v34 = vmul.f32 %v1304_v55, %v1195_v46  ;;  %v408_v44 = vmul.f32 %v1304_v55, %v1203_v58  ;;  %v436_v47 = vmax.f32 %v404_v43, 0.0 }
  0xcc   : > { %591 = vst.msk [vmem:[%s1327_s14 + $0x28] sm:$0xf] %vm580_vm1, %v723_v37  ;;  %592 = vst.msk [vmem:[%s1327_s14 + $0x2c] sm:$0xf] %vm580_vm1, %v724_v35  ;;  %v409_v39 = vmul.f32 %v1304_v55, %v1211_v53  ;;  %v410_v51 = vmul.f32 %v1304_v55, %v1219_v9  ;;  %v411_v46 = vmul.f32 %v1304_v55, %v1227_v60  ;;  %v437_v62 = vmax.f32 %v405_v5, 0.0 }
  0xcd   : > { %593 = vst.msk [vmem:[%s1327_s14 + $0x30] sm:$0xf] %vm580_vm1, %v725_v32  ;;  %594 = vst.msk [vmem:[%s1327_s14 + $0x34] sm:$0xf] %vm580_vm1, %v726_v40  ;;  %v438_v19 = vmax.f32 %v406_v52, 0.0  ;;  %v439_v16 = vmax.f32 %v407_v34, 0.0  ;;  %v729_v29 = vpack.c.bf16 %v436_v47, %v436_v47  ;;  %v412_v13 = vmul.f32 %v1304_v55, %v1235_v21 }
  0xce   : > { %595 = vst.msk [vmem:[%s1327_s14 + $0x38] sm:$0xf] %vm580_vm1, %v727_v38  ;;  %596 = vst.msk [vmem:[%s1327_s14 + $0x3c] sm:$0xf] %vm580_vm1, %v728_v42  ;;  %v440_v22 = vmax.f32 %v408_v44, 0.0  ;;  %v441_v50 = vmax.f32 %v409_v39, 0.0  ;;  %v730_v53 = vpack.c.bf16 %v437_v62, %v437_v62  ;;  %v413_v56 = vmul.f32 %v1304_v55, %v1243_v12 }
  0xcf   : > { %v442_v58 = vmax.f32 %v410_v51, 0.0  ;;  %v443_v8 = vmax.f32 %v411_v46, 0.0  ;;  %v731_v9 = vpack.c.bf16 %v438_v19, %v438_v19  ;;  %v732_v31 = vpack.c.bf16 %v439_v16, %v439_v16  ;;  %597 = vst.msk [vmem:[%s1327_s14 + $0x40] sm:$0xf] %vm580_vm1, %v729_v29 }
  0xd0   : > { %v733_v60 = vpack.c.bf16 %v440_v22, %v440_v22  ;;  %v734_v2 = vpack.c.bf16 %v441_v50, %v441_v50  ;;  %598 = vst.msk [vmem:[%s1327_s14 + $0x44] sm:$0xf] %vm580_vm1, %v730_v53  ;;  %v414_v59 = vmul.f32 %v1304_v55, %v1251_v33  ;;  %v415_v17 = vmul.f32 %v1304_v55, %v1259_v24 }
  0xd1   : > { %v735_v1 = vpack.c.bf16 %v442_v58, %v442_v58  ;;  %v736_v7 = vpack.c.bf16 %v443_v8, %v443_v8  ;;  %599 = vst.msk [vmem:[%s1327_s14 + $0x48] sm:$0xf] %vm580_vm1, %v731_v9  ;;  %600 = vst.msk [vmem:[%s1327_s14 + $0x4c] sm:$0xf] %vm580_vm1, %v732_v31  ;;  %v416_v21 = vmul.f32 %v1304_v55, %v1267_v45  ;;  %v444_v41 = vmax.f32 %v412_v13, 0.0 }
  0xd2   : > { %601 = vst.msk [vmem:[%s1327_s14 + $0x50] sm:$0xf] %vm580_vm1, %v733_v60  ;;  %602 = vst.msk [vmem:[%s1327_s14 + $0x54] sm:$0xf] %vm580_vm1, %v734_v2  ;;  %v417_v12 = vmul.f32 %v1304_v55, %v1275_v36  ;;  %v418_v33 = vmul.f32 %v1304_v55, %v1283_v57  ;;  %v419_v24 = vmul.f32 %v1304_v55, %v1291_v49  ;;  %v445_v15 = vmax.f32 %v413_v56, 0.0 }
  0xd3   : > { %603 = vst.msk [vmem:[%s1327_s14 + $0x58] sm:$0xf] %vm580_vm1, %v735_v1  ;;  %604 = vst.msk [vmem:[%s1327_s14 + $0x5c] sm:$0xf] %vm580_vm1, %v736_v7  ;;  %v446_v63 = vmax.f32 %v414_v59, 0.0  ;;  %v447_v20 = vmax.f32 %v415_v17, 0.0  ;;  %v737_v57 = vpack.c.bf16 %v444_v41, %v444_v41 }
  0xd4   : > { %v448_v61 = vmax.f32 %v416_v21, 0.0  ;;  %v449_v45 = vmax.f32 %v417_v12, 0.0  ;;  %v450_v26 = vmax.f32 %v418_v33, 0.0  ;;  %v451_v36 = vmax.f32 %v419_v24, 0.0 }
  0xd5   : > { %v738_v14 = vpack.c.bf16 %v445_v15, %v445_v15  ;;  %v739_v54 = vpack.c.bf16 %v446_v63, %v446_v63  ;;  %v740_v49 = vpack.c.bf16 %v447_v20, %v447_v20  ;;  %605 = vst.msk [vmem:[%s1327_s14 + $0x60] sm:$0xf] %vm580_vm1, %v737_v57 }
  0xd6   : > { %v741_v55 = vpack.c.bf16 %v448_v61, %v448_v61  ;;  %v742_v11 = vpack.c.bf16 %v449_v45, %v449_v45  ;;  %v743_v23 = vpack.c.bf16 %v450_v26, %v450_v26  ;;  %v744_v18 = vpack.c.bf16 %v451_v36, %v451_v36 }
  0xd7   : > { %606 = vst.msk [vmem:[%s1327_s14 + $0x64] sm:$0xf] %vm580_vm1, %v738_v14  ;;  %607 = vst.msk [vmem:[%s1327_s14 + $0x68] sm:$0xf] %vm580_vm1, %v739_v54 }
  0xd8   : > { %608 = vst.msk [vmem:[%s1327_s14 + $0x6c] sm:$0xf] %vm580_vm1, %v740_v49  ;;  %609 = vst.msk [vmem:[%s1327_s14 + $0x70] sm:$0xf] %vm580_vm1, %v741_v55 }
  0xd9   : > { %610 = vst.msk [vmem:[%s1327_s14 + $0x74] sm:$0xf] %vm580_vm1, %v742_v11  ;;  %611 = vst.msk [vmem:[%s1327_s14 + $0x78] sm:$0xf] %vm580_vm1, %v743_v23 }
  0xda   : > { %612 = vst.msk [vmem:[%s1327_s14 + $0x7c] sm:$0xf] %vm580_vm1, %v744_v18 }
  0xdb PF: > { %s11_s6 = sadd.s32 1, %s840_s6  }
  0xdc   : > { %p8_p4 = scmp.ge.s32.totalorder %s11_s6, 4  }
  0xde   :  { %10 = sbr.rel (!%p8_p4) target bundleno = 1 (0x1), region = 54 }

// kernel: residual_oct_block.11
= control target key start
LH: loop header
LB: loop body
LE: loop exit
PB: predicated region body
PF: predicated region fallthrough
CT: control target
= control target key end

     0   :  { %s384_s6 = smov 0   ;;  %s432_s0 = inlined_call_operand.vmem [shape: bf16[2,64,1], index: 0, kind: input, shape index: {}]   ;;  %s433_s1 = inlined_call_operand.vmem [shape: bf16[2,64,1], index: 1, kind: output, shape index: {}]  }
   0x1 LB: > { %s308_s7 = sadd.s32 4294967295, %s372_s6   ;;  %p312_p0 = scmp.ge.s32.totalorder %s372_s6, 1  ;;  %s372_s6 = sphi %s384_s6, %s11_s6  }
   0x2   : > { %p87_p1 = scmp.lt.s32.totalorder %s372_s6, 3 }
   0x4   : > { %p88_p2 = pnand %p312_p0, %p87_p1 }
   0x5   : > { %p107_p3 = scmp.lt.s32.totalorder (!%p88_p2), %s308_s7, 1  ;;  %vm133_vm0 = vcmask (!%p88_p2), 7168   ;;  %vm244_vm1 = vcmask (!%p88_p2), 3072  }
   0x6   : > { %91 = sbr.rel (%p88_p2) target bundleno = 104 (0x68), region = 24 }
   0xd   : > { %s435_s7 = smov (!%p107_p3, %s308_s7), 1 }
   0xe   : > { %s327_s8 = sshll.u32 %s435_s7, 5 }
   0xf   : > { %s111_s11 = scalar_lea.vmem %s432_s0, %s327_s8  ;;  %s116_s14 = scalar_lea.vmem %s433_s1, %s327_s8 }
  0x10   : > { %v338_v0 = vld [vmem:[%s111_s11] sm:$0xff]   ;;  %v353_v1 = vld [vmem:[%s111_s11 + $0x8] sm:$0xff]   ;;  %v354_v2 = vld [vmem:[%s111_s11 + $0x10] sm:$0xff]  }
  0x11   : > { %v339_v3 = vunpack.c.l.bf16 %v338_v0  ;;  %v340_v4 = vunpack.c.h.bf16 %v338_v0  ;;  %v343_v5 = vunpack.c.l.bf16 %v353_v1  ;;  %v344_v6 = vunpack.c.h.bf16 %v353_v1  ;;  %v355_v11 = vld [vmem:[%s111_s11 + $0x18] sm:$0xff]  }
  0x12   : > { %v347_v7 = vunpack.c.l.bf16 %v354_v2  ;;  %v348_v13 = vunpack.c.h.bf16 %v354_v2  ;;  %v351_v16 = vunpack.c.l.bf16 %v355_v11  ;;  %v352_v19 = vunpack.c.h.bf16 %v355_v11 }
  0x13   : > { %v134_v8 = vsel %vm133_vm0, %v339_v3, 0.0  ;;  %v135_v9 = vsel %vm133_vm0, %v340_v4, 0.0  ;;  %v137_v10 = vsel %vm133_vm0, %v343_v5, 0.0  ;;  %v139_v14 = vsel %vm133_vm0, %v344_v6, 0.0 }
  0x14   : > { %v136_v12 = vadd.f32 %v135_v9, %v134_v8  ;;  %v141_v17 = vsel %vm133_vm0, %v347_v7, 0.0  ;;  %v143_v20 = vsel %vm133_vm0, %v348_v13, 0.0  ;;  %v145_v22 = vsel %vm133_vm0, %v351_v16, 0.0 }
  0x15   : > { %v147_v24 = vsel %vm133_vm0, %v352_v19, 0.0 }
  0x16   : > { %v138_v15 = vadd.f32 %v137_v10, %v136_v12 }
  0x18   : > { %v140_v18 = vadd.f32 %v139_v14, %v138_v15 }
  0x1a   : > { %v142_v21 = vadd.f32 %v141_v17, %v140_v18 }
  0x1c   : > { %v144_v23 = vadd.f32 %v143_v20, %v142_v21 }
  0x1e   : > { %v146_v25 = vadd.f32 %v145_v22, %v144_v23 }
  0x20   : > { %v148_v26 = vadd.f32 %v147_v24, %v146_v25 }
  0x22   : > { %v149_v27 = vrot.slane %v148_v26, 4 }
  0x24   : > { %v150_v28 = vadd.f32 %v149_v27, %v148_v26 }
  0x26   : > { %v151_v29 = vrot.slane %v150_v28, 2 }
  0x28   : > { %v152_v30 = vadd.f32 %v151_v29, %v150_v28 }
  0x2a   : > { %v153_v31 = vrot.slane %v152_v30, 1 }
  0x2c   : > { %v154_v32 = vadd.f32 %v153_v31, %v152_v30 }
  0x2e   : > { %v155_v33 = vmul.f32 0.015625, %v154_v32 }
  0x30   : > { %v156_v34 = vsub.f32 %v339_v3, %v155_v33  ;;  %v157_v35 = vsub.f32 %v340_v4, %v155_v33  ;;  %v158_v36 = vsub.f32 %v343_v5, %v155_v33  ;;  %v159_v37 = vsub.f32 %v344_v6, %v155_v33 }
  0x31   : > { %v160_v38 = vsub.f32 %v347_v7, %v155_v33  ;;  %v161_v39 = vsub.f32 %v348_v13, %v155_v33  ;;  %v162_v44 = vsub.f32 %v351_v16, %v155_v33  ;;  %v163_v50 = vsub.f32 %v352_v19, %v155_v33 }
  0x32   : > { %v164_v40 = vmul.f32 %v156_v34, %v156_v34  ;;  %v165_v41 = vmul.f32 %v157_v35, %v157_v35  ;;  %v166_v42 = vmul.f32 %v158_v36, %v158_v36  ;;  %v167_v43 = vmul.f32 %v159_v37, %v159_v37 }
  0x33   : > { %v168_v45 = vmul.f32 %v160_v38, %v160_v38  ;;  %v169_v51 = vmul.f32 %v161_v39, %v161_v39  ;;  %v170_v54 = vmul.f32 %v162_v44, %v162_v44  ;;  %v171_v57 = vmul.f32 %v163_v50, %v163_v50 }
  0x34   : > { %v172_v46 = vsel %vm133_vm0, %v164_v40, 0.0  ;;  %v173_v47 = vsel %vm133_vm0, %v165_v41, 0.0  ;;  %v175_v48 = vsel %vm133_vm0, %v166_v42, 0.0  ;;  %v177_v52 = vsel %vm133_vm0, %v167_v43, 0.0 }
  0x35   : > { %v174_v49 = vadd.f32 %v173_v47, %v172_v46  ;;  %v179_v55 = vsel %vm133_vm0, %v168_v45, 0.0  ;;  %v181_v58 = vsel %vm133_vm0, %v169_v51, 0.0  ;;  %v183_v60 = vsel %vm133_vm0, %v170_v54, 0.0 }
  0x36   : > { %v185_v62 = vsel %vm133_vm0, %v171_v57, 0.0 }
  0x37   : > { %v176_v53 = vadd.f32 %v175_v48, %v174_v49 }
  0x39   : > { %v178_v56 = vadd.f32 %v177_v52, %v176_v53 }
  0x3b   : > { %v180_v59 = vadd.f32 %v179_v55, %v178_v56 }
  0x3d   : > { %v182_v61 = vadd.f32 %v181_v58, %v180_v59 }
  0x3f   : > { %v184_v63 = vadd.f32 %v183_v60, %v182_v61 }
  0x41   : > { %v186_v0 = vadd.f32 %v185_v62, %v184_v63 }
  0x43   : > { %v187_v1 = vrot.slane %v186_v0, 4 }
  0x45   : > { %v188_v2 = vadd.f32 %v187_v1, %v186_v0 }
  0x47   : > { %v189_v3 = vrot.slane %v188_v2, 2 }
  0x49   : > { %v190_v4 = vadd.f32 %v189_v3, %v188_v2 }
  0x4b   : > { %v191_v5 = vrot.slane %v190_v4, 1 }
  0x4d   : > { %v192_v6 = vadd.f32 %v191_v5, %v190_v4 }
  0x4f   : > { %v193_v7 = vmul.f32 0.015625, %v192_v6 }
  0x51   : > { %v194_v8 = vadd.f32 1e-05, %v193_v7 }
  0x53   : > { %364 = vrsqrt.f32 %v194_v8 }
  0x5d   : > { %v365_v9 = vpop.eup %364 }
  0x5e   : > { %v196_v10 = vmul.f32 %v365_v9, %v156_v34  ;;  %v197_v11 = vmul.f32 %v365_v9, %v157_v35  ;;  %v198_v12 = vmul.f32 %v365_v9, %v158_v36  ;;  %v199_v13 = vmul.f32 %v365_v9, %v159_v37 }
  0x5f   : > { %v200_v14 = vmul.f32 %v365_v9, %v160_v38  ;;  %v201_v15 = vmul.f32 %v365_v9, %v161_v39  ;;  %v202_v16 = vmul.f32 %v365_v9, %v162_v44  ;;  %v203_v17 = vmul.f32 %v365_v9, %v163_v50 }
  0x60   : > { %v204_v18 = vmax.f32 %v196_v10, 0.0  ;;  %v205_v19 = vmax.f32 %v197_v11, 0.0  ;;  %v206_v20 = vmax.f32 %v198_v12, 0.0  ;;  %v207_v21 = vmax.f32 %v199_v13, 0.0 }
  0x61   : > { %v208_v22 = vmax.f32 %v200_v14, 0.0  ;;  %v209_v23 = vmax.f32 %v201_v15, 0.0  ;;  %v210_v24 = vmax.f32 %v202_v16, 0.0  ;;  %v211_v25 = vmax.f32 %v203_v17, 0.0 }
  0x62   : > { %v329_v26 = vpack.c.bf16 %v204_v18, %v204_v18  ;;  %v330_v27 = vpack.c.bf16 %v205_v19, %v205_v19  ;;  %v331_v28 = vpack.c.bf16 %v206_v20, %v206_v20  ;;  %v332_v29 = vpack.c.bf16 %v207_v21, %v207_v21 }
  0x63   : > { %v333_v30 = vpack.c.bf16 %v208_v22, %v208_v22  ;;  %v334_v31 = vpack.c.bf16 %v209_v23, %v209_v23  ;;  %v335_v32 = vpack.c.bf16 %v210_v24, %v210_v24  ;;  %v336_v33 = vpack.c.bf16 %v211_v25, %v211_v25 }
  0x64   : > { %245 = vst.msk [vmem:[%s116_s14] sm:$0xf] %vm244_vm1, %v329_v26  ;;  %246 = vst.msk [vmem:[%s116_s14 + $0x4] sm:$0xf] %vm244_vm1, %v330_v27 }
  0x65   : > { %247 = vst.msk [vmem:[%s116_s14 + $0x8] sm:$0xf] %vm244_vm1, %v331_v28  ;;  %248 = vst.msk [vmem:[%s116_s14 + $0xc] sm:$0xf] %vm244_vm1, %v332_v29 }
  0x66   : > { %249 = vst.msk [vmem:[%s116_s14 + $0x10] sm:$0xf] %vm244_vm1, %v333_v30  ;;  %250 = vst.msk [vmem:[%s116_s14 + $0x14] sm:$0xf] %vm244_vm1, %v334_v31 }
  0x67   : > { %251 = vst.msk [vmem:[%s116_s14 + $0x18] sm:$0xf] %vm244_vm1, %v335_v32  ;;  %252 = vst.msk [vmem:[%s116_s14 + $0x1c] sm:$0xf] %vm244_vm1, %v336_v33 }
  0x68 PF: > { %s11_s6 = sadd.s32 1, %s372_s6  }
  0x69   : > { %p8_p4 = scmp.ge.s32.totalorder %s11_s6, 4  }
  0x6b   :  { %10 = sbr.rel (!%p8_p4) target bundleno = 1 (0x1), region = 54 }

// kernel: residual_oct_block.9
= control target key start
LH: loop header
LB: loop body
LE: loop exit
PB: predicated region body
PF: predicated region fallthrough
CT: control target
= control target key end

     0   :  { %s1427_s15 = smov 0   ;;  %s1429_s16 = smov 0   ;;  %s1820_s0 = inlined_call_operand.vmem [shape: bf16[2,16,18,4], index: 0, kind: input, shape index: {}]   ;;  %s1821_s1 = inlined_call_operand.vmem [shape: bf16[2,4,18,4], index: 1, kind: input, shape index: {}]   ;;  %s1822_s2 = inlined_call_operand.vmem [shape: bf16[36,3], index: 2, kind: input, shape index: {}]   ;;  %s1823_s3 = inlined_call_operand.vmem [shape: bf16[2,128,3], index: 3, kind: input, shape index: {}]   ;;  %s1824_s4 = inlined_call_operand.vmem [shape: bf16[2,256,3], index: 4, kind: output, shape index: {}]  }
   0x1   :  { %s1431_s17 = smov 0   ;;  %s1433_s18 = smov 0  }
   0x2   :  { %s1435_s19 = smov 0  }
   0x3 LB: > { %s23_s20 = sadd.s32 1, %s1388_s17  ;;  %s26_s21 = sadd.s32 1, %s1392_s18  ;;  %s1396_s19 = sphi %s1435_s19, %s14_s19   ;;  %s1392_s18 = sphi %s1433_s18, %s1828_s18   ;;  %s1388_s17 = sphi %s1431_s17, %s1827_s17   ;;  %s1384_s16 = sphi %s1429_s16, %s1826_s16   ;;  %s1380_s15 = sphi %s1427_s15, %s1825_s15  }
   0x4   : > { %p24_p0 = scmp.ge.s32.totalorder %s23_s20, 2  ;;  %p1148_p1 = scmp.ge.s32.totalorder %s1396_s19, 1 }
   0x5   : > { %p219_p2 = scmp.lt.s32.totalorder %s1396_s19, 5 }
   0x6   : > { %s1830_s20 = smov (%p24_p0, %s23_s20), 0  ;;  %s1832_s21 = smov (!%p24_p0, %s26_s21), %s1392_s18 }
   0x7   : > { %p220_p3 = pnand %p1148_p1, %p219_p2  ;;  %p28_p4 = scmp.ge.s32.totalorder %s1832_s21, 2 }
   0x8   : > { %s1149_s22 = sshll.u32 (!%p220_p3), %s1380_s15, 3  ;;  %p274_p5 = scmp.lt.s32.totalorder (!%p220_p3), %s1384_s16, 1  ;;  %vm496_vm0 = vcmask (!%p220_p3), 31744   ;;  %vm545_vm1 = vcmask (!%p220_p3), 64512   ;;  %v1355_v30 = vld [vmem:[%s1822_s2] sm:$0xff] (!%p220_p3)   ;;  %vm691_vm2 = vcmask (!%p220_p3), 1046528  }
   0x9   : > { %s1834_s21 = smov (%p28_p4, %s1832_s21), 0  ;;  %223 = sbr.rel (%p220_p3) target bundleno = 555 (0x22b), region = 36 }
   0xa   : > { %p276_p6 = scmp.lt.s32.totalorder (!%p220_p3), %s1149_s22, 15  ;;  %s1151_s25 = sshll.u32 (!%p220_p3), %s1380_s15, 1  ;;  %1257 = vmatprep.subr.bf16.mxu0 (!%p220_p3), %v1355_v30  ;;  %1279 = vmatprep.subr.bf16.mxu1 (!%p220_p3), %v1355_v30  ;;  %vm578_vm3 = vsmask.f32 (!%p220_p3), 7424  ;;  %vm798_vm4 = vcmask (!%p220_p3), 1041408   ;;  %vm732_vm5 = vcmask (!%p220_p3), 97280  }
   0xb   : > { %p287_p7 = scmp.lt.s32.totalorder (!%p220_p3), %s1151_s25, 3  ;;  %s1398_s5 = smov (!%p220_p3), 4   ;;  %1258 = vmatpush3.bf16.msra.mxu0 (!%p220_p3), %v1355_v30  ;;  %1282 = vmatpush3.bf16.msra.mxu1 (!%p220_p3), %v1355_v30  ;;  %vm749_vm6 = vcmask (!%p220_p3), 195584   ;;  %vm781_vm7 = vcmask (!%p220_p3), 293888   ;;  %vm995_vm8 = vcmask (!%p220_p3), 19456  }
   0xc   : > { %s1399_s9 = smov (!%p220_p3), 8   ;;  %s1401_s29 = smov (!%p220_p3), 12  }
  0x10   : > { %s1836_s16 = smov (!%p274_p5, %s1384_s16), 1  ;;  %s1838_s22 = smov (!%p276_p6, %s1149_s22), 15 }
  0x11   : > { %s1288_s23 = smul.u32 48, %s1836_s16  ;;  %s1840_s25 = smov (!%p287_p7, %s1151_s25), 3 }
  0x12   : > { %s1287_s24 = smul.u32 3, %s1838_s22  ;;  %s1157_s11 = sshll.u32 %s1836_s16, 5 }
  0x13   : > { %s1290_s6 = smul.u32 12, %s1836_s16 }
  0x14   : > { %s280_s26 = sadd.s32 %s1288_s23, %s1287_s24  ;;  %s1289_s7 = smul.u32 3, %s1840_s25 }
  0x15   : > { %s1150_s27 = sshll.u32 %s280_s26, 2  ;;  %s1400_s24 = smov 24  }
  0x16   : > { %s1470_s30 = scalar_lea.vmem %s1820_s0, %s1150_s27  ;;  %s291_s8 = sadd.s32 %s1290_s6, %s1289_s7 }
  0x17   : > { %v1473_v0 = vld [vmem:[%s1470_s30 + $0xc] sm:$0xff]   ;;  %v1476_v1 = vld [vmem:[%s1470_s30] sm:$0xff]   ;;  %v1494_v4 = vld [vmem:[%s1470_s30 + $0x38] ss:$0 sps:$4 sm:$0x11]   ;;  %s1152_s10 = sshll.u32 %s291_s8, 2 }
  0x18   : > { %428 = vrot.lane.b32.xlu1 %v1473_v0, %s1398_s5  ;;  %v1481_v2 = vld [vmem:[%s1470_s30 + $0x3c] sm:$0xff]   ;;  %424 = vrot.lane.b32.xlu0 %v1476_v1, %s1398_s5  ;;  %v1486_v3 = vld [vmem:[%s1470_s30 + $0x30] sm:$0xff]   ;;  %s1506_s13 = scalar_lea.vmem %s1821_s1, %s1152_s10  ;;  %s1156_s6 = sshll.u32 %s1380_s15, 4 }
  0x19   : > { %v1499_v5 = vld [vmem:[%s1470_s30 + $0x8] ss:$0 sps:$4 sm:$0x11]   ;;  %v1516_v7 = vld [vmem:[%s1470_s30 + $0x18] sm:$0xff]   ;;  %v1349_v14 = vld [vmem:[%s1506_s13 + $0xc] sm:$0xff]   ;;  %p308_p8 = scmp.lt.s32.totalorder %s1156_s6, 31 }
  0x1a   : > { %v1511_v6 = vld [vmem:[%s1470_s30 + $0x48] sm:$0xff]   ;;  %v1521_v8 = vld [vmem:[%s1470_s30 + $0x44] ss:$0 sps:$4 sm:$0x11]   ;;  %v1347_v12 = vld [vmem:[%s1470_s30 + $0x54] sm:$0xff]  }
  0x1b   : > { %v1526_v9 = vld [vmem:[%s1470_s30 + $0x14] ss:$0 sps:$4 sm:$0x11]   ;;  %v1535_v10 = vld [vmem:[%s1470_s30 + $0x50] ss:$0 sps:$4 sm:$0x11]  }
  0x1c   : > { %444 = vrot.lane.b32.xlu1 %v1481_v2, %s1398_s5  ;;  %440 = vrot.lane.b32.xlu0 %v1486_v3, %s1398_s5  ;;  %v1540_v11 = vld [vmem:[%s1470_s30 + $0x20] ss:$0 sps:$4 sm:$0x11]   ;;  %v1348_v13 = vld [vmem:[%s1470_s30 + $0x24] sm:$0xff]   ;;  %s1842_s6 = smov (!%p308_p8, %s1156_s6), 31 }
  0x1d   : > { %v1350_v15 = vld [vmem:[%s1470_s30 + $0x5c] ss:$0 sps:$4 sm:$0x11]   ;;  %v1351_v16 = vld [vmem:[%s1470_s30 + $0x2c] ss:$0 sps:$4 sm:$0x11]   ;;  %s311_s12 = sadd.s32 %s1157_s11, %s1842_s6 }
  0x1e   : > { %v1352_v17 = vld [vmem:[%s1506_s13 + $0x14] ss:$0 sps:$4 sm:$0x11]   ;;  %v1353_v28 = vld [vmem:[%s1506_s13] sm:$0xff]   ;;  %s1154_s30 = sshll.u32 %s1836_s16, 4 }
  0x1f   : > { %v1354_v31 = vld [vmem:[%s1506_s13 + $0x8] ss:$0 sps:$4 sm:$0x11]   ;;  %s1158_s13 = sshll.u32 %s311_s12, 2 }
  0x20   : > { %480 = vrot.lane.b32.xlu1 %v1481_v2, %s1399_s9  ;;  %464 = vrot.lane.b32.xlu0 %v1473_v0, %s1399_s9  ;;  %s1769_s14 = scalar_lea.vmem %s1824_s4, %s1158_s13 }
  0x24   : > { %442 = vrot.lane.b32.xlu1 %v1494_v4, %s1398_s5  ;;  %426 = vrot.lane.b32.xlu0 %v1499_v5, %s1398_s5 }
  0x28   : > { %484 = vrot.lane.b32.xlu1 %v1511_v6, %s1399_s9  ;;  %468 = vrot.lane.b32.xlu0 %v1516_v7, %s1399_s9 }
  0x2c   : > { %446 = vrot.lane.b32.xlu1 %v1521_v8, %s1398_s5  ;;  %430 = vrot.lane.b32.xlu0 %v1526_v9, %s1398_s5 }
  0x30   : > { %482 = vrot.lane.b32.xlu1 %v1521_v8, %s1399_s9  ;;  %466 = vrot.lane.b32.xlu0 %v1526_v9, %s1399_s9 }
  0x34   : > { %486 = vrot.lane.b32.xlu1 %v1535_v10, %s1399_s9  ;;  %470 = vrot.lane.b32.xlu0 %v1540_v11, %s1399_s9 }
  0x38   : > { %448 = vrot.lane.b32.xlu1 %v1511_v6, %s1398_s5  ;;  %432 = vrot.lane.b32.xlu0 %v1516_v7, %s1398_s5 }
  0x3c   : > { %452 = vrot.lane.b32.xlu1 %v1347_v12, %s1398_s5  ;;  %436 = vrot.lane.b32.xlu0 %v1348_v13, %s1398_s5 }
  0x40   : > { %488 = vrot.lane.b32.xlu1 %v1347_v12, %s1399_s9  ;;  %472 = vrot.lane.b32.xlu0 %v1348_v13, %s1399_s9 }
  0x44   : > { %450 = vrot.lane.b32.xlu1 %v1535_v10, %s1398_s5  ;;  %434 = vrot.lane.b32.xlu0 %v1540_v11, %s1398_s5 }
  0x48   : > { %492 = vrot.lane.b32.xlu1 %v1349_v14, %s1399_s9  ;;  %476 = vrot.lane.b32.xlu0 %v1486_v3, %s1399_s9 }
  0x4c   : > { %454 = vrot.lane.b32.xlu1 %v1350_v15, %s1398_s5  ;;  %438 = vrot.lane.b32.xlu0 %v1351_v16, %s1398_s5  ;;  %s301_s5 = sadd.s32 %s1154_s30, %s1838_s22 }
  0x4d   : > { %s1155_s7 = sshll.u32 %s301_s5, 2 }
  0x4e   : > { %s1761_s10 = scalar_lea.vmem %s1823_s3, %s1155_s7 }
  0x50   : > { %490 = vrot.lane.b32.xlu1 %v1350_v15, %s1399_s9  ;;  %474 = vrot.lane.b32.xlu0 %v1351_v16, %s1399_s9 }
  0x54   : > { %494 = vrot.lane.b32.xlu1 %v1352_v17, %s1399_s9  ;;  %478 = vrot.lane.b32.xlu0 %v1494_v4, %s1399_s9 }
  0x8a   : > { %v429_v18 = vpop.permute.xlu1 %428  ;;  %v425_v19 = vpop.permute.xlu0 %424 }
  0x8b   : > { %v499_v34 = vsel %vm496_vm0, %v1353_v28, %v425_v19  ;;  %v505_v46 = vsel %vm496_vm0, %v1476_v1, %v429_v18  ;;  %v1356_v18 = vld [vmem:[%s1822_s2 + $0x8] sm:$0xff]  }
  0x8c   : > { %1259 = vmatprep.subr.bf16.mxu0 %v1356_v18  ;;  %1280 = vmatprep.subr.bf16.mxu1 %v1356_v18 }
  0x8d   : > { %1260 = vmatpush3.bf16.msra.mxu0 %v1356_v18  ;;  %1283 = vmatpush3.bf16.msra.mxu1 %v1356_v18 }
  0x8e   : > { %v445_v20 = vpop.permute.xlu1 %444  ;;  %v441_v21 = vpop.permute.xlu0 %440 }
  0x8f   : > { %v523_v33 = vsel %vm496_vm0, %v1348_v13, %v441_v21  ;;  %v529_v42 = vsel %vm496_vm0, %v1486_v3, %v445_v20 }
  0x92   : > { %v481_v22 = vpop.permute.xlu1 %480  ;;  %v465_v23 = vpop.permute.xlu0 %464 }
  0x93   : > { %v1582_v35 = vsel %vm545_vm1, %v523_v33, %v481_v22  ;;  %v1585_v36 = vsel %vm545_vm1, %v499_v34, %v465_v23 }
  0x94   : > { %v704_v43 = vrot.slane %v1582_v35, 1  ;;  %v692_v47 = vrot.slane %v1585_v36, 1  ;;  %v621_v20 = vshll.u32 %v1582_v35, 16  ;;  %v581_v21 = vshll.u32 %v1585_v36, 16 }
  0x95   : > { %v579_v33 = vshrl.u32 %v1585_v36, 16 }
  0x96   : > { %v443_v24 = vpop.permute.xlu1 %442  ;;  %v427_v25 = vpop.permute.xlu0 %426  ;;  %v583_v34 = vrot.slane %v581_v21, 1 }
  0x97   : > { %v526_v37 = vsel %vm496_vm0, %v1351_v16, %v443_v24  ;;  %v502_v39 = vsel %vm496_vm0, %v1354_v31, %v427_v25  ;;  %v1357_v24 = vld [vmem:[%s1822_s2 + $0x10] ss:$0 sps:$4 sm:$0x33]   ;;  %v619_v25 = vshrl.u32 %v1582_v35, 16 }
  0x98   : > { %1285 = vmatprep.subr.msk.bf16.mxu0 %vm798_vm4, %v1357_v24  ;;  %1286 = vmatprep.subr.msk.bf16.mxu1 %vm798_vm4, %v1357_v24 }
  0x9a   : > { %v485_v26 = vpop.permute.xlu1 %484  ;;  %v469_v27 = vpop.permute.xlu0 %468 }
  0x9b   : > { %v1603_v48 = vsel %vm545_vm1, %v529_v42, %v485_v26  ;;  %v1607_v50 = vsel %vm545_vm1, %v505_v46, %v469_v27  ;;  %v623_v26 = vrot.slane %v621_v20, 1 }
  0x9c   : > { %v707_v58 = vrot.slane %v1603_v48, 1  ;;  %v695_v61 = vrot.slane %v1607_v50, 1 }
  0x9e   : > { %v447_v29 = vpop.permute.xlu1 %446  ;;  %v431_v32 = vpop.permute.xlu0 %430 }
  0x9f   : > { %v532_v51 = vsel %vm496_vm0, %v1494_v4, %v447_v29  ;;  %v508_v54 = vsel %vm496_vm0, %v1499_v5, %v431_v32  ;;  %v800_v32 = vsel %vm798_vm4, %v1357_v24, 0 }
  0xa0   : > { %1262 = vmatpush3.bf16.msra.mxu0 %v800_v32  ;;  %1284 = vmatpush3.bf16.msra.mxu1 %v800_v32 }
  0xa2   : > { %v483_v38 = vpop.permute.xlu1 %482  ;;  %v467_v41 = vpop.permute.xlu0 %466 }
  0xa3   : > { %v1590_v40 = vsel %vm545_vm1, %v526_v37, %v483_v38  ;;  %v1597_v45 = vsel %vm545_vm1, %v502_v39, %v467_v41  ;;  %v591_v39 = vshll.u32 %v1607_v50, 16 }
  0xa4   : > { %v705_v44 = vrot.slane %v1590_v40, 1  ;;  %v693_v49 = vrot.slane %v1597_v45, 1  ;;  %v625_v27 = vshll.u32 %v1590_v40, 16  ;;  %v585_v29 = vshll.u32 %v1597_v45, 16 }
  0xa6   : > { %v487_v52 = vpop.permute.xlu1 %486  ;;  %v706_v53 = vsel %vm691_vm2, %v704_v43, %v705_v44  ;;  %v471_v56 = vpop.permute.xlu0 %470  ;;  %v694_v57 = vsel %vm691_vm2, %v692_v47, %v693_v49  ;;  %v627_v43 = vrot.slane %v625_v27, 1 }
  0xa7   : > { %v1615_v55 = vsel %vm545_vm1, %v532_v51, %v487_v52  ;;  %724 = vrot.lane.b32.xlu1 %v706_v53, %s1400_s24  ;;  %v1622_v60 = vsel %vm545_vm1, %v508_v54, %v471_v56  ;;  %716 = vrot.lane.b32.xlu0 %v694_v57, %s1400_s24  ;;  %v624_v51 = vor.u32 %v623_v26, %v619_v25  ;;  %v629_v52 = vshrl.u32 %v1603_v48, 16 }
  0xa8   : > { %v708_v59 = vrot.slane %v1615_v55, 1  ;;  %v696_v62 = vrot.slane %v1622_v60, 1  ;;  %v635_v53 = vshll.u32 %v1615_v55, 16  ;;  %v584_v54 = vor.u32 %v583_v34, %v579_v33 }
  0xa9   : > { %v589_v57 = vshrl.u32 %v1607_v50, 16  ;;  %v628_v55 = vsel %vm578_vm3, %v624_v51, %v627_v43 }
  0xaa   : > { %v449_v63 = vpop.permute.xlu1 %448  ;;  %v709_v1 = vsel %vm691_vm2, %v707_v58, %v708_v59  ;;  %v433_v3 = vpop.permute.xlu0 %432  ;;  %v697_v4 = vsel %vm691_vm2, %v695_v61, %v696_v62  ;;  %v595_v58 = vshll.u32 %v1622_v60, 16  ;;  %v593_v61 = vrot.slane %v591_v39, 1 }
  0xab   : > { %726 = vrot.lane.b32.xlu1 %v709_v1, %s1400_s24  ;;  %718 = vrot.lane.b32.xlu0 %v697_v4, %s1400_s24  ;;  %v535_v28 = vsel %vm496_vm0, %v1481_v2, %v449_v63  ;;  %v511_v30 = vsel %vm496_vm0, %v1473_v0, %v433_v3  ;;  %v631_v0 = vshll.u32 %v1603_v48, 16 }
  0xac   : > { %v597_v18 = vrot.slane %v595_v58, 1  ;;  %v594_v25 = vor.u32 %v593_v61, %v589_v57 }
  0xad   : > { %v633_v56 = vrot.slane %v631_v0, 1 }
  0xae   : > { %v453_v5 = vpop.permute.xlu1 %452  ;;  %v1631_v12 = vpop.permute.xlu0 %436  ;;  %v598_v32 = vsel %vm578_vm3, %v594_v25, %v597_v18 }
  0xaf   : > { %v541_v62 = vsel %vm496_vm0, %v1511_v6, %v453_v5  ;;  %v517_v3 = vsel %vm496_vm0, %v1516_v7, %v1631_v12  ;;  %v637_v6 = vrot.slane %v635_v53, 1  ;;  %v634_v24 = vor.u32 %v633_v56, %v629_v52 }
  0xb1   : > { %v638_v27 = vsel %vm578_vm3, %v634_v24, %v637_v6 }
  0xb2   : > { %v489_v13 = vpop.permute.xlu1 %488  ;;  %v473_v14 = vpop.permute.xlu0 %472 }
  0xb3   : > { %v1651_v31 = vsel %vm545_vm1, %v535_v28, %v489_v13  ;;  %v1655_v37 = vsel %vm545_vm1, %v511_v30, %v473_v14 }
  0xb4   : > { %v710_v44 = vrot.slane %v1651_v31, 1  ;;  %v698_v47 = vrot.slane %v1655_v37, 1  ;;  %v641_v63 = vshll.u32 %v1651_v31, 16  ;;  %v601_v60 = vshll.u32 %v1655_v37, 16 }
  0xb5   : > { %v599_v28 = vshrl.u32 %v1655_v37, 16 }
  0xb6   : > { %v451_v15 = vpop.permute.xlu1 %450  ;;  %v435_v16 = vpop.permute.xlu0 %434  ;;  %v643_v20 = vrot.slane %v641_v63, 1 }
  0xb7   : > { %v538_v2 = vsel %vm496_vm0, %v1521_v8, %v451_v15  ;;  %v514_v40 = vsel %vm496_vm0, %v1526_v9, %v435_v16  ;;  %v587_v8 = vrot.slane %v585_v29, 1 }
  0xb9   : > { %v588_v14 = vsel %vm578_vm3, %v584_v54, %v587_v8 }
  0xba   : > { %v493_v17 = vpop.permute.xlu1 %492  ;;  %v1636_v19 = vpop.permute.xlu0 %476 }
  0xbb   : > { %v1684_v4 = vsel %vm545_vm1, %v541_v62, %v493_v17  ;;  %v1689_v5 = vsel %vm545_vm1, %v517_v3, %v1636_v19 }
  0xbc   : > { %v651_v21 = vshll.u32 %v1684_v4, 16  ;;  %v649_v0 = vshrl.u32 %v1684_v4, 16  ;;  %v713_v51 = vrot.slane %v1684_v4, 1  ;;  %v701_v52 = vrot.slane %v1689_v5, 1 }
  0xbe   : > { %v455_v22 = vpop.permute.xlu1 %454  ;;  %v439_v23 = vpop.permute.xlu0 %438  ;;  %v653_v33 = vrot.slane %v651_v21, 1 }
  0xbf   : > { %v544_v15 = vsel %vm496_vm0, %v1535_v10, %v455_v22  ;;  %v520_v7 = vsel %vm496_vm0, %v1540_v11, %v439_v23  ;;  %v603_v10 = vrot.slane %v601_v60, 1  ;;  %v611_v22 = vshll.u32 %v1689_v5, 16 }
  0xc0   : > { %v639_v11 = vshrl.u32 %v1651_v31, 16 }
  0xc2   : > { %v491_v38 = vpop.permute.xlu1 %490  ;;  %v475_v42 = vpop.permute.xlu0 %474  ;;  %v644_v34 = vor.u32 %v643_v20, %v639_v11 }
  0xc3   : > { %v573_v41 = vsel %vm545_vm1, %v538_v2, %v491_v38  ;;  %v557_v46 = vsel %vm545_vm1, %v514_v40, %v475_v42  ;;  %v613_v2 = vrot.slane %v611_v22, 1  ;;  %v604_v38 = vor.u32 %v603_v10, %v599_v28 }
  0xc4   : > { %v711_v45 = vrot.slane %v573_v41, 1  ;;  %v699_v49 = vrot.slane %v557_v46, 1  ;;  %v645_v16 = vshll.u32 %v573_v41, 16  ;;  %v605_v12 = vshll.u32 %v557_v46, 16 }
  0xc5   : > { %v609_v41 = vshrl.u32 %v1689_v5, 16 }
  0xc6   : > { %v712_v9 = vsel %vm691_vm2, %v710_v44, %v711_v45  ;;  %v700_v59 = vsel %vm691_vm2, %v698_v47, %v699_v49  ;;  %v495_v1 = vpop.permute.xlu1 %494  ;;  %v479_v13 = vpop.permute.xlu0 %478  ;;  %v647_v23 = vrot.slane %v645_v16, 1  ;;  %v607_v29 = vrot.slane %v605_v12, 1 }
  0xc7   : > { %728 = vrot.lane.b32.xlu1 %v712_v9, %s1400_s24  ;;  %720 = vrot.lane.b32.xlu0 %v700_v59, %s1400_s24  ;;  %v577_v17 = vsel %vm545_vm1, %v544_v15, %v495_v1  ;;  %v561_v19 = vsel %vm545_vm1, %v520_v7, %v479_v13  ;;  %v654_v44 = vor.u32 %v653_v33, %v649_v0 }
  0xc8   : > { %v655_v26 = vshll.u32 %v577_v17, 16  ;;  %v615_v30 = vshll.u32 %v561_v19, 16  ;;  %v648_v40 = vsel %vm578_vm3, %v644_v34, %v647_v23  ;;  %v608_v43 = vsel %vm578_vm3, %v604_v38, %v607_v29 }
  0xc9   : > { %v614_v45 = vor.u32 %v613_v2, %v609_v41  ;;  %v714_v46 = vrot.slane %v577_v17, 1  ;;  %v702_v47 = vrot.slane %v561_v19, 1 }
  0xca   : > { %v657_v39 = vrot.slane %v655_v26, 1  ;;  %v617_v42 = vrot.slane %v615_v30, 1 }
  0xcb   : > { %667 = vrot.lane.b32.xlu1 %v628_v55, %s1401_s29  ;;  %659 = vrot.lane.b32.xlu0 %v588_v14, %s1401_s29  ;;  %v715_v53 = vsel %vm691_vm2, %v713_v51, %v714_v46  ;;  %v703_v9 = vsel %vm691_vm2, %v701_v52, %v702_v47 }
  0xcc   : > { %v658_v8 = vsel %vm578_vm3, %v654_v44, %v657_v39  ;;  %v618_v49 = vsel %vm578_vm3, %v614_v45, %v617_v42 }
  0xcf   : > { %669 = vrot.lane.b32.xlu1 %v638_v27, %s1401_s29  ;;  %661 = vrot.lane.b32.xlu0 %v598_v32, %s1401_s29 }
  0xd3   : > { %671 = vrot.lane.b32.xlu1 %v648_v40, %s1401_s29  ;;  %663 = vrot.lane.b32.xlu0 %v608_v43, %s1401_s29 }
  0xd7   : > { %673 = vrot.lane.b32.xlu1 %v658_v8, %s1401_s29  ;;  %665 = vrot.lane.b32.xlu0 %v618_v49, %s1401_s29  ;;  %v1245_v49 = vld [vmem:[%s1761_s10 + $0x18] sm:$0xff]  }
  0xdb   : > { %730 = vrot.lane.b32.xlu1 %v715_v53, %s1400_s24  ;;  %722 = vrot.lane.b32.xlu0 %v703_v9, %s1400_s24  ;;  %v1243_v53 = vld [vmem:[%s1761_s10 + $0x8] sm:$0xff]  }
 0x119   : > { %v725_v54 = vpop.permute.xlu1 %724  ;;  %v717_v56 = vpop.permute.xlu0 %716 }
 0x11d   : > { %v727_v57 = vpop.permute.xlu1 %726  ;;  %v719_v58 = vpop.permute.xlu0 %718 }
 0x139   : > { %v729_v59 = vpop.permute.xlu1 %728  ;;  %v721_v61 = vpop.permute.xlu0 %720 }
 0x13d   : > { %v668_v62 = vpop.permute.xlu1 %667  ;;  %v660_v1 = vpop.permute.xlu0 %659 }
 0x13e   : > { %v742_v63 = vsel %vm732_vm5, %v1582_v35, %v668_v62  ;;  %v734_v55 = vsel %vm732_vm5, %v1585_v36, %v660_v1 }
 0x13f   : > { %v759_v3 = vsel %vm749_vm6, %v742_v63, %v725_v54  ;;  %v751_v60 = vsel %vm749_vm6, %v734_v55, %v717_v56  ;;  %v1241_v54 = vunpack.c.l.bf16 %v1245_v49  ;;  %v1233_v56 = vunpack.c.l.bf16 %v1243_v53 }
 0x140   : > { %1271 = vmatprep.mubr.msk.bf16.mxu1 %vm781_vm7, %v759_v3  ;;  %1263 = vmatprep.mubr.msk.bf16.mxu0 %vm781_vm7, %v751_v60 }
 0x141   : > { %v670_v13 = vpop.permute.xlu1 %669  ;;  %v662_v6 = vpop.permute.xlu0 %661 }
 0x142   : > { %v744_v14 = vsel %vm732_vm5, %v1603_v48, %v670_v13  ;;  %v736_v35 = vsel %vm732_vm5, %v1607_v50, %v662_v6 }
 0x143   : > { %v761_v15 = vsel %vm749_vm6, %v744_v14, %v727_v57  ;;  %v753_v36 = vsel %vm749_vm6, %v736_v35, %v719_v58  ;;  %v1242_v57 = vunpack.c.h.bf16 %v1245_v49 }
 0x144   : > { %1272 = vmatmul.mubr.msk.bf16.vlgmr.msra.gmra.mrb[0].mxu1 %vm781_vm7, %v761_v15  ;;  %1264 = vmatmul.mubr.msk.bf16.vlgmr.msra.gmra.mrb[0].mxu0 %vm781_vm7, %v753_v36 }
 0x145   : > { %v672_v16 = vpop.permute.xlu1 %671  ;;  %v664_v7 = vpop.permute.xlu0 %663 }
 0x146   : > { %v746_v18 = vsel %vm732_vm5, %v1651_v31, %v672_v16  ;;  %v738_v48 = vsel %vm732_vm5, %v1655_v37, %v664_v7 }
 0x147   : > { %v763_v50 = vsel %vm749_vm6, %v746_v18, %v729_v59  ;;  %v755_v12 = vsel %vm749_vm6, %v738_v48, %v721_v61  ;;  %v1234_v59 = vunpack.c.h.bf16 %v1243_v53 }
 0x148   : > { %1275 = vmatprep.mubr.msk.bf16.mxu1 %vm781_vm7, %v763_v50  ;;  %1267 = vmatprep.mubr.msk.bf16.mxu0 %vm781_vm7, %v755_v12 }
 0x149   : > { %v674_v17 = vpop.permute.xlu1 %673  ;;  %v666_v20 = vpop.permute.xlu0 %665 }
 0x14a   : > { %v748_v31 = vsel %vm732_vm5, %v1684_v4, %v674_v17  ;;  %v740_v37 = vsel %vm732_vm5, %v1689_v5, %v666_v20  ;;  %v1244_v4 = vld [vmem:[%s1761_s10 + $0x10] sm:$0xff]   ;;  %v1228_v5 = vld [vmem:[%s1761_s10] sm:$0xff]  }
 0x14b   : > { %v1237_v22 = vunpack.c.l.bf16 %v1244_v4  ;;  %v1229_v25 = vunpack.c.l.bf16 %v1228_v5  ;;  %v1238_v11 = vunpack.c.h.bf16 %v1244_v4  ;;  %v1230_v26 = vunpack.c.h.bf16 %v1228_v5 }
 0x14d   : > { %v731_v21 = vpop.permute.xlu1 %730  ;;  %v723_v24 = vpop.permute.xlu0 %722 }
 0x14e   : > { %v765_v19 = vsel %vm749_vm6, %v748_v31, %v731_v21  ;;  %v757_v10 = vsel %vm749_vm6, %v740_v37, %v723_v24 }
 0x14f   : > { %1276 = vmatmul.mubr.msk.bf16.gmra.mrb[4].mxu1 %vm781_vm7, %v765_v19  ;;  %1268 = vmatmul.mubr.msk.bf16.gmra.mrb[4].mxu0 %vm781_vm7, %v757_v10 }
 0x217   : > { %v1273_v23 = vpop.f32.mrb[0].mxu1  ;;  %v1265_v27 = vpop.f32.mrb[0].mxu0 }
 0x218   : > { %v925_v28 = vadd.f32 %v1273_v23, %v1237_v22  ;;  %v868_v29 = vpop.f32.mrb[1].mxu1  ;;  %v917_v30 = vadd.f32 %v1265_v27, %v1229_v25  ;;  %v836_v32 = vpop.f32.mrb[1].mxu0 }
 0x219   : > { %v923_v33 = vadd.f32 %v1237_v22, %v868_v29  ;;  %v1274_v34 = vpop.f32.mrb[2].mxu1  ;;  %v915_v38 = vadd.f32 %v1229_v25, %v836_v32  ;;  %v1266_v0 = vpop.f32.mrb[2].mxu0 }
 0x21a   : > { %v1221_v2 = vpack.c.bf16 %v925_v28, %v925_v28  ;;  %v926_v39 = vadd.f32 %v1274_v34, %v1238_v11  ;;  %v871_v40 = vpop.f32.mrb[3].mxu1  ;;  %v1213_v41 = vpack.c.bf16 %v917_v30, %v917_v30  ;;  %v918_v43 = vadd.f32 %v1266_v0, %v1230_v26  ;;  %v839_v44 = vpop.f32.mrb[3].mxu0 }
 0x21b   : > { %v1219_v42 = vpack.c.bf16 %v923_v33, %v923_v33  ;;  %v924_v45 = vadd.f32 %v1238_v11, %v871_v40  ;;  %v1211_v46 = vpack.c.bf16 %v915_v38, %v915_v38  ;;  %v916_v47 = vadd.f32 %v1230_v26, %v839_v44 }
 0x21c   : > { %1006 = vst.msk [vmem:[%s1769_s14 + $0x28] sm:$0xf] %vm995_vm8, %v1221_v2  ;;  %v1222_v8 = vpack.c.bf16 %v926_v39, %v926_v39  ;;  %998 = vst.msk [vmem:[%s1769_s14 + $0x8] sm:$0xf] %vm995_vm8, %v1213_v41  ;;  %v1214_v51 = vpack.c.bf16 %v918_v43, %v918_v43 }
 0x21d   : > { %1004 = vst.msk [vmem:[%s1769_s14 + $0x20] sm:$0xf] %vm995_vm8, %v1219_v42  ;;  %v1220_v52 = vpack.c.bf16 %v924_v45, %v924_v45  ;;  %996 = vst.msk [vmem:[%s1769_s14] sm:$0xf] %vm995_vm8, %v1211_v46  ;;  %v1212_v9 = vpack.c.bf16 %v916_v47, %v916_v47 }
 0x21e   : > { %1007 = vst.msk [vmem:[%s1769_s14 + $0x2c] sm:$0xf] %vm995_vm8, %v1222_v8  ;;  %999 = vst.msk [vmem:[%s1769_s14 + $0xc] sm:$0xf] %vm995_vm8, %v1214_v51 }
 0x21f   : > { %1005 = vst.msk [vmem:[%s1769_s14 + $0x24] sm:$0xf] %vm995_vm8, %v1220_v52  ;;  %997 = vst.msk [vmem:[%s1769_s14 + $0x4] sm:$0xf] %vm995_vm8, %v1212_v9 }
 0x222   : > { %v1277_v58 = vpop.f32.mrb[4].mxu1  ;;  %v1269_v61 = vpop.f32.mrb[4].mxu0 }
 0x223   : > { %v929_v62 = vadd.f32 %v1277_v58, %v1241_v54  ;;  %v884_v63 = vpop.f32.mrb[5].mxu1  ;;  %v921_v1 = vadd.f32 %v1269_v61, %v1233_v56  ;;  %v852_v55 = vpop.f32.mrb[5].mxu0 }
 0x224   : > { %v927_v3 = vadd.f32 %v1241_v54, %v884_v63  ;;  %v1278_v60 = vpop.f32.mrb[6].mxu1  ;;  %v919_v14 = vadd.f32 %v1233_v56, %v852_v55  ;;  %v1270_v6 = vpop.f32.mrb[6].mxu0 }
 0x225   : > { %v1225_v13 = vpack.c.bf16 %v929_v62, %v929_v62  ;;  %v930_v35 = vadd.f32 %v1278_v60, %v1242_v57  ;;  %v887_v15 = vpop.f32.mrb[7].mxu1  ;;  %v1217_v36 = vpack.c.bf16 %v921_v1, %v921_v1  ;;  %v922_v18 = vadd.f32 %v1270_v6, %v1234_v59  ;;  %v855_v7 = vpop.f32.mrb[7].mxu0 }
 0x226   : > { %v1223_v16 = vpack.c.bf16 %v927_v3, %v927_v3  ;;  %v928_v48 = vadd.f32 %v1242_v57, %v887_v15  ;;  %v1215_v50 = vpack.c.bf16 %v919_v14, %v919_v14  ;;  %v920_v17 = vadd.f32 %v1234_v59, %v855_v7 }
 0x227   : > { %1010 = vst.msk [vmem:[%s1769_s14 + $0x38] sm:$0xf] %vm995_vm8, %v1225_v13  ;;  %v1226_v12 = vpack.c.bf16 %v930_v35, %v930_v35  ;;  %1002 = vst.msk [vmem:[%s1769_s14 + $0x18] sm:$0xf] %vm995_vm8, %v1217_v36  ;;  %v1218_v20 = vpack.c.bf16 %v922_v18, %v922_v18 }
 0x228   : > { %1008 = vst.msk [vmem:[%s1769_s14 + $0x30] sm:$0xf] %vm995_vm8, %v1223_v16  ;;  %v1224_v31 = vpack.c.bf16 %v928_v48, %v928_v48  ;;  %1000 = vst.msk [vmem:[%s1769_s14 + $0x10] sm:$0xf] %vm995_vm8, %v1215_v50  ;;  %v1216_v21 = vpack.c.bf16 %v920_v17, %v920_v17 }
 0x229   : > { %1011 = vst.msk [vmem:[%s1769_s14 + $0x3c] sm:$0xf] %vm995_vm8, %v1226_v12  ;;  %1003 = vst.msk [vmem:[%s1769_s14 + $0x1c] sm:$0xf] %vm995_vm8, %v1218_v20 }
 0x22a   : > { %1009 = vst.msk [vmem:[%s1769_s14 + $0x34] sm:$0xf] %vm995_vm8, %v1224_v31  ;;  %1001 = vst.msk [vmem:[%s1769_s14 + $0x14] sm:$0xf] %vm995_vm8, %v1216_v21 }
 0x22b PF: > { %s14_s19 = sadd.s32 1, %s1396_s19   ;;  %s1825_s15 = smov %s1388_s17 }
 0x22c   : > { %p11_p9 = scmp.ge.s32.totalorder %s14_s19, 6   ;;  %s1826_s16 = smov %s1392_s18 }
 0x22d   : > { %s1827_s17 = smov %s1830_s20  ;;  %s1828_s18 = smov %s1834_s21 }
 0x22e   :  { %13 = sbr.rel (!%p11_p9) target bundleno = 3 (0x3), region = 73 }

// kernel: residual_oct_block.12
= control target key start
LH: loop header
LB: loop body
LE: loop exit
PB: predicated region body
PF: predicated region fallthrough
CT: control target
= control target key end

     0   :  { %s799_s12 = smov 0   ;;  %s801_s13 = smov 0   ;;  %s892_s0 = inlined_call_operand.vmem [shape: bf16[2,8,10,4], index: 0, kind: input, shape index: {}]   ;;  %s893_s1 = inlined_call_operand.vmem [shape: bf16[2,4,10,4], index: 1, kind: input, shape index: {}]   ;;  %s894_s2 = inlined_call_operand.vmem [shape: bf16[36,4], index: 2, kind: input, shape index: {}]   ;;  %s895_s3 = inlined_call_operand.vmem [shape: bf16[2,64,4], index: 3, kind: output, shape index: {}]  }
   0x1   :  { %s803_s14 = smov 0   ;;  %s805_s15 = smov 0  }
   0x2   :  { %s807_s16 = smov 0  }
   0x3 LB: > { %s22_s17 = sadd.s32 1, %s765_s14  ;;  %s25_s18 = sadd.s32 1, %s769_s15  ;;  %s773_s16 = sphi %s807_s16, %s13_s16   ;;  %s769_s15 = sphi %s805_s15, %s899_s15   ;;  %s765_s14 = sphi %s803_s14, %s898_s14   ;;  %s761_s13 = sphi %s801_s13, %s897_s13   ;;  %s757_s12 = sphi %s799_s12, %s896_s12  }
   0x4   : > { %p23_p0 = scmp.ge.s32.totalorder %s22_s17, 2  ;;  %p629_p1 = scmp.ge.s32.totalorder %s773_s16, 1 }
   0x5   : > { %p177_p2 = scmp.lt.s32.totalorder %s773_s16, 5 }
   0x6   : > { %s901_s17 = smov (%p23_p0, %s22_s17), 0  ;;  %s903_s18 = smov (!%p23_p0, %s25_s18), %s769_s15 }
   0x7   : > { %p178_p3 = pnand %p629_p1, %p177_p2  ;;  %p27_p4 = scmp.ge.s32.totalorder %s903_s18, 2 }
   0x8   : > { %s630_s19 = sshll.u32 (!%p178_p3), %s757_s12, 2  ;;  %p221_p5 = scmp.lt.s32.totalorder (!%p178_p3), %s761_s13, 1  ;;  %v732_v5 = vld [vmem:[%s894_s2] sm:$0xff] (!%p178_p3)   ;;  %v733_v9 = vld [vmem:[%s894_s2 + $0x8] sm:$0xff] (!%p178_p3)   ;;  %vm317_vm0 = vcmask (!%p178_p3), 31744   ;;  %vm330_vm1 = vcmask (!%p178_p3), 64512  }
   0x9   : > { %s905_s18 = smov (%p27_p4, %s903_s18), 0  ;;  %181 = sbr.rel (%p178_p3) target bundleno = 496 (0x1f0), region = 32 }
   0xa   : > { %p223_p6 = scmp.lt.s32.totalorder (!%p178_p3), %s630_s19, 7  ;;  %s634_s22 = sshll.u32 (!%p178_p3), %s757_s12, 1  ;;  %671 = vmatprep.subr.bf16.mxu0 (!%p178_p3), %v732_v5  ;;  %v734_v14 = vld [vmem:[%s894_s2 + $0x10] ss:$0 sps:$4 sm:$0x33] (!%p178_p3)   ;;  %vm437_vm2 = vcmask (!%p178_p3), 1041408  }
   0xb   : > { %p234_p7 = scmp.lt.s32.totalorder (!%p178_p3), %s634_s22, 3  ;;  %s775_s29 = smov (!%p178_p3), 4   ;;  %672 = vmatpush3.bf16.msra.mxu0 (!%p178_p3), %v732_v5  ;;  %v439_v27 = vsel (!%p178_p3), %vm437_vm2, %v734_v14, 0  ;;  %vm387_vm3 = vcmask (!%p178_p3), 97280   ;;  %vm396_vm4 = vcmask (!%p178_p3), 195584   ;;  %vm430_vm5 = vcmask (!%p178_p3), 293888  }
   0xc   : > { %s776_s9 = smov (!%p178_p3), 8   ;;  %673 = vmatprep.subr.bf16.mxu0 (!%p178_p3), %v733_v9  ;;  %vm506_vm6 = vcmask (!%p178_p3), 27648  }
   0xf   : > { %674 = vmatpush3.bf16.msra.mxu0 (!%p178_p3), %v733_v9 }
  0x10   : > { %s907_s13 = smov (!%p221_p5, %s761_s13), 1  ;;  %s909_s19 = smov (!%p223_p6, %s630_s19), 7  ;;  %681 = vmatprep.subr.msk.bf16.mxu0 %vm437_vm2, %v734_v14 }
  0x11   : > { %s632_s20 = sshll.u32 %s907_s13, 4  ;;  %s631_s21 = sshll.u32 %s909_s19, 1 }
  0x12   : > { %s227_s23 = sadd.s32 %s632_s20, %s631_s21  ;;  %s636_s28 = sshll.u32 %s907_s13, 3 }
  0x13   : > { %s633_s24 = sshll.u32 %s227_s23, 2  ;;  %s911_s22 = smov (!%p234_p7, %s634_s22), 3  ;;  %676 = vmatpush3.bf16.msra.mxu0 %v439_v27 }
  0x14   : > { %s229_s27 = scalar_lea.vmem %s892_s0, %s633_s24  ;;  %s635_s30 = sshll.u32 %s911_s22, 1 }
  0x15   : > { %v726_v0 = vld [vmem:[%s229_s27 + $0x10] sm:$0x1f]   ;;  %v727_v1 = vld [vmem:[%s229_s27] sm:$0x1f]   ;;  %v728_v2 = vld [vmem:[%s229_s27 + $0x18] sm:$0x1f]   ;;  %s238_s4 = sadd.s32 %s636_s28, %s635_s30  ;;  %s248_s25 = sadd.s32 %s636_s28, %s909_s19 }
  0x16   : > { %300 = vrot.lane.b32.xlu1 %v726_v0, %s775_s29  ;;  %296 = vrot.lane.b32.xlu0 %v727_v1, %s775_s29  ;;  %v729_v3 = vld [vmem:[%s229_s27 + $0x8] sm:$0x1f]   ;;  %s637_s5 = sshll.u32 %s238_s4, 2  ;;  %s777_s23 = smov 24  }
  0x17   : > { %s240_s8 = scalar_lea.vmem %s893_s1, %s637_s5  ;;  %s778_s24 = smov 12  }
  0x18   : > { %v730_v4 = vld [vmem:[%s240_s8 + $0x8] sm:$0x1f]   ;;  %v731_v10 = vld [vmem:[%s240_s8] sm:$0x1f]   ;;  %s640_s26 = sshll.u32 %s248_s25, 2 }
  0x19   : > { %s250_s30 = scalar_lea.vmem %s895_s3, %s640_s26 }
  0x1a   : > { %302 = vrot.lane.b32.xlu1 %v728_v2, %s775_s29  ;;  %298 = vrot.lane.b32.xlu0 %v729_v3, %s775_s29 }
  0x1e   : > { %311 = vrot.lane.b32.xlu1 %v726_v0, %s776_s9  ;;  %309 = vrot.lane.b32.xlu0 %v729_v3, %s776_s9 }
  0x22   : > { %315 = vrot.lane.b32.xlu1 %v730_v4, %s776_s9  ;;  %313 = vrot.lane.b32.xlu0 %v728_v2, %s776_s9 }
  0x88   : > { %v301_v6 = vpop.permute.xlu1 %300  ;;  %v297_v7 = vpop.permute.xlu0 %296 }
  0x89   : > { %v320_v15 = vsel %vm317_vm0, %v731_v10, %v297_v7  ;;  %v326_v28 = vsel %vm317_vm0, %v729_v3, %v301_v6 }
  0x8c   : > { %v303_v8 = vpop.permute.xlu1 %302  ;;  %v299_v11 = vpop.permute.xlu0 %298 }
  0x8d   : > { %v323_v12 = vsel %vm317_vm0, %v727_v1, %v299_v11  ;;  %v329_v23 = vsel %vm317_vm0, %v726_v0, %v303_v8 }
  0x90   : > { %v312_v13 = vpop.permute.xlu1 %311  ;;  %v310_v17 = vpop.permute.xlu0 %309 }
  0x91   : > { %v334_v16 = vsel %vm330_vm1, %v323_v12, %v312_v13  ;;  %v332_v19 = vsel %vm330_vm1, %v320_v15, %v310_v17 }
  0x92   : > { %v347_v18 = vshll.u32 %v334_v16, 16  ;;  %v376_v20 = vrot.slane %v334_v16, 1  ;;  %v341_v21 = vshll.u32 %v332_v19, 16  ;;  %v375_v22 = vrot.slane %v332_v19, 1 }
  0x93   : > { %v345_v24 = vshrl.u32 %v334_v16, 16  ;;  %v339_v29 = vshrl.u32 %v332_v19, 16 }
  0x94   : > { %v316_v25 = vpop.permute.xlu1 %315  ;;  %381 = vrot.lane.b32.xlu1 %v376_v20, %s777_s23  ;;  %v349_v26 = vrot.slane %v347_v18, 1  ;;  %379 = vrot.lane.b32.xlu0 %v375_v22, %s777_s23  ;;  %v314_v31 = vpop.permute.xlu0 %313  ;;  %v343_v32 = vrot.slane %v341_v21, 1 }
  0x95   : > { %v338_v30 = vsel %vm330_vm1, %v329_v23, %v316_v25  ;;  %v336_v34 = vsel %vm330_vm1, %v326_v28, %v314_v31 }
  0x96   : > { %v359_v33 = vshll.u32 %v338_v30, 16  ;;  %v350_v35 = vor.u32 %v349_v26, %v345_v24  ;;  %v353_v36 = vshll.u32 %v336_v34, 16  ;;  %v344_v37 = vor.u32 %v343_v32, %v339_v29 }
  0x97   : > { %v357_v38 = vshrl.u32 %v338_v30, 16  ;;  %v351_v40 = vshrl.u32 %v336_v34, 16  ;;  %v378_v44 = vrot.slane %v338_v30, 1  ;;  %v377_v45 = vrot.slane %v336_v34, 1 }
  0x98   : > { %365 = vrot.lane.b32.xlu1 %v350_v35, %s778_s24  ;;  %v361_v39 = vrot.slane %v359_v33, 1  ;;  %363 = vrot.lane.b32.xlu0 %v344_v37, %s778_s24  ;;  %v355_v41 = vrot.slane %v353_v36, 1 }
  0x9a   : > { %v362_v42 = vor.u32 %v361_v39, %v357_v38  ;;  %v356_v43 = vor.u32 %v355_v41, %v351_v40 }
  0x9c   : > { %369 = vrot.lane.b32.xlu1 %v362_v42, %s778_s24  ;;  %367 = vrot.lane.b32.xlu0 %v356_v43, %s778_s24 }
  0xa0   : > { %385 = vrot.lane.b32.xlu1 %v378_v44, %s777_s23  ;;  %383 = vrot.lane.b32.xlu0 %v377_v45, %s777_s23 }
 0x106   : > { %v382_v46 = vpop.permute.xlu1 %381  ;;  %v380_v47 = vpop.permute.xlu0 %379 }
 0x10a   : > { %v366_v48 = vpop.permute.xlu1 %365  ;;  %v364_v50 = vpop.permute.xlu0 %363 }
 0x10b   : > { %v391_v49 = vsel %vm387_vm3, %v334_v16, %v366_v48  ;;  %v389_v51 = vsel %vm387_vm3, %v332_v19, %v364_v50 }
 0x10c   : > { %v400_v52 = vsel %vm396_vm4, %v391_v49, %v382_v46  ;;  %v398_v53 = vsel %vm396_vm4, %v389_v51, %v380_v47 }
 0x10d   : > { %v649_v55 = vcombine.low %v398_v53, %v400_v52 }
 0x10e   : > { %v370_v54 = vpop.permute.xlu1 %369  ;;  %v368_v56 = vpop.permute.xlu0 %367 }
 0x10f   : > { %677 = vmatprep.mubr.msk.bf16.mxu0 %vm430_vm5, %v649_v55  ;;  %v395_v57 = vsel %vm387_vm3, %v338_v30, %v370_v54  ;;  %v393_v59 = vsel %vm387_vm3, %v336_v34, %v368_v56 }
 0x112   : > { %v386_v58 = vpop.permute.xlu1 %385  ;;  %v384_v61 = vpop.permute.xlu0 %383 }
 0x113   : > { %v404_v60 = vsel %vm396_vm4, %v395_v57, %v386_v58  ;;  %v402_v62 = vsel %vm396_vm4, %v393_v59, %v384_v61 }
 0x114   : > { %v650_v63 = vcombine.low %v402_v62, %v404_v60 }
 0x116   : > { %678 = vmatmul.mubr.msk.bf16.vlgmr.msra.gmra.mrb[0].mxu0 %vm430_vm5, %v650_v63 }
 0x1e9   : > { %v679_v0 = vpop.f32.mrb[0].mxu0 }
 0x1ea   : > { %v664_v1 = vpack.c.bf16 %v679_v0, %v679_v0  ;;  %v475_v2 = vpop.f32.mrb[1].mxu0 }
 0x1eb   : > { %v662_v3 = vpack.c.bf16 %v475_v2, %v475_v2  ;;  %v680_v4 = vpop.f32.mrb[2].mxu0 }
 0x1ec   : > { %509 = vst.msk [vmem:[%s250_s30 + $0x8] sm:$0xf] %vm506_vm6, %v664_v1  ;;  %v665_v5 = vpack.c.bf16 %v680_v4, %v680_v4  ;;  %v478_v6 = vpop.f32.mrb[3].mxu0 }
 0x1ed   : > { %507 = vst.msk [vmem:[%s250_s30] sm:$0xf] %vm506_vm6, %v662_v3  ;;  %v663_v7 = vpack.c.bf16 %v478_v6, %v478_v6 }
 0x1ee   : > { %510 = vst.msk [vmem:[%s250_s30 + $0xc] sm:$0xf] %vm506_vm6, %v665_v5 }
 0x1ef   : > { %508 = vst.msk [vmem:[%s250_s30 + $0x4] sm:$0xf] %vm506_vm6, %v663_v7 }
 0x1f0 PF: > { %s13_s16 = sadd.s32 1, %s773_s16   ;;  %s896_s12 = smov %s765_s14 }
 0x1f1   : > { %p10_p8 = scmp.ge.s32.totalorder %s13_s16, 6   ;;  %s897_s13 = smov %s769_s15 }
 0x1f2   : > { %s898_s14 = smov %s901_s17  ;;  %s899_s15 = smov %s905_s18 }
 0x1f3   :  { %12 = sbr.rel (!%p10_p8) target bundleno = 3 (0x3), region = 66 }

// kernel: residual_oct_block.13
= control target key start
LH: loop header
LB: loop body
LE: loop exit
PB: predicated region body
PF: predicated region fallthrough
CT: control target
= control target key end

     0   :  { %s1418_s15 = smov 0   ;;  %s1420_s16 = smov 0   ;;  %s1814_s0 = inlined_call_operand.vmem [shape: bf16[2,16,18,3], index: 0, kind: input, shape index: {}]   ;;  %s1815_s1 = inlined_call_operand.vmem [shape: bf16[2,4,18,3], index: 1, kind: input, shape index: {}]   ;;  %s1816_s2 = inlined_call_operand.vmem [shape: bf16[27,3], index: 2, kind: input, shape index: {}]   ;;  %s1817_s3 = inlined_call_operand.vmem [shape: bf16[2,128,3], index: 3, kind: input, shape index: {}]   ;;  %s1818_s4 = inlined_call_operand.vmem [shape: bf16[2,256,3], index: 4, kind: output, shape index: {}]  }
   0x1   :  { %s1422_s17 = smov 0   ;;  %s1424_s18 = smov 0  }
   0x2   :  { %s1426_s19 = smov 0  }
   0x3 LB: > { %s23_s20 = sadd.s32 1, %s1378_s17  ;;  %s26_s21 = sadd.s32 1, %s1382_s18  ;;  %s1386_s19 = sphi %s1426_s19, %s14_s19   ;;  %s1382_s18 = sphi %s1424_s18, %s1822_s18   ;;  %s1378_s17 = sphi %s1422_s17, %s1821_s17   ;;  %s1374_s16 = sphi %s1420_s16, %s1820_s16   ;;  %s1370_s15 = sphi %s1418_s15, %s1819_s15  }
   0x4   : > { %p24_p0 = scmp.ge.s32.totalorder %s23_s20, 2  ;;  %p1146_p1 = scmp.ge.s32.totalorder %s1386_s19, 1 }
   0x5   : > { %p219_p2 = scmp.lt.s32.totalorder %s1386_s19, 5 }
   0x6   : > { %s1824_s20 = smov (%p24_p0, %s23_s20), 0  ;;  %s1826_s21 = smov (!%p24_p0, %s26_s21), %s1382_s18 }
   0x7   : > { %p220_p3 = pnand %p1146_p1, %p219_p2  ;;  %p28_p4 = scmp.ge.s32.totalorder %s1826_s21, 2 }
   0x8   : > { %s1147_s22 = sshll.u32 (!%p220_p3), %s1370_s15, 3  ;;  %p274_p5 = scmp.lt.s32.totalorder (!%p220_p3), %s1374_s16, 1  ;;  %vm495_vm0 = vcmask (!%p220_p3), 23552   ;;  %vm544_vm1 = vcmask (!%p220_p3), 48128   ;;  %vm690_vm2 = vcmask (!%p220_p3), 1046528   ;;  %vm793_vm3 = vcmask (!%p220_p3), 1044480  }
   0x9   : > { %s1828_s21 = smov (%p28_p4, %s1826_s21), 0  ;;  %223 = sbr.rel (%p220_p3) target bundleno = 555 (0x22b), region = 36 }
   0xa   : > { %p276_p6 = scmp.lt.s32.totalorder (!%p220_p3), %s1147_s22, 15  ;;  %s1149_s25 = sshll.u32 (!%p220_p3), %s1370_s15, 1  ;;  %vm794_vm4 = vcmask (!%p220_p3), 1045504   ;;  %vm577_vm5 = vsmask.f32 (!%p220_p3), 7424  ;;  %vm731_vm6 = vcmask (!%p220_p3), 72704  }
   0xb   : > { %p287_p7 = scmp.lt.s32.totalorder (!%p220_p3), %s1149_s25, 3  ;;  %s1388_s5 = smov (!%p220_p3), 3   ;;  %vm748_vm7 = vcmask (!%p220_p3), 146432   ;;  %vm776_vm8 = vcmask (!%p220_p3), 220160   ;;  %vm993_vm9 = vcmask (!%p220_p3), 19456  }
   0xc   : > { %s1389_s9 = smov (!%p220_p3), 6   ;;  %s1390_s14 = smov (!%p220_p3), 18  }
  0x10   : > { %s1830_s16 = smov (!%p274_p5, %s1374_s16), 1  ;;  %s1832_s22 = smov (!%p276_p6, %s1147_s22), 15 }
  0x11   : > { %s1278_s23 = smul.u32 48, %s1830_s16  ;;  %s1834_s25 = smov (!%p287_p7, %s1149_s25), 3 }
  0x12   : > { %s1277_s24 = smul.u32 3, %s1832_s22  ;;  %s1152_s28 = sshll.u32 %s1830_s16, 4 }
  0x13   : > { %s1280_s6 = smul.u32 12, %s1830_s16  ;;  %s301_s29 = sadd.s32 %s1152_s28, %s1832_s22 }
  0x14   : > { %s280_s26 = sadd.s32 %s1278_s23, %s1277_s24  ;;  %s1279_s7 = smul.u32 3, %s1834_s25 }
  0x15   : > { %s1148_s27 = sshll.u32 %s280_s26, 2 }
  0x16   : > { %s1461_s30 = scalar_lea.vmem %s1814_s0, %s1148_s27  ;;  %s291_s8 = sadd.s32 %s1280_s6, %s1279_s7 }
  0x17   : > { %v1464_v0 = vld [vmem:[%s1461_s30 + $0xc] sm:$0xff]   ;;  %v1467_v1 = vld [vmem:[%s1461_s30] sm:$0xff]   ;;  %v1485_v4 = vld [vmem:[%s1461_s30 + $0x38] ss:$0 sps:$4 sm:$0x11]   ;;  %s1150_s10 = sshll.u32 %s291_s8, 2 }
  0x18   : > { %427 = vrot.lane.b32.xlu1 %v1464_v0, %s1388_s5  ;;  %v1472_v2 = vld [vmem:[%s1461_s30 + $0x3c] sm:$0xff]   ;;  %423 = vrot.lane.b32.xlu0 %v1467_v1, %s1388_s5  ;;  %v1477_v3 = vld [vmem:[%s1461_s30 + $0x30] sm:$0xff]   ;;  %s1497_s13 = scalar_lea.vmem %s1815_s1, %s1150_s10  ;;  %s1392_s27 = smov 9  }
  0x19   : > { %v1490_v5 = vld [vmem:[%s1461_s30 + $0x8] ss:$0 sps:$4 sm:$0x11]   ;;  %v1507_v7 = vld [vmem:[%s1461_s30 + $0x18] sm:$0xff]   ;;  %v1340_v14 = vld [vmem:[%s1497_s13 + $0xc] sm:$0xff]  }
  0x1a   : > { %v1502_v6 = vld [vmem:[%s1461_s30 + $0x48] sm:$0xff]   ;;  %v1512_v8 = vld [vmem:[%s1461_s30 + $0x44] ss:$0 sps:$4 sm:$0x11]   ;;  %v1338_v12 = vld [vmem:[%s1461_s30 + $0x54] sm:$0xff]  }
  0x1b   : > { %v1517_v9 = vld [vmem:[%s1461_s30 + $0x14] ss:$0 sps:$4 sm:$0x11]   ;;  %v1526_v10 = vld [vmem:[%s1461_s30 + $0x50] ss:$0 sps:$4 sm:$0x11]  }
  0x1c   : > { %443 = vrot.lane.b32.xlu1 %v1472_v2, %s1388_s5  ;;  %439 = vrot.lane.b32.xlu0 %v1477_v3, %s1388_s5  ;;  %v1531_v11 = vld [vmem:[%s1461_s30 + $0x20] ss:$0 sps:$4 sm:$0x11]   ;;  %v1339_v13 = vld [vmem:[%s1461_s30 + $0x24] sm:$0xff]  }
  0x1d   : > { %v1341_v15 = vld [vmem:[%s1461_s30 + $0x5c] ss:$0 sps:$4 sm:$0x11]   ;;  %v1342_v16 = vld [vmem:[%s1461_s30 + $0x2c] ss:$0 sps:$4 sm:$0x11]  }
  0x1e   : > { %v1343_v17 = vld [vmem:[%s1497_s13 + $0x14] ss:$0 sps:$4 sm:$0x11]   ;;  %v1344_v28 = vld [vmem:[%s1497_s13] sm:$0xff]   ;;  %s1154_s30 = sshll.u32 %s1370_s15, 4 }
  0x1f   : > { %v1345_v30 = vld [vmem:[%s1497_s13 + $0x8] ss:$0 sps:$4 sm:$0x11]   ;;  %p308_p8 = scmp.lt.s32.totalorder %s1154_s30, 31 }
  0x20   : > { %479 = vrot.lane.b32.xlu1 %v1472_v2, %s1389_s9  ;;  %463 = vrot.lane.b32.xlu0 %v1464_v0, %s1389_s9 }
  0x21   : > { %s1836_s30 = smov (!%p308_p8, %s1154_s30), 31 }
  0x24   : > { %441 = vrot.lane.b32.xlu1 %v1485_v4, %s1388_s5  ;;  %425 = vrot.lane.b32.xlu0 %v1490_v5, %s1388_s5 }
  0x28   : > { %483 = vrot.lane.b32.xlu1 %v1502_v6, %s1389_s9  ;;  %467 = vrot.lane.b32.xlu0 %v1507_v7, %s1389_s9 }
  0x2c   : > { %445 = vrot.lane.b32.xlu1 %v1512_v8, %s1388_s5  ;;  %429 = vrot.lane.b32.xlu0 %v1517_v9, %s1388_s5 }
  0x30   : > { %481 = vrot.lane.b32.xlu1 %v1512_v8, %s1389_s9  ;;  %465 = vrot.lane.b32.xlu0 %v1517_v9, %s1389_s9 }
  0x34   : > { %485 = vrot.lane.b32.xlu1 %v1526_v10, %s1389_s9  ;;  %469 = vrot.lane.b32.xlu0 %v1531_v11, %s1389_s9 }
  0x38   : > { %447 = vrot.lane.b32.xlu1 %v1502_v6, %s1388_s5  ;;  %431 = vrot.lane.b32.xlu0 %v1507_v7, %s1388_s5 }
  0x3c   : > { %451 = vrot.lane.b32.xlu1 %v1338_v12, %s1388_s5  ;;  %435 = vrot.lane.b32.xlu0 %v1339_v13, %s1388_s5 }
  0x40   : > { %487 = vrot.lane.b32.xlu1 %v1338_v12, %s1389_s9  ;;  %471 = vrot.lane.b32.xlu0 %v1339_v13, %s1389_s9 }
  0x44   : > { %449 = vrot.lane.b32.xlu1 %v1526_v10, %s1388_s5  ;;  %433 = vrot.lane.b32.xlu0 %v1531_v11, %s1388_s5 }
  0x48   : > { %491 = vrot.lane.b32.xlu1 %v1340_v14, %s1389_s9  ;;  %475 = vrot.lane.b32.xlu0 %v1477_v3, %s1389_s9 }
  0x4c   : > { %453 = vrot.lane.b32.xlu1 %v1341_v15, %s1388_s5  ;;  %437 = vrot.lane.b32.xlu0 %v1342_v16, %s1388_s5  ;;  %s1153_s5 = sshll.u32 %s301_s29, 2 }
  0x4d   : > { %s1755_s8 = scalar_lea.vmem %s1817_s3, %s1153_s5 }
  0x50   : > { %489 = vrot.lane.b32.xlu1 %v1341_v15, %s1389_s9  ;;  %473 = vrot.lane.b32.xlu0 %v1342_v16, %s1389_s9 }
  0x54   : > { %493 = vrot.lane.b32.xlu1 %v1343_v17, %s1389_s9  ;;  %477 = vrot.lane.b32.xlu0 %v1485_v4, %s1389_s9  ;;  %v1346_v17 = vld [vmem:[%s1816_s2] sm:$0xff]   ;;  %s1155_s9 = sshll.u32 %s1830_s16, 5 }
  0x55   : > { %1253 = vmatprep.subr.bf16.mxu0 %v1346_v17  ;;  %1273 = vmatprep.subr.bf16.mxu1 %v1346_v17  ;;  %s311_s10 = sadd.s32 %s1155_s9, %s1836_s30 }
  0x56   : > { %1254 = vmatpush3.bf16.msra.mxu0 %v1346_v17  ;;  %1275 = vmatpush3.bf16.msra.mxu1 %v1346_v17  ;;  %s1156_s11 = sshll.u32 %s311_s10, 2 }
  0x57   : > { %s1763_s12 = scalar_lea.vmem %s1818_s4, %s1156_s11 }
  0x8a   : > { %v428_v18 = vpop.permute.xlu1 %427  ;;  %v424_v19 = vpop.permute.xlu0 %423 }
  0x8b   : > { %v498_v33 = vsel %vm495_vm0, %v1344_v28, %v424_v19  ;;  %v504_v45 = vsel %vm495_vm0, %v1467_v1, %v428_v18 }
  0x8e   : > { %v444_v20 = vpop.permute.xlu1 %443  ;;  %v440_v21 = vpop.permute.xlu0 %439 }
  0x8f   : > { %v522_v32 = vsel %vm495_vm0, %v1339_v13, %v440_v21  ;;  %v528_v41 = vsel %vm495_vm0, %v1477_v3, %v444_v20  ;;  %v1347_v20 = vld [vmem:[%s1816_s2 + $0x8] sm:$0x3f]  }
  0x92   : > { %v480_v22 = vpop.permute.xlu1 %479  ;;  %v464_v23 = vpop.permute.xlu0 %463 }
  0x93   : > { %v1570_v34 = vsel %vm544_vm1, %v522_v32, %v480_v22  ;;  %v1573_v35 = vsel %vm544_vm1, %v498_v33, %v464_v23 }
  0x94   : > { %v703_v42 = vrot.slane %v1570_v34, 1  ;;  %v691_v46 = vrot.slane %v1573_v35, 1  ;;  %v620_v19 = vshll.u32 %v1570_v34, 16  ;;  %v580_v21 = vshll.u32 %v1573_v35, 16 }
  0x95   : > { %v618_v23 = vshrl.u32 %v1570_v34, 16 }
  0x96   : > { %v442_v24 = vpop.permute.xlu1 %441  ;;  %v426_v25 = vpop.permute.xlu0 %425 }
  0x97   : > { %v525_v36 = vsel %vm495_vm0, %v1342_v16, %v442_v24  ;;  %v501_v38 = vsel %vm495_vm0, %v1345_v30, %v426_v25  ;;  %v1391_v25 = vmov 65535  }
  0x9a   : > { %v484_v26 = vpop.permute.xlu1 %483  ;;  %v468_v27 = vpop.permute.xlu0 %467 }
  0x9b   : > { %v1591_v47 = vsel %vm544_vm1, %v528_v41, %v484_v26  ;;  %v1595_v49 = vsel %vm544_vm1, %v504_v45, %v468_v27  ;;  %v795_v26 = vsel %vm793_vm3, 4294967295, %v1391_v25  ;;  %v622_v27 = vrot.slane %v620_v19, 1 }
  0x9c   : > { %v706_v57 = vrot.slane %v1591_v47, 1  ;;  %v694_v60 = vrot.slane %v1595_v49, 1  ;;  %v796_v30 = vsel %vm794_vm4, %v795_v26, 0  ;;  %v630_v41 = vshll.u32 %v1591_v47, 16 }
  0x9e   : > { %v446_v29 = vpop.permute.xlu1 %445  ;;  %v430_v31 = vpop.permute.xlu0 %429 }
  0x9f   : > { %v531_v50 = vsel %vm495_vm0, %v1485_v4, %v446_v29  ;;  %v507_v53 = vsel %vm495_vm0, %v1490_v5, %v430_v31 }
  0xa2   : > { %v482_v37 = vpop.permute.xlu1 %481  ;;  %v466_v40 = vpop.permute.xlu0 %465 }
  0xa3   : > { %v1578_v39 = vsel %vm544_vm1, %v525_v36, %v482_v37  ;;  %v1585_v44 = vsel %vm544_vm1, %v501_v38, %v466_v40  ;;  %v798_v36 = vand.u32 %v1347_v20, %v796_v30  ;;  %v578_v37 = vshrl.u32 %v1573_v35, 16 }
  0xa4   : > { %v704_v43 = vrot.slane %v1578_v39, 1  ;;  %v692_v48 = vrot.slane %v1585_v44, 1  ;;  %v624_v28 = vshll.u32 %v1578_v39, 16  ;;  %v584_v31 = vshll.u32 %v1585_v44, 16 }
  0xa5   : > { %v582_v38 = vrot.slane %v580_v21, 1  ;;  %1255 = vmatprep.subr.bf16.mxu0 %v798_v36  ;;  %1274 = vmatprep.subr.bf16.mxu1 %v798_v36 }
  0xa6   : > { %v486_v51 = vpop.permute.xlu1 %485  ;;  %v705_v52 = vsel %vm690_vm2, %v703_v42, %v704_v43  ;;  %v470_v55 = vpop.permute.xlu0 %469  ;;  %v693_v56 = vsel %vm690_vm2, %v691_v46, %v692_v48  ;;  %v590_v42 = vshll.u32 %v1595_v49, 16  ;;  %v626_v45 = vrot.slane %v624_v28, 1  ;;  %1256 = vmatpush3.bf16.msra.mxu0 %v798_v36  ;;  %1276 = vmatpush3.bf16.msra.mxu1 %v798_v36 }
  0xa7   : > { %v1603_v54 = vsel %vm544_vm1, %v531_v50, %v486_v51  ;;  %723 = vrot.lane.b32.xlu1 %v705_v52, %s1390_s14  ;;  %v1610_v59 = vsel %vm544_vm1, %v507_v53, %v470_v55  ;;  %715 = vrot.lane.b32.xlu0 %v693_v56, %s1390_s14  ;;  %v623_v53 = vor.u32 %v622_v27, %v618_v23 }
  0xa8   : > { %v707_v58 = vrot.slane %v1603_v54, 1  ;;  %v695_v61 = vrot.slane %v1610_v59, 1  ;;  %v634_v55 = vshll.u32 %v1603_v54, 16 }
  0xaa   : > { %v448_v62 = vpop.permute.xlu1 %447  ;;  %v708_v63 = vsel %vm690_vm2, %v706_v57, %v707_v58  ;;  %v432_v1 = vpop.permute.xlu0 %431  ;;  %v696_v3 = vsel %vm690_vm2, %v694_v60, %v695_v61  ;;  %v583_v57 = vor.u32 %v582_v38, %v578_v37  ;;  %v632_v58 = vrot.slane %v630_v41, 1 }
  0xab   : > { %725 = vrot.lane.b32.xlu1 %v708_v63, %s1390_s14  ;;  %717 = vrot.lane.b32.xlu0 %v696_v3, %s1390_s14  ;;  %v534_v29 = vsel %vm495_vm0, %v1472_v2, %v448_v62  ;;  %v510_v32 = vsel %vm495_vm0, %v1464_v0, %v432_v1  ;;  %v588_v60 = vshrl.u32 %v1595_v49, 16  ;;  %v594_v61 = vshll.u32 %v1610_v59, 16 }
  0xac   : > { %v592_v63 = vrot.slane %v590_v42, 1 }
  0xad   : > { %v596_v21 = vrot.slane %v594_v61, 1 }
  0xae   : > { %v1619_v4 = vpop.permute.xlu1 %451  ;;  %v1621_v5 = vpop.permute.xlu0 %435  ;;  %v593_v27 = vor.u32 %v592_v63, %v588_v60 }
  0xaf   : > { %v540_v1 = vsel %vm495_vm0, %v1502_v6, %v1619_v4  ;;  %v516_v59 = vsel %vm495_vm0, %v1507_v7, %v1621_v5  ;;  %v636_v4 = vrot.slane %v634_v55, 1 }
  0xb0   : > { %v597_v36 = vsel %vm577_vm5, %v593_v27, %v596_v21 }
  0xb2   : > { %v488_v12 = vpop.permute.xlu1 %487  ;;  %v472_v13 = vpop.permute.xlu0 %471 }
  0xb3   : > { %v1643_v33 = vsel %vm544_vm1, %v534_v29, %v488_v12  ;;  %v1647_v40 = vsel %vm544_vm1, %v510_v32, %v472_v13  ;;  %v627_v12 = vsel %vm577_vm5, %v623_v53, %v626_v45 }
  0xb4   : > { %v709_v46 = vrot.slane %v1643_v33, 1  ;;  %v697_v51 = vrot.slane %v1647_v40, 1  ;;  %v640_v3 = vshll.u32 %v1643_v33, 16  ;;  %v600_v13 = vshll.u32 %v1647_v40, 16 }
  0xb5   : > { %v598_v30 = vshrl.u32 %v1647_v40, 16 }
  0xb6   : > { %v450_v14 = vpop.permute.xlu1 %449  ;;  %v434_v15 = vpop.permute.xlu0 %433  ;;  %v642_v23 = vrot.slane %v640_v3, 1 }
  0xb7   : > { %v537_v39 = vsel %vm495_vm0, %v1512_v8, %v450_v14  ;;  %v513_v0 = vsel %vm495_vm0, %v1517_v9, %v434_v15  ;;  %v586_v8 = vrot.slane %v584_v31, 1  ;;  %v628_v9 = vshrl.u32 %v1591_v47, 16 }
  0xb9   : > { %v587_v6 = vsel %vm577_vm5, %v583_v57, %v586_v8  ;;  %v633_v26 = vor.u32 %v632_v58, %v628_v9 }
  0xba   : > { %v1623_v16 = vpop.permute.xlu1 %491  ;;  %v1628_v18 = vpop.permute.xlu0 %475 }
  0xbb   : > { %v1678_v14 = vsel %vm544_vm1, %v540_v1, %v1623_v16  ;;  %v1683_v17 = vsel %vm544_vm1, %v516_v59, %v1628_v18  ;;  %v637_v29 = vsel %vm577_vm5, %v633_v26, %v636_v4 }
  0xbc   : > { %v650_v25 = vshll.u32 %v1678_v14, 16  ;;  %v648_v41 = vshrl.u32 %v1678_v14, 16  ;;  %v712_v53 = vrot.slane %v1678_v14, 1  ;;  %v700_v9 = vrot.slane %v1683_v17, 1 }
  0xbe   : > { %v454_v22 = vpop.permute.xlu1 %453  ;;  %v438_v24 = vpop.permute.xlu0 %437  ;;  %v652_v37 = vrot.slane %v650_v25, 1 }
  0xbf   : > { %v543_v19 = vsel %vm495_vm0, %v1526_v10, %v454_v22  ;;  %v519_v7 = vsel %vm495_vm0, %v1531_v11, %v438_v24  ;;  %v602_v10 = vrot.slane %v600_v13, 1  ;;  %v610_v22 = vshll.u32 %v1683_v17, 16 }
  0xc0   : > { %v638_v11 = vshrl.u32 %v1643_v33, 16 }
  0xc2   : > { %v490_v2 = vpop.permute.xlu1 %489  ;;  %v474_v44 = vpop.permute.xlu0 %473  ;;  %v643_v38 = vor.u32 %v642_v23, %v638_v11 }
  0xc3   : > { %v572_v43 = vsel %vm544_vm1, %v537_v39, %v490_v2  ;;  %v556_v50 = vsel %vm544_vm1, %v513_v0, %v474_v44  ;;  %v612_v39 = vrot.slane %v610_v22, 1  ;;  %v603_v2 = vor.u32 %v602_v10, %v598_v30 }
  0xc4   : > { %v710_v48 = vrot.slane %v572_v43, 1  ;;  %v698_v52 = vrot.slane %v556_v50, 1  ;;  %v644_v20 = vshll.u32 %v572_v43, 16  ;;  %v604_v5 = vshll.u32 %v556_v50, 16 }
  0xc5   : > { %v608_v43 = vshrl.u32 %v1683_v17, 16 }
  0xc6   : > { %v711_v56 = vsel %vm690_vm2, %v709_v46, %v710_v48  ;;  %v699_v62 = vsel %vm690_vm2, %v697_v51, %v698_v52  ;;  %v494_v54 = vpop.permute.xlu1 %493  ;;  %v478_v15 = vpop.permute.xlu0 %477  ;;  %v646_v24 = vrot.slane %v644_v20, 1  ;;  %v606_v31 = vrot.slane %v604_v5, 1 }
  0xc7   : > { %727 = vrot.lane.b32.xlu1 %v711_v56, %s1390_s14  ;;  %719 = vrot.lane.b32.xlu0 %v699_v62, %s1390_s14  ;;  %v576_v16 = vsel %vm544_vm1, %v543_v19, %v494_v54  ;;  %v560_v18 = vsel %vm544_vm1, %v519_v7, %v478_v15  ;;  %v653_v46 = vor.u32 %v652_v37, %v648_v41 }
  0xc8   : > { %v654_v28 = vshll.u32 %v576_v16, 16  ;;  %v614_v32 = vshll.u32 %v560_v18, 16  ;;  %v647_v0 = vsel %vm577_vm5, %v643_v38, %v646_v24  ;;  %v607_v45 = vsel %vm577_vm5, %v603_v2, %v606_v31 }
  0xc9   : > { %v613_v48 = vor.u32 %v612_v39, %v608_v43  ;;  %v713_v50 = vrot.slane %v576_v16, 1  ;;  %v701_v51 = vrot.slane %v560_v18, 1 }
  0xca   : > { %v656_v42 = vrot.slane %v654_v28, 1  ;;  %v616_v44 = vrot.slane %v614_v32, 1 }
  0xcb   : > { %666 = vrot.lane.b32.xlu1 %v627_v12, %s1392_s27  ;;  %658 = vrot.lane.b32.xlu0 %v587_v6, %s1392_s27  ;;  %v714_v55 = vsel %vm690_vm2, %v712_v53, %v713_v50  ;;  %v702_v56 = vsel %vm690_vm2, %v700_v9, %v701_v51 }
  0xcc   : > { %v657_v8 = vsel %vm577_vm5, %v653_v46, %v656_v42  ;;  %v617_v52 = vsel %vm577_vm5, %v613_v48, %v616_v44 }
  0xcf   : > { %668 = vrot.lane.b32.xlu1 %v637_v29, %s1392_s27  ;;  %660 = vrot.lane.b32.xlu0 %v597_v36, %s1392_s27 }
  0xd3   : > { %670 = vrot.lane.b32.xlu1 %v647_v0, %s1392_s27  ;;  %662 = vrot.lane.b32.xlu0 %v607_v45, %s1392_s27 }
  0xd7   : > { %672 = vrot.lane.b32.xlu1 %v657_v8, %s1392_s27  ;;  %664 = vrot.lane.b32.xlu0 %v617_v52, %s1392_s27  ;;  %v1242_v52 = vld [vmem:[%s1755_s8 + $0x18] sm:$0xff]  }
  0xdb   : > { %729 = vrot.lane.b32.xlu1 %v714_v55, %s1390_s14  ;;  %721 = vrot.lane.b32.xlu0 %v702_v56, %s1390_s14  ;;  %v1240_v55 = vld [vmem:[%s1755_s8 + $0x8] sm:$0xff]  }
 0x119   : > { %v724_v57 = vpop.permute.xlu1 %723  ;;  %v716_v58 = vpop.permute.xlu0 %715 }
 0x11d   : > { %v726_v60 = vpop.permute.xlu1 %725  ;;  %v718_v61 = vpop.permute.xlu0 %717 }
 0x139   : > { %v728_v62 = vpop.permute.xlu1 %727  ;;  %v720_v63 = vpop.permute.xlu0 %719 }
 0x13d   : > { %v667_v1 = vpop.permute.xlu1 %666  ;;  %v659_v54 = vpop.permute.xlu0 %658 }
 0x13e   : > { %v741_v3 = vsel %vm731_vm6, %v1570_v34, %v667_v1  ;;  %v733_v12 = vsel %vm731_vm6, %v1573_v35, %v659_v54 }
 0x13f   : > { %v758_v59 = vsel %vm748_vm7, %v741_v3, %v724_v57  ;;  %v750_v13 = vsel %vm748_vm7, %v733_v12, %v716_v58  ;;  %v1238_v57 = vunpack.c.l.bf16 %v1242_v52  ;;  %v1230_v58 = vunpack.c.l.bf16 %v1240_v55 }
 0x140   : > { %1265 = vmatprep.mubr.msk.bf16.mxu1 %vm776_vm8, %v758_v59  ;;  %1257 = vmatprep.mubr.msk.bf16.mxu0 %vm776_vm8, %v750_v13 }
 0x141   : > { %v669_v15 = vpop.permute.xlu1 %668  ;;  %v661_v4 = vpop.permute.xlu0 %660 }
 0x142   : > { %v743_v6 = vsel %vm731_vm6, %v1591_v47, %v669_v15  ;;  %v735_v34 = vsel %vm731_vm6, %v1595_v49, %v661_v4 }
 0x143   : > { %v760_v19 = vsel %vm748_vm7, %v743_v6, %v726_v60  ;;  %v752_v35 = vsel %vm748_vm7, %v735_v34, %v718_v61  ;;  %v1239_v60 = vunpack.c.h.bf16 %v1242_v52 }
 0x144   : > { %1266 = vmatmul.mubr.msk.bf16.vlgmr.msra.gmra.mrb[0].mxu1 %vm776_vm8, %v760_v19  ;;  %1258 = vmatmul.mubr.msk.bf16.vlgmr.msra.gmra.mrb[0].mxu0 %vm776_vm8, %v752_v35 }
 0x145   : > { %v671_v20 = vpop.permute.xlu1 %670  ;;  %v663_v7 = vpop.permute.xlu0 %662 }
 0x146   : > { %v745_v21 = vsel %vm731_vm6, %v1643_v33, %v671_v20  ;;  %v737_v47 = vsel %vm731_vm6, %v1647_v40, %v663_v7 }
 0x147   : > { %v762_v49 = vsel %vm748_vm7, %v745_v21, %v728_v62  ;;  %v754_v5 = vsel %vm748_vm7, %v737_v47, %v720_v63  ;;  %v1231_v62 = vunpack.c.h.bf16 %v1240_v55 }
 0x148   : > { %1269 = vmatprep.mubr.msk.bf16.mxu1 %vm776_vm8, %v762_v49  ;;  %1261 = vmatprep.mubr.msk.bf16.mxu0 %vm776_vm8, %v754_v5 }
 0x149   : > { %v673_v16 = vpop.permute.xlu1 %672  ;;  %v665_v23 = vpop.permute.xlu0 %664 }
 0x14a   : > { %v747_v33 = vsel %vm731_vm6, %v1678_v14, %v673_v16  ;;  %v739_v40 = vsel %vm731_vm6, %v1683_v17, %v665_v23  ;;  %v1241_v14 = vld [vmem:[%s1755_s8 + $0x10] sm:$0xff]   ;;  %v1225_v17 = vld [vmem:[%s1755_s8] sm:$0xff]  }
 0x14b   : > { %v1234_v22 = vunpack.c.l.bf16 %v1241_v14  ;;  %v1226_v27 = vunpack.c.l.bf16 %v1225_v17  ;;  %v1235_v11 = vunpack.c.h.bf16 %v1241_v14  ;;  %v1227_v28 = vunpack.c.h.bf16 %v1225_v17 }
 0x14d   : > { %v730_v25 = vpop.permute.xlu1 %729  ;;  %v722_v26 = vpop.permute.xlu0 %721 }
 0x14e   : > { %v764_v18 = vsel %vm748_vm7, %v747_v33, %v730_v25  ;;  %v756_v10 = vsel %vm748_vm7, %v739_v40, %v722_v26 }
 0x14f   : > { %1270 = vmatmul.mubr.msk.bf16.gmra.mrb[4].mxu1 %vm776_vm8, %v764_v18  ;;  %1262 = vmatmul.mubr.msk.bf16.gmra.mrb[4].mxu0 %vm776_vm8, %v756_v10 }
 0x217   : > { %v1267_v24 = vpop.f32.mrb[0].mxu1  ;;  %v1259_v29 = vpop.f32.mrb[0].mxu0 }
 0x218   : > { %v923_v30 = vadd.f32 %v1267_v24, %v1234_v22  ;;  %v866_v31 = vpop.f32.mrb[1].mxu1  ;;  %v915_v32 = vadd.f32 %v1259_v29, %v1226_v27  ;;  %v834_v36 = vpop.f32.mrb[1].mxu0 }
 0x219   : > { %v921_v37 = vadd.f32 %v1234_v22, %v866_v31  ;;  %v1268_v38 = vpop.f32.mrb[2].mxu1  ;;  %v913_v2 = vadd.f32 %v1226_v27, %v834_v36  ;;  %v1260_v41 = vpop.f32.mrb[2].mxu0 }
 0x21a   : > { %v1218_v39 = vpack.c.bf16 %v923_v30, %v923_v30  ;;  %v924_v42 = vadd.f32 %v1268_v38, %v1235_v11  ;;  %v869_v0 = vpop.f32.mrb[3].mxu1  ;;  %v1210_v43 = vpack.c.bf16 %v915_v32, %v915_v32  ;;  %v916_v45 = vadd.f32 %v1260_v41, %v1227_v28  ;;  %v837_v46 = vpop.f32.mrb[3].mxu0 }
 0x21b   : > { %v1216_v44 = vpack.c.bf16 %v921_v37, %v921_v37  ;;  %v922_v48 = vadd.f32 %v1235_v11, %v869_v0  ;;  %v1208_v50 = vpack.c.bf16 %v913_v2, %v913_v2  ;;  %v914_v51 = vadd.f32 %v1227_v28, %v837_v46 }
 0x21c   : > { %1004 = vst.msk [vmem:[%s1763_s12 + $0x28] sm:$0xf] %vm993_vm9, %v1218_v39  ;;  %v1219_v8 = vpack.c.bf16 %v924_v42, %v924_v42  ;;  %996 = vst.msk [vmem:[%s1763_s12 + $0x8] sm:$0xf] %vm993_vm9, %v1210_v43  ;;  %v1211_v53 = vpack.c.bf16 %v916_v45, %v916_v45 }
 0x21d   : > { %1002 = vst.msk [vmem:[%s1763_s12 + $0x20] sm:$0xf] %vm993_vm9, %v1216_v44  ;;  %v1217_v9 = vpack.c.bf16 %v922_v48, %v922_v48  ;;  %994 = vst.msk [vmem:[%s1763_s12] sm:$0xf] %vm993_vm9, %v1208_v50  ;;  %v1209_v56 = vpack.c.bf16 %v914_v51, %v914_v51 }
 0x21e   : > { %1005 = vst.msk [vmem:[%s1763_s12 + $0x2c] sm:$0xf] %vm993_vm9, %v1219_v8  ;;  %997 = vst.msk [vmem:[%s1763_s12 + $0xc] sm:$0xf] %vm993_vm9, %v1211_v53 }
 0x21f   : > { %1003 = vst.msk [vmem:[%s1763_s12 + $0x24] sm:$0xf] %vm993_vm9, %v1217_v9  ;;  %995 = vst.msk [vmem:[%s1763_s12 + $0x4] sm:$0xf] %vm993_vm9, %v1209_v56 }
 0x222   : > { %v1271_v61 = vpop.f32.mrb[4].mxu1  ;;  %v1263_v63 = vpop.f32.mrb[4].mxu0 }
 0x223   : > { %v927_v1 = vadd.f32 %v1271_v61, %v1238_v57  ;;  %v882_v3 = vpop.f32.mrb[5].mxu1  ;;  %v919_v54 = vadd.f32 %v1263_v63, %v1230_v58  ;;  %v850_v12 = vpop.f32.mrb[5].mxu0 }
 0x224   : > { %v925_v59 = vadd.f32 %v1238_v57, %v882_v3  ;;  %v1272_v13 = vpop.f32.mrb[6].mxu1  ;;  %v917_v6 = vadd.f32 %v1230_v58, %v850_v12  ;;  %v1264_v4 = vpop.f32.mrb[6].mxu0 }
 0x225   : > { %v1222_v15 = vpack.c.bf16 %v927_v1, %v927_v1  ;;  %v928_v34 = vadd.f32 %v1272_v13, %v1239_v60  ;;  %v885_v19 = vpop.f32.mrb[7].mxu1  ;;  %v1214_v35 = vpack.c.bf16 %v919_v54, %v919_v54  ;;  %v920_v21 = vadd.f32 %v1264_v4, %v1231_v62  ;;  %v853_v7 = vpop.f32.mrb[7].mxu0 }
 0x226   : > { %v1220_v20 = vpack.c.bf16 %v925_v59, %v925_v59  ;;  %v926_v47 = vadd.f32 %v1239_v60, %v885_v19  ;;  %v1212_v49 = vpack.c.bf16 %v917_v6, %v917_v6  ;;  %v918_v16 = vadd.f32 %v1231_v62, %v853_v7 }
 0x227   : > { %1008 = vst.msk [vmem:[%s1763_s12 + $0x38] sm:$0xf] %vm993_vm9, %v1222_v15  ;;  %v1223_v5 = vpack.c.bf16 %v928_v34, %v928_v34  ;;  %1000 = vst.msk [vmem:[%s1763_s12 + $0x18] sm:$0xf] %vm993_vm9, %v1214_v35  ;;  %v1215_v23 = vpack.c.bf16 %v920_v21, %v920_v21 }
 0x228   : > { %1006 = vst.msk [vmem:[%s1763_s12 + $0x30] sm:$0xf] %vm993_vm9, %v1220_v20  ;;  %v1221_v33 = vpack.c.bf16 %v926_v47, %v926_v47  ;;  %998 = vst.msk [vmem:[%s1763_s12 + $0x10] sm:$0xf] %vm993_vm9, %v1212_v49  ;;  %v1213_v25 = vpack.c.bf16 %v918_v16, %v918_v16 }
 0x229   : > { %1009 = vst.msk [vmem:[%s1763_s12 + $0x3c] sm:$0xf] %vm993_vm9, %v1223_v5  ;;  %1001 = vst.msk [vmem:[%s1763_s12 + $0x1c] sm:$0xf] %vm993_vm9, %v1215_v23 }
 0x22a   : > { %1007 = vst.msk [vmem:[%s1763_s12 + $0x34] sm:$0xf] %vm993_vm9, %v1221_v33  ;;  %999 = vst.msk [vmem:[%s1763_s12 + $0x14] sm:$0xf] %vm993_vm9, %v1213_v25 }
 0x22b PF: > { %s14_s19 = sadd.s32 1, %s1386_s19   ;;  %s1819_s15 = smov %s1378_s17 }
 0x22c   : > { %p11_p9 = scmp.ge.s32.totalorder %s14_s19, 6   ;;  %s1820_s16 = smov %s1382_s18 }
 0x22d   : > { %s1821_s17 = smov %s1824_s20  ;;  %s1822_s18 = smov %s1828_s21 }
 0x22e   :  { %13 = sbr.rel (!%p11_p9) target bundleno = 3 (0x3), region = 73 }

// kernel: residual_oct_block.14
= control target key start
LH: loop header
LB: loop body
LE: loop exit
PB: predicated region body
PF: predicated region fallthrough
CT: control target
= control target key end

     0   :  { %s791_s9 = smov 0   ;;  %s1449_s0 = inlined_call_operand.vmem [shape: bf16[2,256,3], index: 0, kind: input, shape index: {}]   ;;  %s1450_s1 = inlined_call_operand.vmem [shape: f32[2,256,4], index: 1, kind: input, shape index: {}]   ;;  %s1451_s2 = inlined_call_operand.vmem [shape: f32[2,256,4], index: 2, kind: output, shape index: {}]  }
   0x1 LB: > { %s663_s10 = sadd.s32 4294967295, %s774_s9   ;;  %p667_p0 = scmp.ge.s32.totalorder %s774_s9, 1  ;;  %s774_s9 = sphi %s791_s9, %s12_s9  }
   0x2   : > { %p122_p1 = scmp.lt.s32.totalorder %s774_s9, 3 }
   0x4   : > { %p123_p2 = pnand %p667_p0, %p122_p1 }
   0x5   : > { %p149_p3 = scmp.lt.s32.totalorder (!%p123_p2), %s663_s10, 1  ;;  %vm228_vm0 = vcmask (!%p123_p2), 23552   ;;  %vm563_vm1 = vcmask (!%p123_p2), 31744  }
   0x6   : > { %126 = sbr.rel (%p123_p2) target bundleno = 220 (0xdc), region = 28 }
   0xd   : > { %s1453_s10 = smov (!%p149_p3, %s663_s10), 1 }
   0xe   : > { %s676_s11 = sshll.u32 %s1453_s10, 7  ;;  %s677_s15 = sshll.u32 %s1453_s10, 8 }
   0xf   : > { %s805_s14 = scalar_lea.vmem %s1449_s0, %s676_s11  ;;  %s1245_s18 = scalar_lea.vmem %s1450_s1, %s677_s15 }
  0x10   : > { %v808_v0 = vld [vmem:[%s805_s14] sm:$0xff]   ;;  %v811_v1 = vld [vmem:[%s805_s14 + $0x8] sm:$0xff]   ;;  %v817_v5 = vld [vmem:[%s805_s14 + $0x10] sm:$0xff]   ;;  %s1276_s21 = scalar_lea.vmem %s1451_s2, %s677_s15 }
  0x11   : > { %v681_v2 = vunpack.c.l.bf16 %v808_v0  ;;  %v682_v3 = vunpack.c.h.bf16 %v808_v0  ;;  %v685_v4 = vunpack.c.l.bf16 %v811_v1  ;;  %v686_v6 = vunpack.c.h.bf16 %v811_v1  ;;  %v831_v11 = vld [vmem:[%s805_s14 + $0x18] sm:$0xff]   ;;  %v842_v18 = vld [vmem:[%s805_s14 + $0x20] sm:$0xff]   ;;  %v853_v25 = vld [vmem:[%s805_s14 + $0x28] sm:$0xff]  }
  0x12   : > { %v689_v7 = vunpack.c.l.bf16 %v817_v5  ;;  %v690_v13 = vunpack.c.h.bf16 %v817_v5  ;;  %v693_v16 = vunpack.c.l.bf16 %v831_v11  ;;  %v694_v20 = vunpack.c.h.bf16 %v831_v11  ;;  %v864_v32 = vld [vmem:[%s805_s14 + $0x30] sm:$0xff]   ;;  %v875_v39 = vld [vmem:[%s805_s14 + $0x38] sm:$0xff]   ;;  %v886_v46 = vld [vmem:[%s805_s14 + $0x40] sm:$0xff]  }
  0x13   : > { %v229_v8 = vsel %vm228_vm0, %v681_v2, 0.0  ;;  %v230_v9 = vsel %vm228_vm0, %v682_v3, 0.0  ;;  %v232_v10 = vsel %vm228_vm0, %v685_v4, 0.0  ;;  %v234_v14 = vsel %vm228_vm0, %v686_v6, 0.0  ;;  %v897_v53 = vld [vmem:[%s805_s14 + $0x48] sm:$0xff]   ;;  %v908_v60 = vld [vmem:[%s805_s14 + $0x50] sm:$0xff]  }
  0x14   : > { %v231_v12 = vadd.f32 %v230_v9, %v229_v8  ;;  %v236_v17 = vsel %vm228_vm0, %v689_v7, 0.0  ;;  %v238_v21 = vsel %vm228_vm0, %v690_v13, 0.0  ;;  %v697_v23 = vunpack.c.l.bf16 %v842_v18 }
  0x15   : > { %v240_v24 = vsel %vm228_vm0, %v693_v16, 0.0  ;;  %v698_v27 = vunpack.c.h.bf16 %v842_v18  ;;  %v242_v28 = vsel %vm228_vm0, %v694_v20, 0.0  ;;  %v701_v30 = vunpack.c.l.bf16 %v853_v25 }
  0x16   : > { %v233_v15 = vadd.f32 %v232_v10, %v231_v12  ;;  %v244_v31 = vsel %vm228_vm0, %v697_v23, 0.0  ;;  %v702_v34 = vunpack.c.h.bf16 %v853_v25  ;;  %v705_v37 = vunpack.c.l.bf16 %v864_v32  ;;  %v919_v12 = vld [vmem:[%s805_s14 + $0x58] sm:$0xff]  }
  0x17   : > { %v246_v35 = vsel %vm228_vm0, %v698_v27, 0.0  ;;  %v248_v38 = vsel %vm228_vm0, %v701_v30, 0.0  ;;  %v706_v41 = vunpack.c.h.bf16 %v864_v32  ;;  %v709_v44 = vunpack.c.l.bf16 %v875_v39 }
  0x18   : > { %v235_v19 = vadd.f32 %v234_v14, %v233_v15  ;;  %v250_v42 = vsel %vm228_vm0, %v702_v34, 0.0  ;;  %v252_v45 = vsel %vm228_vm0, %v705_v37, 0.0  ;;  %v710_v48 = vunpack.c.h.bf16 %v875_v39 }
  0x19   : > { %v254_v49 = vsel %vm228_vm0, %v706_v41, 0.0  ;;  %v713_v51 = vunpack.c.l.bf16 %v886_v46  ;;  %v256_v52 = vsel %vm228_vm0, %v709_v44, 0.0  ;;  %v714_v55 = vunpack.c.h.bf16 %v886_v46 }
  0x1a   : > { %v237_v22 = vadd.f32 %v236_v17, %v235_v19  ;;  %v258_v56 = vsel %vm228_vm0, %v710_v48, 0.0  ;;  %v717_v58 = vunpack.c.l.bf16 %v897_v53  ;;  %v718_v62 = vunpack.c.h.bf16 %v897_v53 }
  0x1b   : > { %v260_v59 = vsel %vm228_vm0, %v713_v51, 0.0  ;;  %v262_v63 = vsel %vm228_vm0, %v714_v55, 0.0  ;;  %v721_v9 = vunpack.c.l.bf16 %v908_v60  ;;  %v722_v15 = vunpack.c.h.bf16 %v908_v60 }
  0x1c   : > { %v239_v26 = vadd.f32 %v238_v21, %v237_v22  ;;  %v264_v10 = vsel %vm228_vm0, %v717_v58, 0.0  ;;  %v266_v17 = vsel %vm228_vm0, %v718_v62, 0.0  ;;  %v725_v21 = vunpack.c.l.bf16 %v919_v12 }
  0x1d   : > { %v268_v22 = vsel %vm228_vm0, %v721_v9, 0.0 }
  0x1e   : > { %v241_v29 = vadd.f32 %v240_v24, %v239_v26  ;;  %v930_v24 = vld [vmem:[%s805_s14 + $0x60] sm:$0xff]  }
  0x20   : > { %v243_v33 = vadd.f32 %v242_v28, %v241_v29  ;;  %v726_v28 = vunpack.c.h.bf16 %v919_v12  ;;  %v270_v29 = vsel %vm228_vm0, %v722_v15, 0.0 }
  0x22   : > { %v245_v36 = vadd.f32 %v244_v31, %v243_v33  ;;  %v729_v33 = vunpack.c.l.bf16 %v930_v24 }
  0x24   : > { %v247_v40 = vadd.f32 %v246_v35, %v245_v36  ;;  %v272_v35 = vsel %vm228_vm0, %v725_v21, 0.0  ;;  %v941_v36 = vld [vmem:[%s805_s14 + $0x68] sm:$0xff]  }
  0x26   : > { %v249_v43 = vadd.f32 %v248_v38, %v247_v40  ;;  %v730_v40 = vunpack.c.h.bf16 %v930_v24 }
  0x28   : > { %v251_v47 = vadd.f32 %v250_v42, %v249_v43  ;;  %v274_v42 = vsel %vm228_vm0, %v726_v28, 0.0 }
  0x2a   : > { %v253_v50 = vadd.f32 %v252_v45, %v251_v47  ;;  %v733_v45 = vunpack.c.l.bf16 %v941_v36  ;;  %v276_v47 = vsel %vm228_vm0, %v729_v33, 0.0 }
  0x2c   : > { %v255_v54 = vadd.f32 %v254_v49, %v253_v50  ;;  %v952_v49 = vld [vmem:[%s805_s14 + $0x70] sm:$0xff]  }
  0x2e   : > { %v257_v57 = vadd.f32 %v256_v52, %v255_v54  ;;  %v734_v52 = vunpack.c.h.bf16 %v941_v36  ;;  %v278_v54 = vsel %vm228_vm0, %v730_v40, 0.0 }
  0x30   : > { %v259_v61 = vadd.f32 %v258_v56, %v257_v57  ;;  %v737_v57 = vunpack.c.l.bf16 %v952_v49 }
  0x32   : > { %v261_v8 = vadd.f32 %v260_v59, %v259_v61  ;;  %v280_v59 = vsel %vm228_vm0, %v733_v45, 0.0  ;;  %v963_v61 = vld [vmem:[%s805_s14 + $0x78] sm:$0xff]  }
  0x34   : > { %v263_v14 = vadd.f32 %v262_v63, %v261_v8  ;;  %v738_v8 = vunpack.c.h.bf16 %v952_v49 }
  0x36   : > { %v265_v19 = vadd.f32 %v264_v10, %v263_v14  ;;  %v282_v10 = vsel %vm228_vm0, %v734_v52, 0.0 }
  0x38   : > { %v267_v26 = vadd.f32 %v266_v17, %v265_v19  ;;  %v741_v17 = vunpack.c.l.bf16 %v963_v61  ;;  %v284_v19 = vsel %vm228_vm0, %v737_v57, 0.0 }
  0x3a   : > { %v269_v31 = vadd.f32 %v268_v22, %v267_v26  ;;  %v742_v26 = vunpack.c.h.bf16 %v963_v61 }
  0x3c   : > { %v271_v38 = vadd.f32 %v270_v29, %v269_v31  ;;  %v286_v29 = vsel %vm228_vm0, %v738_v8, 0.0 }
  0x3e   : > { %v273_v43 = vadd.f32 %v272_v35, %v271_v38  ;;  %v288_v35 = vsel %vm228_vm0, %v741_v17, 0.0 }
  0x40   : > { %v275_v50 = vadd.f32 %v274_v42, %v273_v43  ;;  %v290_v42 = vsel %vm228_vm0, %v742_v26, 0.0 }
  0x42   : > { %v277_v56 = vadd.f32 %v276_v47, %v275_v50 }
  0x44   : > { %v279_v63 = vadd.f32 %v278_v54, %v277_v56 }
  0x46   : > { %v281_v14 = vadd.f32 %v280_v59, %v279_v63 }
  0x48   : > { %v283_v22 = vadd.f32 %v282_v10, %v281_v14 }
  0x4a   : > { %v285_v31 = vadd.f32 %v284_v19, %v283_v22 }
  0x4c   : > { %v287_v38 = vadd.f32 %v286_v29, %v285_v31 }
  0x4e   : > { %v289_v43 = vadd.f32 %v288_v35, %v287_v38 }
  0x50   : > { %v291_v47 = vadd.f32 %v290_v42, %v289_v43 }
  0x52   : > { %v292_v50 = vrot.slane %v291_v47, 4 }
  0x54   : > { %v293_v54 = vadd.f32 %v292_v50, %v291_v47 }
  0x56   : > { %v294_v56 = vrot.slane %v293_v54, 2 }
  0x58   : > { %v295_v59 = vadd.f32 %v294_v56, %v293_v54 }
  0x5a   : > { %v296_v63 = vrot.slane %v295_v59, 1 }
  0x5c   : > { %v297_v10 = vadd.f32 %v296_v63, %v295_v59 }
  0x5e   : > { %v983_v14 = vmul.f32 0.00390625, %v297_v10 }
  0x60   : > { %v988_v19 = vsub.f32 %v681_v2, %v983_v14  ;;  %v993_v22 = vsub.f32 %v682_v3, %v983_v14  ;;  %v998_v29 = vsub.f32 %v685_v4, %v983_v14  ;;  %v1003_v31 = vsub.f32 %v686_v6, %v983_v14 }
  0x61   : > { %v1008_v2 = vsub.f32 %v689_v7, %v983_v14  ;;  %v1019_v1 = vsub.f32 %v690_v13, %v983_v14  ;;  %v1026_v7 = vsub.f32 %v693_v16, %v983_v14  ;;  %v1036_v13 = vsub.f32 %v694_v20, %v983_v14 }
  0x62   : > { %v331_v0 = vmul.f32 %v988_v19, %v988_v19  ;;  %v332_v3 = vmul.f32 %v993_v22, %v993_v22  ;;  %v333_v4 = vmul.f32 %v998_v29, %v998_v29  ;;  %v334_v6 = vmul.f32 %v1003_v31, %v1003_v31 }
  0x63   : > { %v335_v35 = vmul.f32 %v1008_v2, %v1008_v2  ;;  %v336_v47 = vmul.f32 %v1019_v1, %v1019_v1  ;;  %v1044_v54 = vsub.f32 %v697_v23, %v983_v14  ;;  %v337_v56 = vmul.f32 %v1026_v7, %v1026_v7 }
  0x64   : > { %v363_v38 = vsel %vm228_vm0, %v331_v0, 0.0  ;;  %v364_v42 = vsel %vm228_vm0, %v332_v3, 0.0  ;;  %v366_v43 = vsel %vm228_vm0, %v333_v4, 0.0  ;;  %v368_v16 = vsel %vm228_vm0, %v334_v6, 0.0 }
  0x65   : > { %v365_v5 = vadd.f32 %v364_v42, %v363_v38  ;;  %v370_v59 = vsel %vm228_vm0, %v335_v35, 0.0  ;;  %v1052_v11 = vsub.f32 %v698_v27, %v983_v14  ;;  %v338_v20 = vmul.f32 %v1036_v13, %v1036_v13 }
  0x66   : > { %v372_v10 = vsel %vm228_vm0, %v336_v47, 0.0  ;;  %v1060_v23 = vsub.f32 %v701_v30, %v983_v14  ;;  %v339_v3 = vmul.f32 %v1044_v54, %v1044_v54  ;;  %v374_v4 = vsel %vm228_vm0, %v337_v56, 0.0 }
  0x67   : > { %v367_v50 = vadd.f32 %v366_v43, %v365_v5  ;;  %v1068_v18 = vsub.f32 %v702_v34, %v983_v14  ;;  %v340_v27 = vmul.f32 %v1052_v11, %v1052_v11  ;;  %v376_v35 = vsel %vm228_vm0, %v338_v20, 0.0 }
  0x68   : > { %v1076_v30 = vsub.f32 %v705_v37, %v983_v14  ;;  %v341_v42 = vmul.f32 %v1060_v23, %v1060_v23  ;;  %v378_v43 = vsel %vm228_vm0, %v339_v3, 0.0  ;;  %v1084_v25 = vsub.f32 %v706_v41, %v983_v14 }
  0x69   : > { %v369_v63 = vadd.f32 %v368_v16, %v367_v50  ;;  %v342_v34 = vmul.f32 %v1068_v18, %v1068_v18  ;;  %v380_v47 = vsel %vm228_vm0, %v340_v27, 0.0  ;;  %v1092_v37 = vsub.f32 %v709_v44, %v983_v14 }
  0x6a   : > { %v343_v50 = vmul.f32 %v1076_v30, %v1076_v30  ;;  %v382_v56 = vsel %vm228_vm0, %v341_v42, 0.0  ;;  %v1100_v32 = vsub.f32 %v710_v48, %v983_v14  ;;  %v344_v41 = vmul.f32 %v1084_v25, %v1084_v25 }
  0x6b   : > { %v371_v0 = vadd.f32 %v370_v59, %v369_v63  ;;  %v384_v63 = vsel %vm228_vm0, %v342_v34, 0.0  ;;  %v1108_v44 = vsub.f32 %v713_v51, %v983_v14  ;;  %v1116_v39 = vsub.f32 %v714_v55, %v983_v14 }
  0x6c   : > { %v346_v48 = vmul.f32 %v1100_v32, %v1100_v32  ;;  %v1124_v51 = vsub.f32 %v717_v58, %v983_v14  ;;  %v1132_v46 = vsub.f32 %v718_v62, %v983_v14  ;;  %v1140_v58 = vsub.f32 %v721_v9, %v983_v14 }
  0x6d   : > { %v373_v6 = vadd.f32 %v372_v10, %v371_v0  ;;  %v345_v10 = vmul.f32 %v1092_v37, %v1092_v37  ;;  %v386_v0 = vsel %vm228_vm0, %v343_v50, 0.0  ;;  %v347_v27 = vmul.f32 %v1108_v44, %v1108_v44 }
  0x6e   : > { %v348_v55 = vmul.f32 %v1116_v39, %v1116_v39  ;;  %v392_v42 = vsel %vm228_vm0, %v346_v48, 0.0  ;;  %v1148_v53 = vsub.f32 %v722_v15, %v983_v14  ;;  %v350_v62 = vmul.f32 %v1132_v46, %v1132_v46 }
  0x6f   : > { %v375_v38 = vadd.f32 %v374_v4, %v373_v6  ;;  %v388_v4 = vsel %vm228_vm0, %v344_v41, 0.0  ;;  %v394_v34 = vsel %vm228_vm0, %v347_v27, 0.0  ;;  %v1156_v9 = vsub.f32 %v725_v21, %v983_v14 }
  0x70   : > { %v1164_v60 = vsub.f32 %v726_v28, %v983_v14  ;;  %v352_v15 = vmul.f32 %v1148_v53, %v1148_v53  ;;  %v1172_v21 = vsub.f32 %v729_v33, %v983_v14  ;;  %v1180_v12 = vsub.f32 %v730_v40, %v983_v14 }
  0x71   : > { %v377_v5 = vadd.f32 %v376_v35, %v375_v38  ;;  %v390_v35 = vsel %vm228_vm0, %v345_v10, 0.0  ;;  %v353_v10 = vmul.f32 %v1156_v9, %v1156_v9  ;;  %v1188_v33 = vsub.f32 %v733_v45, %v983_v14 }
  0x72   : > { %v354_v28 = vmul.f32 %v1164_v60, %v1164_v60  ;;  %v404_v48 = vsel %vm228_vm0, %v352_v15, 0.0  ;;  %v1196_v24 = vsub.f32 %v734_v52, %v983_v14  ;;  %v356_v40 = vmul.f32 %v1180_v12, %v1180_v12 }
  0x73   : > { %v379_v16 = vadd.f32 %v378_v43, %v377_v5  ;;  %v349_v5 = vmul.f32 %v1124_v51, %v1124_v51  ;;  %v406_v27 = vsel %vm228_vm0, %v353_v10, 0.0  ;;  %v1204_v45 = vsub.f32 %v737_v57, %v983_v14 }
  0x74   : > { %v1212_v36 = vsub.f32 %v738_v8, %v983_v14  ;;  %v358_v52 = vmul.f32 %v1196_v24, %v1196_v24  ;;  %v1220_v57 = vsub.f32 %v741_v17, %v983_v14  ;;  %v1228_v49 = vsub.f32 %v742_v26, %v983_v14 }
  0x75   : > { %v381_v59 = vadd.f32 %v380_v47, %v379_v16  ;;  %v396_v16 = vsel %vm228_vm0, %v348_v55, 0.0 }
  0x76   : > { %v360_v8 = vmul.f32 %v1212_v36, %v1212_v36  ;;  %v361_v17 = vmul.f32 %v1220_v57, %v1220_v57 }
  0x77   : > { %v383_v20 = vadd.f32 %v382_v56, %v381_v59  ;;  %v351_v56 = vmul.f32 %v1140_v58, %v1140_v58  ;;  %v398_v59 = vsel %vm228_vm0, %v349_v5, 0.0 }
  0x78   : > { %v422_v26 = vsel %vm228_vm0, %v361_v17, 0.0 }
  0x79   : > { %v385_v3 = vadd.f32 %v384_v63, %v383_v20  ;;  %v400_v63 = vsel %vm228_vm0, %v350_v62, 0.0  ;;  %v359_v62 = vmul.f32 %v1204_v45, %v1204_v45 }
  0x7b   : > { %v387_v6 = vadd.f32 %v386_v0, %v385_v3  ;;  %v402_v0 = vsel %vm228_vm0, %v351_v56, 0.0  ;;  %v416_v56 = vsel %vm228_vm0, %v358_v52, 0.0  ;;  %v470_v52 = vld [vmem:[%s1245_s18 + $0x18] sm:$0xff] }
  0x7d   : > { %v389_v38 = vadd.f32 %v388_v4, %v387_v6  ;;  %v355_v6 = vmul.f32 %v1172_v21, %v1172_v21 }
  0x7f   : > { %v391_v43 = vadd.f32 %v390_v35, %v389_v38  ;;  %v408_v38 = vsel %vm228_vm0, %v354_v28, 0.0 }
  0x81   : > { %v393_v47 = vadd.f32 %v392_v42, %v391_v43  ;;  %v357_v42 = vmul.f32 %v1188_v33, %v1188_v33  ;;  %v410_v43 = vsel %vm228_vm0, %v355_v6, 0.0 }
  0x83   : > { %v395_v50 = vadd.f32 %v394_v34, %v393_v47  ;;  %v412_v34 = vsel %vm228_vm0, %v356_v40, 0.0 }
  0x85   : > { %v397_v41 = vadd.f32 %v396_v16, %v395_v50  ;;  %v414_v16 = vsel %vm228_vm0, %v357_v42, 0.0  ;;  %v468_v42 = vld [vmem:[%s1245_s18 + $0x8] sm:$0xff] }
  0x87   : > { %v399_v20 = vadd.f32 %v398_v59, %v397_v41  ;;  %v418_v41 = vsel %vm228_vm0, %v359_v62, 0.0 }
  0x89   : > { %v401_v3 = vadd.f32 %v400_v63, %v399_v20  ;;  %v362_v63 = vmul.f32 %v1228_v49, %v1228_v49  ;;  %v420_v20 = vsel %vm228_vm0, %v360_v8, 0.0  ;;  %v472_v8 = vld [vmem:[%s1245_s18 + $0x28] sm:$0xff] }
  0x8b   : > { %v403_v4 = vadd.f32 %v402_v0, %v401_v3  ;;  %v424_v10 = vsel %vm228_vm0, %v362_v63, 0.0 }
  0x8d   : > { %v405_v35 = vadd.f32 %v404_v48, %v403_v4 }
  0x8f   : > { %v407_v55 = vadd.f32 %v406_v27, %v405_v35 }
  0x91   : > { %v409_v5 = vadd.f32 %v408_v38, %v407_v55  ;;  %v467_v55 = vld [vmem:[%s1245_s18] sm:$0xff] }
  0x93   : > { %v411_v47 = vadd.f32 %v410_v43, %v409_v5  ;;  %v469_v5 = vld [vmem:[%s1245_s18 + $0x10] sm:$0xff] }
  0x95   : > { %v413_v50 = vadd.f32 %v412_v34, %v411_v47  ;;  %v471_v34 = vld [vmem:[%s1245_s18 + $0x20] sm:$0xff] }
  0x97   : > { %v415_v59 = vadd.f32 %v414_v16, %v413_v50 }
  0x99   : > { %v417_v15 = vadd.f32 %v416_v56, %v415_v59  ;;  %v473_v56 = vld [vmem:[%s1245_s18 + $0x30] sm:$0xff]  ;;  %v474_v59 = vld [vmem:[%s1245_s18 + $0x38] sm:$0xff] }
  0x9b   : > { %v419_v61 = vadd.f32 %v418_v41, %v417_v15 }
  0x9d   : > { %v421_v14 = vadd.f32 %v420_v20, %v419_v61 }
  0x9f   : > { %v423_v0 = vadd.f32 %v422_v26, %v421_v14 }
  0xa1   : > { %v425_v3 = vadd.f32 %v424_v10, %v423_v0  ;;  %v475_v10 = vld [vmem:[%s1245_s18 + $0x40] sm:$0xff]  ;;  %v476_v0 = vld [vmem:[%s1245_s18 + $0x48] sm:$0xff] }
  0xa3   : > { %v426_v28 = vrot.slane %v425_v3, 4 }
  0xa5   : > { %v427_v48 = vadd.f32 %v426_v28, %v425_v3 }
  0xa7   : > { %v428_v4 = vrot.slane %v427_v48, 2 }
  0xa9   : > { %v429_v6 = vadd.f32 %v428_v4, %v427_v48 }
  0xab   : > { %v430_v27 = vrot.slane %v429_v6, 1 }
  0xad   : > { %v431_v35 = vadd.f32 %v430_v27, %v429_v6  ;;  %v477_v6 = vld [vmem:[%s1245_s18 + $0x50] sm:$0xff]  ;;  %v478_v27 = vld [vmem:[%s1245_s18 + $0x58] sm:$0xff] }
  0xaf   : > { %v432_v40 = vmul.f32 0.00390625, %v431_v35  ;;  %v479_v35 = vld [vmem:[%s1245_s18 + $0x60] sm:$0xff] }
  0xb1   : > { %v433_v38 = vadd.f32 1e-05, %v432_v40 }
  0xb3   : > { %766 = vrsqrt.f32 %v433_v38 }
  0xbd   : > { %v1249_v43 = vpop.eup %766 }
  0xbe   : > { %v435_v47 = vmul.f32 %v1249_v43, %v988_v19  ;;  %v436_v62 = vmul.f32 %v1249_v43, %v993_v22  ;;  %v437_v16 = vmul.f32 %v1249_v43, %v998_v29  ;;  %v438_v50 = vmul.f32 %v1249_v43, %v1003_v31 }
  0xbf   : > { %v439_v17 = vmul.f32 %v1249_v43, %v1008_v2  ;;  %v440_v41 = vmul.f32 %v1249_v43, %v1019_v1  ;;  %v441_v19 = vmul.f32 %v1249_v43, %v1026_v7  ;;  %v442_v22 = vmul.f32 %v1249_v43, %v1036_v13 }
  0xc0   : > { %v499_v29 = vadd.f32 %v467_v55, %v435_v47  ;;  %v500_v31 = vadd.f32 %v468_v42, %v436_v62  ;;  %v501_v2 = vadd.f32 %v469_v5, %v437_v16  ;;  %v502_v1 = vadd.f32 %v470_v52, %v438_v50 }
  0xc1   : > { %v503_v15 = vadd.f32 %v471_v34, %v439_v17  ;;  %v504_v63 = vadd.f32 %v472_v8, %v440_v41  ;;  %v505_v7 = vadd.f32 %v473_v56, %v441_v19  ;;  %v506_v20 = vadd.f32 %v474_v59, %v442_v22  ;;  %v483_v41 = vld [vmem:[%s1245_s18 + $0x80] sm:$0xff]  ;;  %v484_v19 = vld [vmem:[%s1245_s18 + $0x88] sm:$0xff] }
  0xc2   : > { %v531_v13 = vsel %vm228_vm0, %v499_v29, %v467_v55  ;;  %v532_v61 = vsel %vm228_vm0, %v500_v31, %v468_v42  ;;  %v533_v26 = vsel %vm228_vm0, %v501_v2, %v469_v5  ;;  %v534_v14 = vsel %vm228_vm0, %v502_v1, %v470_v52  ;;  %v480_v5 = vld [vmem:[%s1245_s18 + $0x68] sm:$0xff]  ;;  %v481_v52 = vld [vmem:[%s1245_s18 + $0x70] sm:$0xff] }
  0xc3   : > { %564 = vst.msk [vmem:[%s1276_s21] sm:$0xff] %vm563_vm1, %v531_v13  ;;  %565 = vst.msk [vmem:[%s1276_s21 + $0x8] sm:$0xff] %vm563_vm1, %v532_v61  ;;  %v535_v3 = vsel %vm228_vm0, %v503_v15, %v471_v34  ;;  %v536_v28 = vsel %vm228_vm0, %v504_v63, %v472_v8  ;;  %v537_v48 = vsel %vm228_vm0, %v505_v7, %v473_v56  ;;  %v482_v34 = vld [vmem:[%s1245_s18 + $0x78] sm:$0xff]  ;;  %v485_v1 = vld [vmem:[%s1245_s18 + $0x90] sm:$0xff] }
  0xc4   : > { %566 = vst.msk [vmem:[%s1276_s21 + $0x10] sm:$0xff] %vm563_vm1, %v533_v26  ;;  %567 = vst.msk [vmem:[%s1276_s21 + $0x18] sm:$0xff] %vm563_vm1, %v534_v14  ;;  %v538_v4 = vsel %vm228_vm0, %v506_v20, %v474_v59  ;;  %v443_v40 = vmul.f32 %v1249_v43, %v1044_v54  ;;  %v444_v38 = vmul.f32 %v1249_v43, %v1052_v11  ;;  %v486_v15 = vld [vmem:[%s1245_s18 + $0x98] sm:$0xff]  ;;  %v487_v63 = vld [vmem:[%s1245_s18 + $0xa0] sm:$0xff] }
  0xc5   : > { %568 = vst.msk [vmem:[%s1276_s21 + $0x20] sm:$0xff] %vm563_vm1, %v535_v3  ;;  %569 = vst.msk [vmem:[%s1276_s21 + $0x28] sm:$0xff] %vm563_vm1, %v536_v28  ;;  %v445_v55 = vmul.f32 %v1249_v43, %v1060_v23  ;;  %v446_v42 = vmul.f32 %v1249_v43, %v1068_v18  ;;  %v447_v47 = vmul.f32 %v1249_v43, %v1076_v30  ;;  %v488_v26 = vld [vmem:[%s1245_s18 + $0xa8] sm:$0xff]  ;;  %v489_v14 = vld [vmem:[%s1245_s18 + $0xb0] sm:$0xff] }
  0xc6   : > { %570 = vst.msk [vmem:[%s1276_s21 + $0x30] sm:$0xff] %vm563_vm1, %v537_v48  ;;  %571 = vst.msk [vmem:[%s1276_s21 + $0x38] sm:$0xff] %vm563_vm1, %v538_v4  ;;  %v448_v62 = vmul.f32 %v1249_v43, %v1084_v25  ;;  %v449_v54 = vmul.f32 %v1249_v43, %v1092_v37  ;;  %v450_v11 = vmul.f32 %v1249_v43, %v1100_v32 }
  0xc7   : > { %v507_v23 = vadd.f32 %v475_v10, %v443_v40  ;;  %v508_v18 = vadd.f32 %v476_v0, %v444_v38  ;;  %v509_v16 = vadd.f32 %v477_v6, %v445_v55  ;;  %v510_v50 = vadd.f32 %v478_v27, %v446_v42  ;;  %v491_v40 = vld [vmem:[%s1245_s18 + $0xc0] sm:$0xff]  ;;  %v492_v38 = vld [vmem:[%s1245_s18 + $0xc8] sm:$0xff] }
  0xc8   : > { %v511_v30 = vadd.f32 %v479_v35, %v447_v47  ;;  %v512_v8 = vadd.f32 %v480_v5, %v448_v62  ;;  %v513_v56 = vadd.f32 %v481_v52, %v449_v54  ;;  %v514_v25 = vadd.f32 %v482_v34, %v450_v11  ;;  %v494_v47 = vld [vmem:[%s1245_s18 + $0xd8] sm:$0xff]  ;;  %v495_v62 = vld [vmem:[%s1245_s18 + $0xe0] sm:$0xff] }
  0xc9   : > { %v539_v59 = vsel %vm228_vm0, %v507_v23, %v475_v10  ;;  %v540_v37 = vsel %vm228_vm0, %v508_v18, %v476_v0  ;;  %v541_v32 = vsel %vm228_vm0, %v509_v16, %v477_v6  ;;  %v542_v17 = vsel %vm228_vm0, %v510_v50, %v478_v27  ;;  %v490_v10 = vld [vmem:[%s1245_s18 + $0xb8] sm:$0xff]  ;;  %v496_v16 = vld [vmem:[%s1245_s18 + $0xe8] sm:$0xff]  ;;  %v497_v50 = vld [vmem:[%s1245_s18 + $0xf0] sm:$0xff] }
  0xca   : > { %572 = vst.msk [vmem:[%s1276_s21 + $0x40] sm:$0xff] %vm563_vm1, %v539_v59  ;;  %573 = vst.msk [vmem:[%s1276_s21 + $0x48] sm:$0xff] %vm563_vm1, %v540_v37  ;;  %v543_v22 = vsel %vm228_vm0, %v511_v30, %v479_v35  ;;  %v544_v29 = vsel %vm228_vm0, %v512_v8, %v480_v5  ;;  %v545_v31 = vsel %vm228_vm0, %v513_v56, %v481_v52  ;;  %v498_v30 = vld [vmem:[%s1245_s18 + $0xf8] sm:$0xff] }
  0xcb   : > { %574 = vst.msk [vmem:[%s1276_s21 + $0x50] sm:$0xff] %vm563_vm1, %v541_v32  ;;  %575 = vst.msk [vmem:[%s1276_s21 + $0x58] sm:$0xff] %vm563_vm1, %v542_v17  ;;  %v546_v2 = vsel %vm228_vm0, %v514_v25, %v482_v34  ;;  %v451_v7 = vmul.f32 %v1249_v43, %v1108_v44  ;;  %v452_v20 = vmul.f32 %v1249_v43, %v1116_v39  ;;  %v493_v34 = vld [vmem:[%s1245_s18 + $0xd0] sm:$0xff] }
  0xcc   : > { %576 = vst.msk [vmem:[%s1276_s21 + $0x60] sm:$0xff] %vm563_vm1, %v543_v22  ;;  %577 = vst.msk [vmem:[%s1276_s21 + $0x68] sm:$0xff] %vm563_vm1, %v544_v29  ;;  %v453_v13 = vmul.f32 %v1249_v43, %v1124_v51  ;;  %v454_v61 = vmul.f32 %v1249_v43, %v1132_v46  ;;  %v455_v0 = vmul.f32 %v1249_v43, %v1140_v58 }
  0xcd   : > { %578 = vst.msk [vmem:[%s1276_s21 + $0x70] sm:$0xff] %vm563_vm1, %v545_v31  ;;  %579 = vst.msk [vmem:[%s1276_s21 + $0x78] sm:$0xff] %vm563_vm1, %v546_v2  ;;  %v456_v3 = vmul.f32 %v1249_v43, %v1148_v53  ;;  %v457_v44 = vmul.f32 %v1249_v43, %v1156_v9  ;;  %v458_v39 = vmul.f32 %v1249_v43, %v1164_v60 }
  0xce   : > { %v515_v51 = vadd.f32 %v483_v41, %v451_v7  ;;  %v516_v46 = vadd.f32 %v484_v19, %v452_v20  ;;  %v517_v28 = vadd.f32 %v485_v1, %v453_v13  ;;  %v518_v48 = vadd.f32 %v486_v15, %v454_v61 }
  0xcf   : > { %v519_v58 = vadd.f32 %v487_v63, %v455_v0  ;;  %v520_v4 = vadd.f32 %v488_v26, %v456_v3  ;;  %v521_v6 = vadd.f32 %v489_v14, %v457_v44  ;;  %v522_v53 = vadd.f32 %v490_v10, %v458_v39 }
  0xd0   : > { %v547_v27 = vsel %vm228_vm0, %v515_v51, %v483_v41  ;;  %v548_v9 = vsel %vm228_vm0, %v516_v46, %v484_v19  ;;  %v549_v60 = vsel %vm228_vm0, %v517_v28, %v485_v1  ;;  %v550_v35 = vsel %vm228_vm0, %v518_v48, %v486_v15 }
  0xd1   : > { %580 = vst.msk [vmem:[%s1276_s21 + $0x80] sm:$0xff] %vm563_vm1, %v547_v27  ;;  %581 = vst.msk [vmem:[%s1276_s21 + $0x88] sm:$0xff] %vm563_vm1, %v548_v9  ;;  %v551_v55 = vsel %vm228_vm0, %v519_v58, %v487_v63  ;;  %v552_v42 = vsel %vm228_vm0, %v520_v4, %v488_v26  ;;  %v553_v5 = vsel %vm228_vm0, %v521_v6, %v489_v14 }
  0xd2   : > { %582 = vst.msk [vmem:[%s1276_s21 + $0x90] sm:$0xff] %vm563_vm1, %v549_v60  ;;  %583 = vst.msk [vmem:[%s1276_s21 + $0x98] sm:$0xff] %vm563_vm1, %v550_v35  ;;  %v554_v52 = vsel %vm228_vm0, %v522_v53, %v490_v10  ;;  %v459_v54 = vmul.f32 %v1249_v43, %v1172_v21  ;;  %v460_v11 = vmul.f32 %v1249_v43, %v1180_v12 }
  0xd3   : > { %584 = vst.msk [vmem:[%s1276_s21 + $0xa0] sm:$0xff] %vm563_vm1, %v551_v55  ;;  %585 = vst.msk [vmem:[%s1276_s21 + $0xa8] sm:$0xff] %vm563_vm1, %v552_v42  ;;  %v461_v23 = vmul.f32 %v1249_v43, %v1188_v33  ;;  %v462_v18 = vmul.f32 %v1249_v43, %v1196_v24  ;;  %v463_v8 = vmul.f32 %v1249_v43, %v1204_v45 }
  0xd4   : > { %586 = vst.msk [vmem:[%s1276_s21 + $0xb0] sm:$0xff] %vm563_vm1, %v553_v5  ;;  %587 = vst.msk [vmem:[%s1276_s21 + $0xb8] sm:$0xff] %vm563_vm1, %v554_v52  ;;  %v464_v56 = vmul.f32 %v1249_v43, %v1212_v36  ;;  %v465_v21 = vmul.f32 %v1249_v43, %v1220_v57  ;;  %v466_v12 = vmul.f32 %v1249_v43, %v1228_v49 }
  0xd5   : > { %v523_v33 = vadd.f32 %v491_v40, %v459_v54  ;;  %v524_v24 = vadd.f32 %v492_v38, %v460_v11  ;;  %v525_v25 = vadd.f32 %v493_v34, %v461_v23  ;;  %v526_v59 = vadd.f32 %v494_v47, %v462_v18 }
  0xd6   : > { %v527_v37 = vadd.f32 %v495_v62, %v463_v8  ;;  %v528_v45 = vadd.f32 %v496_v16, %v464_v56  ;;  %v529_v32 = vadd.f32 %v497_v50, %v465_v21  ;;  %v530_v36 = vadd.f32 %v498_v30, %v466_v12 }
  0xd7   : > { %v555_v17 = vsel %vm228_vm0, %v523_v33, %v491_v40  ;;  %v556_v57 = vsel %vm228_vm0, %v524_v24, %v492_v38  ;;  %v557_v41 = vsel %vm228_vm0, %v525_v25, %v493_v34  ;;  %v558_v49 = vsel %vm228_vm0, %v526_v59, %v494_v47 }
  0xd8   : > { %588 = vst.msk [vmem:[%s1276_s21 + $0xc0] sm:$0xff] %vm563_vm1, %v555_v17  ;;  %589 = vst.msk [vmem:[%s1276_s21 + $0xc8] sm:$0xff] %vm563_vm1, %v556_v57  ;;  %v559_v43 = vsel %vm228_vm0, %v527_v37, %v495_v62  ;;  %v560_v19 = vsel %vm228_vm0, %v528_v45, %v496_v16  ;;  %v561_v22 = vsel %vm228_vm0, %v529_v32, %v497_v50 }
  0xd9   : > { %590 = vst.msk [vmem:[%s1276_s21 + $0xd0] sm:$0xff] %vm563_vm1, %v557_v41  ;;  %591 = vst.msk [vmem:[%s1276_s21 + $0xd8] sm:$0xff] %vm563_vm1, %v558_v49  ;;  %v562_v29 = vsel %vm228_vm0, %v530_v36, %v498_v30 }
  0xda   : > { %592 = vst.msk [vmem:[%s1276_s21 + $0xe0] sm:$0xff] %vm563_vm1, %v559_v43  ;;  %593 = vst.msk [vmem:[%s1276_s21 + $0xe8] sm:$0xff] %vm563_vm1, %v560_v19 }
  0xdb   : > { %594 = vst.msk [vmem:[%s1276_s21 + $0xf0] sm:$0xff] %vm563_vm1, %v561_v22  ;;  %595 = vst.msk [vmem:[%s1276_s21 + $0xf8] sm:$0xff] %vm563_vm1, %v562_v29 }
  0xdc PF: > { %s12_s9 = sadd.s32 1, %s774_s9  }
  0xdd   : > { %p9_p4 = scmp.ge.s32.totalorder %s12_s9, 4  }
  0xdf   :  { %11 = sbr.rel (!%p9_p4) target bundleno = 1 (0x1), region = 61 }

// kernel: residual_oct_block.15
= control target key start
LH: loop header
LB: loop body
LE: loop exit
PB: predicated region body
PF: predicated region fallthrough
CT: control target
= control target key end

     0   :  { %s454_s9 = smov 0   ;;  %s530_s0 = inlined_call_operand.vmem [shape: bf16[2,64,1], index: 0, kind: input, shape index: {}]   ;;  %s531_s1 = inlined_call_operand.vmem [shape: f32[2,64,4], index: 1, kind: input, shape index: {}]   ;;  %s532_s2 = inlined_call_operand.vmem [shape: f32[2,64,4], index: 2, kind: output, shape index: {}]  }
   0x1 LB: > { %s384_s10 = sadd.s32 4294967295, %s436_s9   ;;  %p388_p0 = scmp.ge.s32.totalorder %s436_s9, 1  ;;  %s436_s9 = sphi %s454_s9, %s12_s9  }
   0x2   : > { %p122_p1 = scmp.lt.s32.totalorder %s436_s9, 3 }
   0x4   : > { %p123_p2 = pnand %p388_p0, %p122_p1 }
   0x5   : > { %p149_p3 = scmp.lt.s32.totalorder (!%p123_p2), %s384_s10, 1  ;;  %vm180_vm0 = vcmask (!%p123_p2), 7168   ;;  %s438_s15 = smov (!%p123_p2), 3   ;;  %vm299_vm1 = vcmask (!%p123_p2), 23552   ;;  %vm308_vm2 = vcmask (!%p123_p2), 31744  }
   0x6   : > { %126 = sbr.rel (%p123_p2) target bundleno = 227 (0xe3), region = 28 }
   0xd   : > { %s534_s10 = smov (!%p149_p3, %s384_s10), 1 }
   0xe   : > { %s397_s11 = sshll.u32 %s534_s10, 5  ;;  %s398_s16 = sshll.u32 %s534_s10, 6 }
   0xf   : > { %s153_s14 = scalar_lea.vmem %s530_s0, %s397_s11  ;;  %s488_s19 = scalar_lea.vmem %s531_s1, %s398_s16 }
  0x10   : > { %v401_v0 = vld [vmem:[%s153_s14] sm:$0xff]   ;;  %v416_v1 = vld [vmem:[%s153_s14 + $0x8] sm:$0xff]   ;;  %v417_v2 = vld [vmem:[%s153_s14 + $0x10] sm:$0xff]   ;;  %s495_s22 = scalar_lea.vmem %s532_s2, %s398_s16 }
  0x11   : > { %v402_v3 = vunpack.c.l.bf16 %v401_v0  ;;  %v403_v4 = vunpack.c.h.bf16 %v401_v0  ;;  %v406_v5 = vunpack.c.l.bf16 %v416_v1  ;;  %v407_v6 = vunpack.c.h.bf16 %v416_v1  ;;  %v418_v11 = vld [vmem:[%s153_s14 + $0x18] sm:$0xff]  }
  0x12   : > { %v410_v7 = vunpack.c.l.bf16 %v417_v2  ;;  %v411_v13 = vunpack.c.h.bf16 %v417_v2  ;;  %v414_v16 = vunpack.c.l.bf16 %v418_v11  ;;  %v415_v19 = vunpack.c.h.bf16 %v418_v11 }
  0x13   : > { %v181_v8 = vsel %vm180_vm0, %v402_v3, 0.0  ;;  %v182_v9 = vsel %vm180_vm0, %v403_v4, 0.0  ;;  %v184_v10 = vsel %vm180_vm0, %v406_v5, 0.0  ;;  %v186_v14 = vsel %vm180_vm0, %v407_v6, 0.0 }
  0x14   : > { %v183_v12 = vadd.f32 %v182_v9, %v181_v8  ;;  %v188_v17 = vsel %vm180_vm0, %v410_v7, 0.0  ;;  %v190_v20 = vsel %vm180_vm0, %v411_v13, 0.0  ;;  %v192_v22 = vsel %vm180_vm0, %v414_v16, 0.0 }
  0x15   : > { %v194_v24 = vsel %vm180_vm0, %v415_v19, 0.0 }
  0x16   : > { %v185_v15 = vadd.f32 %v184_v10, %v183_v12 }
  0x18   : > { %v187_v18 = vadd.f32 %v186_v14, %v185_v15 }
  0x1a   : > { %v189_v21 = vadd.f32 %v188_v17, %v187_v18  ;;  %v253_v18 = vld [vmem:[%s488_s19 + $0x10] sm:$0xff] }
  0x1c   : > { %v191_v23 = vadd.f32 %v190_v20, %v189_v21 }
  0x1e   : > { %v193_v25 = vadd.f32 %v192_v22, %v191_v23 }
  0x20   : > { %v195_v26 = vadd.f32 %v194_v24, %v193_v25  ;;  %v254_v24 = vld [vmem:[%s488_s19 + $0x18] sm:$0xff]  ;;  %v252_v25 = vld [vmem:[%s488_s19 + $0x8] sm:$0xff] }
  0x22   : > { %v196_v27 = vrot.slane %v195_v26, 4 }
  0x24   : > { %v197_v28 = vadd.f32 %v196_v27, %v195_v26 }
  0x26   : > { %v198_v29 = vrot.slane %v197_v28, 2 }
  0x28   : > { %v199_v30 = vadd.f32 %v198_v29, %v197_v28 }
  0x2a   : > { %v200_v31 = vrot.slane %v199_v30, 1 }
  0x2c   : > { %v201_v32 = vadd.f32 %v200_v31, %v199_v30 }
  0x2e   : > { %v202_v33 = vmul.f32 0.015625, %v201_v32  ;;  %v256_v32 = vld [vmem:[%s488_s19 + $0x28] sm:$0xff] }
  0x30   : > { %v203_v34 = vsub.f32 %v402_v3, %v202_v33  ;;  %v204_v35 = vsub.f32 %v403_v4, %v202_v33  ;;  %v205_v36 = vsub.f32 %v406_v5, %v202_v33  ;;  %v206_v37 = vsub.f32 %v407_v6, %v202_v33 }
  0x31   : > { %v207_v38 = vsub.f32 %v410_v7, %v202_v33  ;;  %v208_v39 = vsub.f32 %v411_v13, %v202_v33  ;;  %v209_v44 = vsub.f32 %v414_v16, %v202_v33  ;;  %v210_v50 = vsub.f32 %v415_v19, %v202_v33  ;;  %v251_v19 = vld [vmem:[%s488_s19] sm:$0xff] }
  0x32   : > { %v211_v40 = vmul.f32 %v203_v34, %v203_v34  ;;  %v212_v41 = vmul.f32 %v204_v35, %v204_v35  ;;  %v213_v42 = vmul.f32 %v205_v36, %v205_v36  ;;  %v214_v43 = vmul.f32 %v206_v37, %v206_v37  ;;  %v255_v33 = vld [vmem:[%s488_s19 + $0x20] sm:$0xff] }
  0x33   : > { %v215_v45 = vmul.f32 %v207_v38, %v207_v38  ;;  %v216_v51 = vmul.f32 %v208_v39, %v208_v39  ;;  %v217_v54 = vmul.f32 %v209_v44, %v209_v44  ;;  %v218_v57 = vmul.f32 %v210_v50, %v210_v50 }
  0x34   : > { %v219_v46 = vsel %vm180_vm0, %v211_v40, 0.0  ;;  %v220_v47 = vsel %vm180_vm0, %v212_v41, 0.0  ;;  %v222_v48 = vsel %vm180_vm0, %v213_v42, 0.0  ;;  %v224_v52 = vsel %vm180_vm0, %v214_v43, 0.0  ;;  %v258_v40 = vld [vmem:[%s488_s19 + $0x38] sm:$0xff]  ;;  %v257_v41 = vld [vmem:[%s488_s19 + $0x30] sm:$0xff] }
  0x35   : > { %v221_v49 = vadd.f32 %v220_v47, %v219_v46  ;;  %v226_v55 = vsel %vm180_vm0, %v215_v45, 0.0  ;;  %v228_v58 = vsel %vm180_vm0, %v216_v51, 0.0  ;;  %v230_v60 = vsel %vm180_vm0, %v217_v54, 0.0 }
  0x36   : > { %v232_v62 = vsel %vm180_vm0, %v218_v57, 0.0 }
  0x37   : > { %v223_v53 = vadd.f32 %v222_v48, %v221_v49 }
  0x39   : > { %v225_v56 = vadd.f32 %v224_v52, %v223_v53 }
  0x3b   : > { %v227_v59 = vadd.f32 %v226_v55, %v225_v56 }
  0x3d   : > { %v229_v61 = vadd.f32 %v228_v58, %v227_v59 }
  0x3f   : > { %v231_v63 = vadd.f32 %v230_v60, %v229_v61 }
  0x41   : > { %v233_v0 = vadd.f32 %v232_v62, %v231_v63 }
  0x43   : > { %v234_v1 = vrot.slane %v233_v0, 4 }
  0x45   : > { %v235_v2 = vadd.f32 %v234_v1, %v233_v0 }
  0x47   : > { %v236_v3 = vrot.slane %v235_v2, 2 }
  0x49   : > { %v237_v4 = vadd.f32 %v236_v3, %v235_v2 }
  0x4b   : > { %v238_v5 = vrot.slane %v237_v4, 1 }
  0x4d   : > { %v239_v6 = vadd.f32 %v238_v5, %v237_v4 }
  0x4f   : > { %v240_v7 = vmul.f32 0.015625, %v239_v6 }
  0x51   : > { %v241_v8 = vadd.f32 1e-05, %v240_v7 }
  0x53   : > { %428 = vrsqrt.f32 %v241_v8 }
  0x5d   : > { %v429_v9 = vpop.eup %428 }
  0x5e   : > { %v245_v10 = vmul.f32 %v429_v9, %v205_v36  ;;  %v243_v11 = vmul.f32 %v429_v9, %v203_v34  ;;  %v246_v12 = vmul.f32 %v429_v9, %v206_v37  ;;  %v244_v13 = vmul.f32 %v429_v9, %v204_v35 }
  0x5f   : > { %v248_v14 = vmul.f32 %v429_v9, %v208_v39  ;;  %v247_v15 = vmul.f32 %v429_v9, %v207_v38  ;;  %v250_v16 = vmul.f32 %v429_v9, %v210_v50  ;;  %v249_v17 = vmul.f32 %v429_v9, %v209_v44 }
  0x60   : > { %271 = vrot.lane.b32.xlu1 %v245_v10, %s438_s15  ;;  %267 = vrot.lane.b32.xlu0 %v243_v11, %s438_s15 }
  0x64   : > { %273 = vrot.lane.b32.xlu1 %v246_v12, %s438_s15  ;;  %269 = vrot.lane.b32.xlu0 %v244_v13, %s438_s15 }
  0x68   : > { %277 = vrot.lane.b32.xlu1 %v248_v14, %s438_s15  ;;  %275 = vrot.lane.b32.xlu0 %v247_v15, %s438_s15 }
  0x6c   : > { %281 = vrot.lane.b32.xlu1 %v250_v16, %s438_s15  ;;  %279 = vrot.lane.b32.xlu0 %v249_v17, %s438_s15 }
  0xd2   : > { %v272_v20 = vpop.permute.xlu1 %271  ;;  %v268_v21 = vpop.permute.xlu0 %267 }
  0xd3   : > { %v293_v22 = vadd.f32 %v272_v20, %v253_v18  ;;  %v291_v23 = vadd.f32 %v268_v21, %v251_v19 }
  0xd5   : > { %v302_v26 = vsel %vm299_vm1, %v253_v18, %v293_v22  ;;  %v300_v27 = vsel %vm299_vm1, %v251_v19, %v291_v23 }
  0xd6   : > { %311 = vst.msk [vmem:[%s495_s22 + $0x10] sm:$0xff] %vm308_vm2, %v302_v26  ;;  %309 = vst.msk [vmem:[%s495_s22] sm:$0xff] %vm308_vm2, %v300_v27  ;;  %v274_v28 = vpop.permute.xlu1 %273  ;;  %v270_v29 = vpop.permute.xlu0 %269 }
  0xd7   : > { %v294_v30 = vadd.f32 %v274_v28, %v254_v24  ;;  %v292_v31 = vadd.f32 %v270_v29, %v252_v25 }
  0xd9   : > { %v303_v34 = vsel %vm299_vm1, %v254_v24, %v294_v30  ;;  %v301_v35 = vsel %vm299_vm1, %v252_v25, %v292_v31 }
  0xda   : > { %312 = vst.msk [vmem:[%s495_s22 + $0x18] sm:$0xff] %vm308_vm2, %v303_v34  ;;  %310 = vst.msk [vmem:[%s495_s22 + $0x8] sm:$0xff] %vm308_vm2, %v301_v35  ;;  %v278_v36 = vpop.permute.xlu1 %277  ;;  %v276_v37 = vpop.permute.xlu0 %275 }
  0xdb   : > { %v296_v38 = vadd.f32 %v278_v36, %v256_v32  ;;  %v295_v39 = vadd.f32 %v276_v37, %v255_v33 }
  0xdd   : > { %v305_v42 = vsel %vm299_vm1, %v256_v32, %v296_v38  ;;  %v304_v43 = vsel %vm299_vm1, %v255_v33, %v295_v39 }
  0xde   : > { %314 = vst.msk [vmem:[%s495_s22 + $0x28] sm:$0xff] %vm308_vm2, %v305_v42  ;;  %313 = vst.msk [vmem:[%s495_s22 + $0x20] sm:$0xff] %vm308_vm2, %v304_v43  ;;  %v282_v44 = vpop.permute.xlu1 %281  ;;  %v280_v45 = vpop.permute.xlu0 %279 }
  0xdf   : > { %v298_v46 = vadd.f32 %v282_v44, %v258_v40  ;;  %v297_v47 = vadd.f32 %v280_v45, %v257_v41 }
  0xe1   : > { %v307_v48 = vsel %vm299_vm1, %v258_v40, %v298_v46  ;;  %v306_v49 = vsel %vm299_vm1, %v257_v41, %v297_v47 }
  0xe2   : > { %316 = vst.msk [vmem:[%s495_s22 + $0x38] sm:$0xff] %vm308_vm2, %v307_v48  ;;  %315 = vst.msk [vmem:[%s495_s22 + $0x30] sm:$0xff] %vm308_vm2, %v306_v49 }
  0xe3 PF: > { %s12_s9 = sadd.s32 1, %s436_s9  }
  0xe4   : > { %p9_p4 = scmp.ge.s32.totalorder %s12_s9, 4  }
  0xe6   :  { %11 = sbr.rel (!%p9_p4) target bundleno = 1 (0x1), region = 61 }

</bundles_post_ra>
